<compile_context>
chip_gen: v7x
topology: tpu7x:2x2x1
jax: 0.10.0
libtpu: 0.0.40
codegen_flags: <defaults>
</compile_context>

<pallas_src>
import functools
import math

import jax
import jax.numpy as jnp
from jax import lax
from jax.experimental import pallas as pl
from jax.experimental.pallas import tpu as pltpu


def _softmax_last(x):
    m = jnp.max(x, axis=-1, keepdims=True)
    e = jnp.exp(x - m)
    return e * pl.reciprocal(jnp.sum(e, axis=-1, keepdims=True), approx=True)


def _intra_rank(x, tie_mask):
    """Stable intra-row rank table.

    x: (R, D). Returns r with
      r[r_, p] = #{d : x[r_, d] < x[r_, p]} + #{d < p : x[r_, d] == x[r_, p]}
    i.e. the rank a stable sort assigns to element p among its own row.
    """
    xd = x[:, None, :]                       # value at position d -> (R, 1, D)
    xp = x[:, :, None]                       # value at position p -> (R, D, 1)
    lt = xd < xp                             # (R, D_p, D_d)
    tie = (xd == xp) & tie_mask[None, :, :]
    return jnp.sum(jnp.where(lt | tie, 1.0, 0.0), axis=-1)   # (R, D)


def _vrca_kernel(q_ref, k_ref, v_ref, w_ref, b_ref, o_ref, *,
                 rio, sup, eps, mu, inv_sigma, inv_norm):
    _, L, D = q_ref.shape
    _, TI, _ = k_ref.shape

    q = q_ref[0]                 # (L, D)   all query rows
    k = k_ref[0]                 # (TI, D)  this step's key-row tile
    v = v_ref[0]                 # (L, D)   all value rows

    wq, wk, wv2, wp = w_ref[0], w_ref[1], w_ref[2], w_ref[3]           # (D, D)
    bq, bk, bv2, bp = (b_ref[0:1, :], b_ref[1:2, :],
                       b_ref[2:3, :], b_ref[3:4, :])                   # (1, D)

    # 1x1-conv projections (weights pre-transposed / pre-fused by the wrapper).
    qp = _softmax_last(jnp.dot(q, wq, preferred_element_type=jnp.float32) + bq)   # (L, D)
    kp = _softmax_last(jnp.dot(k, wk, preferred_element_type=jnp.float32) + bk)   # (TI, D)
    # NB: the reference forward applies the value projection a second time;
    # wv2 / bv2 are the host-fused composition of both applications.
    vp2 = jnp.dot(v, wv2, preferred_element_type=jnp.float32) + bv2               # (L, D)

    # ---- Cucconi statistic over the pooled sample [qp[j,:], kp[i,:]] per (i, j) ----
    # torch.sort argsort is reproduced with stable pairwise ranks: pooled
    # position p is among the D smallest iff its stable rank < D.
    #   rank(q-side, p) = rq_intra[j, p] + #{d : kp[i, d] <  qp[j, p]}
    #   rank(k-side, p) = rk_intra[i, p] + #{d : qp[j, d] <= kp[i, p]}
    d_iota = lax.broadcasted_iota(jnp.int32, (D, D), 1)   # d varies along lanes
    p_iota = lax.broadcasted_iota(jnp.int32, (D, D), 0)   # p varies along sublanes
    tie_mask = d_iota < p_iota                            # (D_p, D_d)

    rq_intra = _intra_rank(qp, tie_mask)                  # (L, D)
    rk_intra = _intra_rank(kp, tie_mask)                  # (TI, D)
    thr_q = float(D) - rq_intra                           # select iff cross-count < thr
    thr_k = float(D) - rk_intra

    # Cross counts, batched over the whole (i, j, p) tile at once; layout [i,j,p,d].
    cross_qk = jnp.sum(
        jnp.where(kp[:, None, None, :] < qp[None, :, :, None], 1.0, 0.0),
        axis=-1)                                          # (TI, L, D): #{d: kp[i,d] <  qp[j,p]}
    sel_q = jnp.where(cross_qk < thr_q[None, :, :], 1.0, 0.0)           # (TI, L, D)

    cross_kq = jnp.sum(
        jnp.where(qp[None, :, None, :] <= kp[:, None, :, None], 1.0, 0.0),
        axis=-1)                                          # (TI, L, D): #{d: qp[j,d] <= kp[i,p]}
    sel_k = jnp.where(cross_kq < thr_k[:, None, :], 1.0, 0.0)           # (TI, L, D)

    # Weighted reductions against constant per-position rows:
    #   q-side pooled position p   contributes (p+1)^2   / (2D-p)^2,
    #   k-side pooled position D+p contributes (D+p+1)^2 / (D-p)^2.
    pos = lax.broadcasted_iota(jnp.int32, (1, 1, D), 2).astype(jnp.float32)
    a_q = pos + 1.0
    a_k = pos + float(D + 1)
    r_q = float(2 * D) - pos
    r_k = float(D) - pos
    sum_square = jnp.sum(sel_q * (a_q * a_q) + sel_k * (a_k * a_k), axis=-1)      # (TI, L)
    rev_sum_square = jnp.sum(sel_q * (r_q * r_q) + sel_k * (r_k * r_k), axis=-1)  # (TI, L)

    u = (6.0 * sum_square - mu) * inv_sigma
    w = (6.0 * rev_sum_square - mu) * inv_sigma
    c = (u * u + w * w - (2.0 * rio) * (u * w)) * inv_norm
    c = jnp.minimum(c, sup)

    scores = _softmax_last(-jnp.log(c + eps))             # (TI, L), softmax over j
    # TODO(synk): nn.Dropout(p=0.1) omitted — identity under eval/inference semantics.

    out = jnp.dot(scores, vp2, preferred_element_type=jnp.float32)      # (TI, D)
    out = jnp.dot(out, wp, preferred_element_type=jnp.float32) + bp
    o_ref[0] = out.astype(o_ref.dtype)


def vrca_cucconi_forward(queries, keys, values, params, *, dim, enc_in,
                         alpha=0.05, eps=1e-6, row_block=128):
    B, L, D = queries.shape
    assert L == enc_in and D == dim

    # module-level constants (exactly as in __init__), folded on the host.
    rio = 2 * (4 * dim ** 2 - 4) / ((dim * 4 + 1) * (dim * 16 + 11)) - 1
    sup = (math.sqrt(-8 * math.log(alpha)) / 2) ** 2 / (1 - rio)
    mu = dim * (dim * 2 + 1) * (dim * 4 + 1)
    sigma = math.sqrt(dim ** 2 * (dim * 2 + 1) * (dim * 4 + 1) * (dim * 16 + 11) / 5)

    wq, bq, wk, bk, wv, bv, wp, bp = params
    # pre-transpose conv weights (out, in) -> (in, out) so the kernel does x @ W.
    wq_t, wk_t, wv_t, wp_t = wq.T, wk.T, wv.T, wp.T
    # Fuse the double value projection: v @ Wv_t @ Wv_t + (bv @ Wv_t + bv).
    wv2 = (wv_t @ wv_t).astype(jnp.float32)
    bv2 = (bv @ wv_t + bv).astype(jnp.float32)

    w_pack = jnp.stack([wq_t, wk_t, wv2, wp_t], axis=0).astype(jnp.float32)   # (4, D, D)
    b_pack = jnp.stack([bq, bk, bv2, bp], axis=0).astype(jnp.float32)         # (4, D)

    # Key-row tile for the pairwise stage (second grid axis); fall back to the
    # full L when L is small or not divisible by the requested tile.
    ti = row_block if (L > row_block and L % row_block == 0) else L

    kernel = functools.partial(
        _vrca_kernel,
        rio=float(rio), sup=float(sup), eps=float(eps), mu=float(mu),
        inv_sigma=float(1.0 / sigma),
        inv_norm=float(1.0 / (2.0 * (1.0 - rio ** 2))))

    full_spec = pl.BlockSpec((1, L, D), lambda b, it: (b, 0, 0))
    tile_spec = pl.BlockSpec((1, ti, D), lambda b, it: (b, it, 0))
    w_spec = pl.BlockSpec((4, D, D), lambda b, it: (0, 0, 0))
    bias_spec = pl.BlockSpec((4, D), lambda b, it: (0, 0))

    return pl.pallas_call(
        kernel,
        out_shape=jax.ShapeDtypeStruct((B, L, D), jnp.float32),
        grid=(B, L // ti),
        in_specs=[full_spec, tile_spec, full_spec, w_spec, bias_spec],
        out_specs=tile_spec,
        compiler_params=pltpu.CompilerParams(
            dimension_semantics=("parallel", "parallel")),
    )(queries.astype(jnp.float32), keys.astype(jnp.float32),
      values.astype(jnp.float32), w_pack, b_pack)


if __name__ == "__main__":
    B, enc_in, dim = 2, 8, 8

    key = jax.random.PRNGKey(0)
    ks = jax.random.split(key, 11)
    queries = jax.random.normal(ks[0], (B, enc_in, dim), jnp.float32)
    keys_in = jax.random.normal(ks[1], (B, enc_in, dim), jnp.float32)
    values = jax.random.normal(ks[2], (B, enc_in, dim), jnp.float32)

    # deterministic Conv1d(k=1) parameters: weight (out=dim, in=dim), bias (dim,)
    scale = 1.0 / math.sqrt(dim)
    params = (
        jax.random.uniform(ks[3], (dim, dim), jnp.float32, -scale, scale),   # Wq
        jax.random.uniform(ks[4], (dim,), jnp.float32, -scale, scale),       # bq
        jax.random.uniform(ks[5], (dim, dim), jnp.float32, -scale, scale),   # Wk
        jax.random.uniform(ks[6], (dim,), jnp.float32, -scale, scale),       # bk
        jax.random.uniform(ks[7], (dim, dim), jnp.float32, -scale, scale),   # Wv
        jax.random.uniform(ks[8], (dim,), jnp.float32, -scale, scale),       # bv
        jax.random.uniform(ks[9], (dim, dim), jnp.float32, -scale, scale),   # Wp (projection)
        jax.random.uniform(ks[10], (dim,), jnp.float32, -scale, scale),      # bp
    )

    out = vrca_cucconi_forward(queries, keys_in, values, params,
                               dim=dim, enc_in=enc_in)
    out = jax.block_until_ready(out)
    assert out.shape == (B, enc_in, dim)
    assert bool(jnp.isfinite(out).all())
    print("KERNEL_OK")
</pallas_src>

<mosaic_0001>
module attributes {stable_mosaic.version = 11 : i64} {
  func.func @_vrca_kernel(%arg0: i32, %arg1: i32, %arg2: memref<1x8x8xf32, #tpu.memory_space<vmem>>, %arg3: memref<1x8x8xf32, #tpu.memory_space<vmem>>, %arg4: memref<1x8x8xf32, #tpu.memory_space<vmem>>, %arg5: memref<4x8x8xf32, #tpu.memory_space<vmem>>, %arg6: memref<4x8xf32, #tpu.memory_space<vmem>>, %arg7: memref<1x8x8xf32, #tpu.memory_space<vmem>>) attributes {dimension_semantics = [#tpu.dimension_semantics<parallel>, #tpu.dimension_semantics<parallel>], iteration_bounds = array<i64: 2, 1>, scalar_prefetch = 0 : i64, scratch_operands = 0 : i64, tpu.core_type = #tpu.core_type<tc>, window_params = [{transform_indices = @transform_0, window_bounds = array<i64: 1, 8, 8>}, {transform_indices = @transform_1, window_bounds = array<i64: 1, 8, 8>}, {transform_indices = @transform_2, window_bounds = array<i64: 1, 8, 8>}, {pipeline_mode = #tpu.pipeline_mode<synchronous>, transform_indices = @transform_3, window_bounds = array<i64: 4, 8, 8>}, {pipeline_mode = #tpu.pipeline_mode<synchronous>, transform_indices = @transform_4, window_bounds = array<i64: 4, 8>}, {transform_indices = @transform_5, window_bounds = array<i64: 1, 8, 8>}]} {
    %c0 = arith.constant 0 : index
    %c0_0 = arith.constant 0 : index
    %c0_1 = arith.constant 0 : index
    %0 = vector.load %arg2[%c0, %c0_0, %c0_1] : memref<1x8x8xf32, #tpu.memory_space<vmem>>, vector<1x8x8xf32>
    %1 = vector.shape_cast %0 : vector<1x8x8xf32> to vector<8x8xf32>
    %c0_2 = arith.constant 0 : index
    %c0_3 = arith.constant 0 : index
    %c0_4 = arith.constant 0 : index
    %2 = vector.load %arg3[%c0_2, %c0_3, %c0_4] : memref<1x8x8xf32, #tpu.memory_space<vmem>>, vector<1x8x8xf32>
    %3 = vector.shape_cast %2 : vector<1x8x8xf32> to vector<8x8xf32>
    %c0_5 = arith.constant 0 : index
    %c0_6 = arith.constant 0 : index
    %c0_7 = arith.constant 0 : index
    %4 = vector.load %arg4[%c0_5, %c0_6, %c0_7] : memref<1x8x8xf32, #tpu.memory_space<vmem>>, vector<1x8x8xf32>
    %5 = vector.shape_cast %4 : vector<1x8x8xf32> to vector<8x8xf32>
    %c0_8 = arith.constant 0 : index
    %c0_9 = arith.constant 0 : index
    %c0_10 = arith.constant 0 : index
    %6 = vector.load %arg5[%c0_8, %c0_9, %c0_10] : memref<4x8x8xf32, #tpu.memory_space<vmem>>, vector<1x8x8xf32>
    %7 = vector.shape_cast %6 : vector<1x8x8xf32> to vector<8x8xf32>
    %c1 = arith.constant 1 : index
    %c0_11 = arith.constant 0 : index
    %c0_12 = arith.constant 0 : index
    %8 = vector.load %arg5[%c1, %c0_11, %c0_12] : memref<4x8x8xf32, #tpu.memory_space<vmem>>, vector<1x8x8xf32>
    %9 = vector.shape_cast %8 : vector<1x8x8xf32> to vector<8x8xf32>
    %c2 = arith.constant 2 : index
    %c0_13 = arith.constant 0 : index
    %c0_14 = arith.constant 0 : index
    %10 = vector.load %arg5[%c2, %c0_13, %c0_14] : memref<4x8x8xf32, #tpu.memory_space<vmem>>, vector<1x8x8xf32>
    %11 = vector.shape_cast %10 : vector<1x8x8xf32> to vector<8x8xf32>
    %c3 = arith.constant 3 : index
    %c0_15 = arith.constant 0 : index
    %c0_16 = arith.constant 0 : index
    %12 = vector.load %arg5[%c3, %c0_15, %c0_16] : memref<4x8x8xf32, #tpu.memory_space<vmem>>, vector<1x8x8xf32>
    %13 = vector.shape_cast %12 : vector<1x8x8xf32> to vector<8x8xf32>
    %c0_17 = arith.constant 0 : index
    %c0_18 = arith.constant 0 : index
    %14 = vector.load %arg6[%c0_17, %c0_18] : memref<4x8xf32, #tpu.memory_space<vmem>>, vector<1x8xf32>
    %c1_19 = arith.constant 1 : index
    %c0_20 = arith.constant 0 : index
    %15 = vector.load %arg6[%c1_19, %c0_20] : memref<4x8xf32, #tpu.memory_space<vmem>>, vector<1x8xf32>
    %c2_21 = arith.constant 2 : index
    %c0_22 = arith.constant 0 : index
    %16 = vector.load %arg6[%c2_21, %c0_22] : memref<4x8xf32, #tpu.memory_space<vmem>>, vector<1x8xf32>
    %c3_23 = arith.constant 3 : index
    %c0_24 = arith.constant 0 : index
    %17 = vector.load %arg6[%c3_23, %c0_24] : memref<4x8xf32, #tpu.memory_space<vmem>>, vector<1x8xf32>
    %cst = arith.constant dense<0.000000e+00> : vector<8x8xf32>
    %18 = tpu.matmul %1, %7, %cst {dimension_numbers = #tpu.dot_dimension_numbers<[1], [0], [0], [1], [0, 0, 1, 1], [], []>} : vector<8x8xf32>, vector<8x8xf32>, vector<8x8xf32> -> vector<8x8xf32>
    %19 = vector.broadcast %14 : vector<1x8xf32> to vector<8x8xf32>
    %20 = arith.addf %18, %19 : vector<8x8xf32>
    %cst_25 = arith.constant dense<0xFF800000> : vector<8xf32>
    %21 = vector.multi_reduction <maximumf>, %20, %cst_25 [1] : vector<8x8xf32> to vector<8xf32>
    %22 = vector.shape_cast %21 : vector<8xf32> to vector<8x1xf32>
    %23 = vector.broadcast %22 : vector<8x1xf32> to vector<8x8xf32>
    %24 = arith.subf %20, %23 : vector<8x8xf32>
    %25 = math.exp %24 : vector<8x8xf32>
    %cst_26 = arith.constant dense<0.000000e+00> : vector<8xf32>
    %26 = vector.multi_reduction <add>, %25, %cst_26 [1] : vector<8x8xf32> to vector<8xf32>
    %27 = vector.shape_cast %26 : vector<8xf32> to vector<8x1xf32>
    %28 = tpu.reciprocal %27 {approx = true} : vector<8x1xf32> -> vector<8x1xf32>
    %29 = vector.broadcast %28 : vector<8x1xf32> to vector<8x8xf32>
    %30 = arith.mulf %25, %29 : vector<8x8xf32>
    %cst_27 = arith.constant dense<0.000000e+00> : vector<8x8xf32>
    %31 = tpu.matmul %3, %9, %cst_27 {dimension_numbers = #tpu.dot_dimension_numbers<[1], [0], [0], [1], [0, 0, 1, 1], [], []>} : vector<8x8xf32>, vector<8x8xf32>, vector<8x8xf32> -> vector<8x8xf32>
    %32 = vector.broadcast %15 : vector<1x8xf32> to vector<8x8xf32>
    %33 = arith.addf %31, %32 : vector<8x8xf32>
    %cst_28 = arith.constant dense<0xFF800000> : vector<8xf32>
    %34 = vector.multi_reduction <maximumf>, %33, %cst_28 [1] : vector<8x8xf32> to vector<8xf32>
    %35 = vector.shape_cast %34 : vector<8xf32> to vector<8x1xf32>
    %36 = vector.broadcast %35 : vector<8x1xf32> to vector<8x8xf32>
    %37 = arith.subf %33, %36 : vector<8x8xf32>
    %38 = math.exp %37 : vector<8x8xf32>
    %cst_29 = arith.constant dense<0.000000e+00> : vector<8xf32>
    %39 = vector.multi_reduction <add>, %38, %cst_29 [1] : vector<8x8xf32> to vector<8xf32>
    %40 = vector.shape_cast %39 : vector<8xf32> to vector<8x1xf32>
    %41 = tpu.reciprocal %40 {approx = true} : vector<8x1xf32> -> vector<8x1xf32>
    %42 = vector.broadcast %41 : vector<8x1xf32> to vector<8x8xf32>
    %43 = arith.mulf %38, %42 : vector<8x8xf32>
    %cst_30 = arith.constant dense<0.000000e+00> : vector<8x8xf32>
    %44 = tpu.matmul %5, %11, %cst_30 {dimension_numbers = #tpu.dot_dimension_numbers<[1], [0], [0], [1], [0, 0, 1, 1], [], []>} : vector<8x8xf32>, vector<8x8xf32>, vector<8x8xf32> -> vector<8x8xf32>
    %45 = vector.broadcast %16 : vector<1x8xf32> to vector<8x8xf32>
    %46 = arith.addf %44, %45 : vector<8x8xf32>
    %47 = tpu.iota {dimensions = array<i32: 1>} : vector<8x8xi32>
    %48 = tpu.iota {dimensions = array<i32: 0>} : vector<8x8xi32>
    %49 = arith.cmpi slt, %47, %48 : vector<8x8xi32>
    %50 = vector.shape_cast %30 : vector<8x8xf32> to vector<8x1x8xf32>
    %51 = vector.shape_cast %30 : vector<8x8xf32> to vector<8x8x1xf32>
    %52 = vector.broadcast %50 : vector<8x1x8xf32> to vector<8x8x8xf32>
    %53 = vector.broadcast %51 : vector<8x8x1xf32> to vector<8x8x8xf32>
    %54 = arith.cmpf olt, %52, %53 : vector<8x8x8xf32>
    %55 = vector.broadcast %50 : vector<8x1x8xf32> to vector<8x8x8xf32>
    %56 = vector.broadcast %51 : vector<8x8x1xf32> to vector<8x8x8xf32>
    %57 = arith.cmpf oeq, %55, %56 : vector<8x8x8xf32>
    %58 = vector.shape_cast %49 : vector<8x8xi1> to vector<1x8x8xi1>
    %59 = vector.broadcast %58 : vector<1x8x8xi1> to vector<8x8x8xi1>
    %60 = arith.andi %57, %59 : vector<8x8x8xi1>
    %61 = arith.ori %54, %60 : vector<8x8x8xi1>
    %cst_31 = arith.constant 1.000000e+00 : f32
    %cst_32 = arith.constant 0.000000e+00 : f32
    %62 = vector.broadcast %cst_31 : f32 to vector<8x8x8xf32>
    %63 = vector.broadcast %cst_32 : f32 to vector<8x8x8xf32>
    %64 = arith.select %61, %62, %63 : vector<8x8x8xi1>, vector<8x8x8xf32>
    %cst_33 = arith.constant dense<0.000000e+00> : vector<8x8xf32>
    %65 = vector.multi_reduction <add>, %64, %cst_33 [2] : vector<8x8x8xf32> to vector<8x8xf32>
    %66 = vector.shape_cast %43 : vector<8x8xf32> to vector<8x1x8xf32>
    %67 = vector.shape_cast %43 : vector<8x8xf32> to vector<8x8x1xf32>
    %68 = vector.broadcast %66 : vector<8x1x8xf32> to vector<8x8x8xf32>
    %69 = vector.broadcast %67 : vector<8x8x1xf32> to vector<8x8x8xf32>
    %70 = arith.cmpf olt, %68, %69 : vector<8x8x8xf32>
    %71 = vector.broadcast %66 : vector<8x1x8xf32> to vector<8x8x8xf32>
    %72 = vector.broadcast %67 : vector<8x8x1xf32> to vector<8x8x8xf32>
    %73 = arith.cmpf oeq, %71, %72 : vector<8x8x8xf32>
    %74 = vector.shape_cast %49 : vector<8x8xi1> to vector<1x8x8xi1>
    %75 = vector.broadcast %74 : vector<1x8x8xi1> to vector<8x8x8xi1>
    %76 = arith.andi %73, %75 : vector<8x8x8xi1>
    %77 = arith.ori %70, %76 : vector<8x8x8xi1>
    %cst_34 = arith.constant 1.000000e+00 : f32
    %cst_35 = arith.constant 0.000000e+00 : f32
    %78 = vector.broadcast %cst_34 : f32 to vector<8x8x8xf32>
    %79 = vector.broadcast %cst_35 : f32 to vector<8x8x8xf32>
    %80 = arith.select %77, %78, %79 : vector<8x8x8xi1>, vector<8x8x8xf32>
    %cst_36 = arith.constant dense<0.000000e+00> : vector<8x8xf32>
    %81 = vector.multi_reduction <add>, %80, %cst_36 [2] : vector<8x8x8xf32> to vector<8x8xf32>
    %cst_37 = arith.constant 8.000000e+00 : f32
    %82 = vector.broadcast %cst_37 : f32 to vector<8x8xf32>
    %83 = arith.subf %82, %65 : vector<8x8xf32>
    %cst_38 = arith.constant 8.000000e+00 : f32
    %84 = vector.broadcast %cst_38 : f32 to vector<8x8xf32>
    %85 = arith.subf %84, %81 : vector<8x8xf32>
    %86 = vector.shape_cast %43 : vector<8x8xf32> to vector<8x1x1x8xf32>
    %87 = vector.shape_cast %30 : vector<8x8xf32> to vector<1x8x8x1xf32>
    %88 = vector.broadcast %86 : vector<8x1x1x8xf32> to vector<8x8x8x8xf32>
    %89 = vector.broadcast %87 : vector<1x8x8x1xf32> to vector<8x8x8x8xf32>
    %90 = arith.cmpf olt, %88, %89 : vector<8x8x8x8xf32>
    %cst_39 = arith.constant 1.000000e+00 : f32
    %cst_40 = arith.constant 0.000000e+00 : f32
    %91 = vector.broadcast %cst_39 : f32 to vector<8x8x8x8xf32>
    %92 = vector.broadcast %cst_40 : f32 to vector<8x8x8x8xf32>
    %93 = arith.select %90, %91, %92 : vector<8x8x8x8xi1>, vector<8x8x8x8xf32>
    %cst_41 = arith.constant dense<0.000000e+00> : vector<8x8x8xf32>
    %94 = vector.multi_reduction <add>, %93, %cst_41 [3] : vector<8x8x8x8xf32> to vector<8x8x8xf32>
    %95 = vector.shape_cast %83 : vector<8x8xf32> to vector<1x8x8xf32>
    %96 = vector.broadcast %95 : vector<1x8x8xf32> to vector<8x8x8xf32>
    %97 = arith.cmpf olt, %94, %96 : vector<8x8x8xf32>
    %cst_42 = arith.constant 1.000000e+00 : f32
    %cst_43 = arith.constant 0.000000e+00 : f32
    %98 = vector.broadcast %cst_42 : f32 to vector<8x8x8xf32>
    %99 = vector.broadcast %cst_43 : f32 to vector<8x8x8xf32>
    %100 = arith.select %97, %98, %99 : vector<8x8x8xi1>, vector<8x8x8xf32>
    %101 = vector.shape_cast %30 : vector<8x8xf32> to vector<1x8x1x8xf32>
    %102 = vector.shape_cast %43 : vector<8x8xf32> to vector<8x1x8x1xf32>
    %103 = vector.broadcast %101 : vector<1x8x1x8xf32> to vector<8x8x8x8xf32>
    %104 = vector.broadcast %102 : vector<8x1x8x1xf32> to vector<8x8x8x8xf32>
    %105 = arith.cmpf ole, %103, %104 : vector<8x8x8x8xf32>
    %cst_44 = arith.constant 1.000000e+00 : f32
    %cst_45 = arith.constant 0.000000e+00 : f32
    %106 = vector.broadcast %cst_44 : f32 to vector<8x8x8x8xf32>
    %107 = vector.broadcast %cst_45 : f32 to vector<8x8x8x8xf32>
    %108 = arith.select %105, %106, %107 : vector<8x8x8x8xi1>, vector<8x8x8x8xf32>
    %cst_46 = arith.constant dense<0.000000e+00> : vector<8x8x8xf32>
    %109 = vector.multi_reduction <add>, %108, %cst_46 [3] : vector<8x8x8x8xf32> to vector<8x8x8xf32>
    %110 = vector.shape_cast %85 : vector<8x8xf32> to vector<8x1x8xf32>
    %111 = vector.broadcast %110 : vector<8x1x8xf32> to vector<8x8x8xf32>
    %112 = arith.cmpf olt, %109, %111 : vector<8x8x8xf32>
    %cst_47 = arith.constant 1.000000e+00 : f32
    %cst_48 = arith.constant 0.000000e+00 : f32
    %113 = vector.broadcast %cst_47 : f32 to vector<8x8x8xf32>
    %114 = vector.broadcast %cst_48 : f32 to vector<8x8x8xf32>
    %115 = arith.select %112, %113, %114 : vector<8x8x8xi1>, vector<8x8x8xf32>
    %116 = tpu.iota {dimensions = array<i32: 2>} : vector<1x1x8xi32>
    %117 = arith.sitofp %116 : vector<1x1x8xi32> to vector<1x1x8xf32>
    %cst_49 = arith.constant 1.000000e+00 : f32
    %118 = vector.broadcast %cst_49 : f32 to vector<1x1x8xf32>
    %119 = arith.addf %117, %118 : vector<1x1x8xf32>
    %cst_50 = arith.constant 9.000000e+00 : f32
    %120 = vector.broadcast %cst_50 : f32 to vector<1x1x8xf32>
    %121 = arith.addf %117, %120 : vector<1x1x8xf32>
    %cst_51 = arith.constant 1.600000e+01 : f32
    %122 = vector.broadcast %cst_51 : f32 to vector<1x1x8xf32>
    %123 = arith.subf %122, %117 : vector<1x1x8xf32>
    %cst_52 = arith.constant 8.000000e+00 : f32
    %124 = vector.broadcast %cst_52 : f32 to vector<1x1x8xf32>
    %125 = arith.subf %124, %117 : vector<1x1x8xf32>
    %126 = arith.mulf %119, %119 : vector<1x1x8xf32>
    %127 = vector.broadcast %126 : vector<1x1x8xf32> to vector<8x8x8xf32>
    %128 = arith.mulf %100, %127 : vector<8x8x8xf32>
    %129 = arith.mulf %121, %121 : vector<1x1x8xf32>
    %130 = vector.broadcast %129 : vector<1x1x8xf32> to vector<8x8x8xf32>
    %131 = arith.mulf %115, %130 : vector<8x8x8xf32>
    %132 = arith.addf %128, %131 : vector<8x8x8xf32>
    %cst_53 = arith.constant dense<0.000000e+00> : vector<8x8xf32>
    %133 = vector.multi_reduction <add>, %132, %cst_53 [2] : vector<8x8x8xf32> to vector<8x8xf32>
    %134 = arith.mulf %123, %123 : vector<1x1x8xf32>
    %135 = vector.broadcast %134 : vector<1x1x8xf32> to vector<8x8x8xf32>
    %136 = arith.mulf %100, %135 : vector<8x8x8xf32>
    %137 = arith.mulf %125, %125 : vector<1x1x8xf32>
    %138 = vector.broadcast %137 : vector<1x1x8xf32> to vector<8x8x8xf32>
    %139 = arith.mulf %115, %138 : vector<8x8x8xf32>
    %140 = arith.addf %136, %139 : vector<8x8x8xf32>
    %cst_54 = arith.constant dense<0.000000e+00> : vector<8x8xf32>
    %141 = vector.multi_reduction <add>, %140, %cst_54 [2] : vector<8x8x8xf32> to vector<8x8xf32>
    %cst_55 = arith.constant 6.000000e+00 : f32
    %142 = vector.broadcast %cst_55 : f32 to vector<8x8xf32>
    %143 = arith.mulf %142, %133 : vector<8x8xf32>
    %cst_56 = arith.constant 4.488000e+03 : f32
    %144 = vector.broadcast %cst_56 : f32 to vector<8x8xf32>
    %145 = arith.subf %143, %144 : vector<8x8xf32>
    %cst_57 = arith.constant 0.00100093568 : f32
    %146 = vector.broadcast %cst_57 : f32 to vector<8x8xf32>
    %147 = arith.mulf %145, %146 : vector<8x8xf32>
    %cst_58 = arith.constant 6.000000e+00 : f32
    %148 = vector.broadcast %cst_58 : f32 to vector<8x8xf32>
    %149 = arith.mulf %148, %141 : vector<8x8xf32>
    %cst_59 = arith.constant 4.488000e+03 : f32
    %150 = vector.broadcast %cst_59 : f32 to vector<8x8xf32>
    %151 = arith.subf %149, %150 : vector<8x8xf32>
    %cst_60 = arith.constant 0.00100093568 : f32
    %152 = vector.broadcast %cst_60 : f32 to vector<8x8xf32>
    %153 = arith.mulf %151, %152 : vector<8x8xf32>
    %154 = arith.mulf %147, %147 : vector<8x8xf32>
    %155 = arith.mulf %153, %153 : vector<8x8xf32>
    %156 = arith.addf %154, %155 : vector<8x8xf32>
    %157 = arith.mulf %147, %153 : vector<8x8xf32>
    %cst_61 = arith.constant -1.78024852 : f32
    %158 = vector.broadcast %cst_61 : f32 to vector<8x8xf32>
    %159 = arith.mulf %158, %157 : vector<8x8xf32>
    %160 = arith.subf %156, %159 : vector<8x8xf32>
    %cst_62 = arith.constant 2.40756416 : f32
    %161 = vector.broadcast %cst_62 : f32 to vector<8x8xf32>
    %162 = arith.mulf %160, %161 : vector<8x8xf32>
    %cst_63 = arith.constant 3.16987872 : f32
    %163 = vector.broadcast %cst_63 : f32 to vector<8x8xf32>
    %164 = arith.minimumf %162, %163 : vector<8x8xf32>
    %cst_64 = arith.constant 9.99999997E-7 : f32
    %165 = vector.broadcast %cst_64 : f32 to vector<8x8xf32>
    %166 = arith.addf %164, %165 : vector<8x8xf32>
    %167 = math.log %166 : vector<8x8xf32>
    %cst_65 = arith.constant 0.000000e+00 : f32
    %168 = vector.broadcast %cst_65 : f32 to vector<8x8xf32>
    %169 = arith.subf %168, %167 : vector<8x8xf32>
    %cst_66 = arith.constant dense<0xFF800000> : vector<8xf32>
    %170 = vector.multi_reduction <maximumf>, %169, %cst_66 [1] : vector<8x8xf32> to vector<8xf32>
    %171 = vector.shape_cast %170 : vector<8xf32> to vector<8x1xf32>
    %172 = vector.broadcast %171 : vector<8x1xf32> to vector<8x8xf32>
    %173 = arith.subf %169, %172 : vector<8x8xf32>
    %174 = math.exp %173 : vector<8x8xf32>
    %cst_67 = arith.constant dense<0.000000e+00> : vector<8xf32>
    %175 = vector.multi_reduction <add>, %174, %cst_67 [1] : vector<8x8xf32> to vector<8xf32>
    %176 = vector.shape_cast %175 : vector<8xf32> to vector<8x1xf32>
    %177 = tpu.reciprocal %176 {approx = true} : vector<8x1xf32> -> vector<8x1xf32>
    %178 = vector.broadcast %177 : vector<8x1xf32> to vector<8x8xf32>
    %179 = arith.mulf %174, %178 : vector<8x8xf32>
    %cst_68 = arith.constant dense<0.000000e+00> : vector<8x8xf32>
    %180 = tpu.matmul %179, %46, %cst_68 {dimension_numbers = #tpu.dot_dimension_numbers<[1], [0], [0], [1], [0, 0, 1, 1], [], []>} : vector<8x8xf32>, vector<8x8xf32>, vector<8x8xf32> -> vector<8x8xf32>
    %cst_69 = arith.constant dense<0.000000e+00> : vector<8x8xf32>
    %181 = tpu.matmul %180, %13, %cst_69 {dimension_numbers = #tpu.dot_dimension_numbers<[1], [0], [0], [1], [0, 0, 1, 1], [], []>} : vector<8x8xf32>, vector<8x8xf32>, vector<8x8xf32> -> vector<8x8xf32>
    %182 = vector.broadcast %17 : vector<1x8xf32> to vector<8x8xf32>
    %183 = arith.addf %181, %182 : vector<8x8xf32>
    %c0_70 = arith.constant 0 : index
    %c0_71 = arith.constant 0 : index
    %c0_72 = arith.constant 0 : index
    %184 = vector.load %arg7[%c0_70, %c0_71, %c0_72] : memref<1x8x8xf32, #tpu.memory_space<vmem>>, vector<1x8x8xf32>
    %185 = vector.shape_cast %184 : vector<1x8x8xf32> to vector<8x8xf32>
    %186 = vector.shape_cast %183 : vector<8x8xf32> to vector<1x8x8xf32>
    tpu.vector_store %arg7[%c0_70, %c0_71, %c0_72], %186 {strides = array<i32>} : memref<1x8x8xf32, #tpu.memory_space<vmem>>, vector<1x8x8xf32>,
    return
  }
  func.func @transform_0(%arg0: i32, %arg1: i32) -> (i32, i32, i32) {
    %c0_i32 = arith.constant 0 : i32
    %c0_i32_0 = arith.constant 0 : i32
    %c0_i32_1 = arith.constant 0 : i32
    return %arg0, %c0_i32, %c0_i32_0 : i32, i32, i32
  }
  func.func @transform_1(%arg0: i32, %arg1: i32) -> (i32, i32, i32) {
    %c0_i32 = arith.constant 0 : i32
    %c0_i32_0 = arith.constant 0 : i32
    return %arg0, %arg1, %c0_i32 : i32, i32, i32
  }
  func.func @transform_2(%arg0: i32, %arg1: i32) -> (i32, i32, i32) {
    %c0_i32 = arith.constant 0 : i32
    %c0_i32_0 = arith.constant 0 : i32
    %c0_i32_1 = arith.constant 0 : i32
    return %arg0, %c0_i32, %c0_i32_0 : i32, i32, i32
  }
  func.func @transform_3(%arg0: i32, %arg1: i32) -> (i32, i32, i32) {
    %c0_i32 = arith.constant 0 : i32
    %c0_i32_0 = arith.constant 0 : i32
    %c0_i32_1 = arith.constant 0 : i32
    %c0_i32_2 = arith.constant 0 : i32
    return %c0_i32, %c0_i32_0, %c0_i32_1 : i32, i32, i32
  }
  func.func @transform_4(%arg0: i32, %arg1: i32) -> (i32, i32) {
    %c0_i32 = arith.constant 0 : i32
    %c0_i32_0 = arith.constant 0 : i32
    %c0_i32_1 = arith.constant 0 : i32
    return %c0_i32, %c0_i32_0 : i32, i32
  }
  func.func @transform_5(%arg0: i32, %arg1: i32) -> (i32, i32, i32) {
    %c0_i32 = arith.constant 0 : i32
    %c0_i32_0 = arith.constant 0 : i32
    return %arg0, %arg1, %c0_i32 : i32, i32, i32
  }
}

</mosaic_0001>

<bundles_post_ra>
// kernel: tpu_custom_call.1
= control target key start
LH: loop header
LB: loop body
LE: loop exit
PB: predicated region body
PF: predicated region fallthrough
CT: control target
= control target key end

     0   :  { %s7633_s0 = inlined_call_operand.hbm [shape: f32[2,8,8], index: 0, kind: input, shape index: {}]   ;;  %s7634_s1 = inlined_call_operand.hbm [shape: f32[2,8,8], index: 1, kind: input, shape index: {}]   ;;  %s7635_s2 = inlined_call_operand.hbm [shape: f32[2,8,8], index: 2, kind: input, shape index: {}]   ;;  %s7636_s3 = inlined_call_operand.hbm [shape: f32[4,8,8], index: 3, kind: input, shape index: {}]   ;;  %s7637_s4 = inlined_call_operand.vmem [shape: f32[4,8], index: 4, kind: input, shape index: {}]   ;;  %s7638_s5 = inlined_call_operand.hbm [shape: f32[2,8,8], index: 5, kind: output, shape index: {}]  }
   0x1   :  { %7680 = sst [smem:[#allocation126_spill]] %s7634_s1 }
   0x2   :  { %7681 = sst [smem:[#allocation127_spill]] %s7638_s5 }
   0x3   :  { %10 = vsyncpa [#allocation3], 0 }
   0x4   :  { %12 = vsyncpa [#allocation3 + $0x1], 0 }
   0x5   :  { %13 = vsyncpa [#allocation6], 0 }
   0x6   :  { %15 = vsyncpa [#allocation6 + $0x1], 0 }
   0x7   :  { %16 = vsyncpa [#allocation9], 0 }
   0x8   :  { %17 = vsyncpa [#allocation4], 0 }
   0x9   :  { %19 = vsyncpa [#allocation4 + $0x1], 0  ;;  %s4789_s18 = smov 0   ;;  %s4791_s19 = smov 0  }
   0xa   :  { %s4793_s20 = smov 0   ;;  %s4795_s21 = smov 0  }
   0xb   :  { %s4797_s22 = smov 0   ;;  %s4799_s23 = smov 0  }
   0xc LB: > { %7682 = sst [smem:[#allocation15_spill]] %s4726_s18  ;;  %s37_s24 = sadd.s32 1, %s4742_s22  ;;  %s4746_s23 = sphi %s4799_s23, %s25_s23   ;;  %s4742_s22 = sphi %s4797_s22, %s8024_s22   ;;  %s4738_s21 = sphi %s4795_s21, %s8023_s21   ;;  %s4734_s20 = sphi %s4793_s20, %s8027_s20   ;;  %s4730_s19 = sphi %s4791_s19, %s8026_s19   ;;  %s4726_s18 = sphi %s4789_s18, %s8025_s18  }
   0xd   : > { %7683 = sst [smem:[#allocation16_spill]] %s4742_s22  ;;  %s44_s25 = sadd.s32 1, %s4734_s20 }
   0xe   : > { %7684 = sst [smem:[#allocation17_spill]] %s4746_s23  ;;  %p39_p0 = scmp.ge.s32.totalorder %s37_s24, 2 }
   0xf   : > { %p7639_p1 = scmp.ne.s32.totalorder %s4734_s20, %s4730_s19  ;;  %p52_p2 = scmp.eq.s32.totalorder %s4746_s23, 0 }
  0x10   : > { %s8029_s24 = smov (%p39_p0, %s37_s24), 0  ;;  %p4436_p5 = scmp.lt.s32.totalorder %s4746_s23, 2 }
  0x11   : > { %7685 = sst [smem:[#allocation18_spill]] %s8029_s24  ;;  %p53_p4 = por %p52_p2, %p7639_p1 }
  0x12   : > { %s41_s26 = ssub.s32 %s4742_s22, %s8029_s24  ;;  %s7640_s27 = sand.u32 1, %s4734_s20  }
  0x13   : > { %p42_p6 = scmp.eq.s32.totalorder %s41_s26, 0  ;;  %s4836_s28 = sshll.u32 %s7640_s27, 3 }
  0x14   : > { %s4839_s29 = sshll.u32 %s4742_s22, 7  ;;  %p4841_p7 = pnand %p4436_p5, %p53_p4 }
  0x15   : > { %s4846_s6 = scalar_select %p42_p6, %s4734_s20, %s44_s25  }
  0x16   : > { %s7686_s30 = scalar_select %p4841_p7, 1, 0 }
  0x17   : > { %7687 = sst [smem:[#allocation19_spill]] %s4846_s6  ;;  %s239_s7 = sand.u32 1, %s4746_s23  }
  0x18   : > { %s7688_s1 = sld [smem:[#allocation126_spill]]  ;;  %s243_s11 = scalar_lea.vmem [#allocation5], %s4836_s28 }
  0x19   : > { %s251_s12 = sshll.u32 %s243_s11, 4  ;;  %s4858_s13 = scalar_lea.sflag [#allocation6], %s239_s7  ;;  %s4856_s12 = int_to_ptr.vmem [resolvable:$true] %s251_s12 }
  0x1a   : > { %p4864_p9 = pneg %p4841_p7 }
  0x1c   : > { %s7689_s15 = scalar_select %p4864_p9, 1, 0 }
  0x1e   : > { %s4853_s10 = scalar_lea.hbm %s7688_s1, %s4839_s29  ;;  %s4543_s25 = scalar_lea.hbm %s7688_s1, 256 }
  0x1f   : > { %s4538_s14 = scalar_lea.hbm %s4853_s10, 128  ;;  %p4544_p12 = scmp.lt.u32.totalorder %s4853_s10, %s7688_s1 }
  0x20   : > { %p4539_p8 = scmp.ne.s32.totalorder %s4853_s10, %s4538_s14  ;;  %p4545_p13 = scmp.lt.u32.totalorder %s4543_s25, %s4538_s14 }
  0x21   : > { %p4547_p2 = scmp.lt.u32.totalorder %s4538_s14, %s4853_s10 }
  0x22   : > { %p4541_p10 = pnand %p4864_p9, %p4539_p8  ;;  %p4546_p0 = por %p4545_p13, %p4544_p12 }
  0x24   : > { %p4542_p11 = pneg %p4541_p10  ;;  %p4548_p4 = por %p4547_p2, %p4546_p0 }
  0x26   : > { %p4549_p5 = pnand %p4548_p4, %p4542_p11 }
  0x28   : > { %4552 = shalt.err (!%p4549_p5)
}
  0x29   : > { %s4553_s7 = scalar_lea.vmem %s4856_s12, 128  ;;  %s4748_s9 = smov [#allocation5]  }
  0x2a   : > { %p4554_p6 = scmp.ne.s32.totalorder %s4856_s12, %s4553_s7  ;;  %s4558_s11 = sshll.u32 %s4748_s9, 4  ;;  %s4559_s11 = int_to_ptr.vmem [resolvable:$false] %s4558_s11 }
  0x2b   : > { %s4560_s16 = scalar_lea.vmem %s4559_s11, 256  ;;  %p4561_p3 = scmp.lt.s32.totalorder %s4856_s12, %s4559_s11 }
  0x2c   : > { %p4556_p8 = pnand %p4554_p6, %p4864_p9  ;;  %p4562_p1 = scmp.lt.s32.totalorder %s4560_s16, %s4553_s7 }
  0x2e   : > { %p4557_p10 = pneg %p4556_p8  ;;  %p4563_p12 = por %p4562_p1, %p4561_p3 }
  0x30   : > { %p4564_p13 = pnand %p4563_p12, %p4557_p10 }
  0x32   : > { %4567 = shalt.err (!%p4564_p13)
}
  0x33   : > { %4427 = dma.hbm_to_vmem [thread:$0]  (!%p4841_p7), %s4853_s10, 128, %s4856_s12, %s4858_s13  }
  0x34   : > { %s4889_s14 = sadd.s32 4294967295, %s4746_s23   ;;  %s4325_s17 = sadd.s32 4294967294, %s4746_s23  }
  0x35   : > { %p57_p1 = scmp.ne.s32.totalorder %s4730_s19, %s4726_s18  ;;  %p7645_p3 = scmp.eq.s32.totalorder %s4889_s14, 0 }
  0x36   : > { %p179_p11 = scmp.eq.s32.totalorder %s4889_s14, 1  ;;  %p185_p0 = scmp.eq.s32.totalorder %s4325_s17, 1 }
  0x37   : > { %p4326_p2 = scmp.ge.s32.totalorder %s4746_s23, 1  ;;  %p4899_p4 = por %p7645_p3, %p57_p1 }
  0x38   : > { %p7691_p5 = scmp.ne.s32.totalorder %s4734_s20, %s4730_s19  ;;  %p4910_p8 = por %p185_p0, %p57_p1 }
  0x39   : > { %s7690_s25 = scalar_select %p4899_p4, 1, 0 }
  0x3a   : > { %p4906_p6 = por %p179_p11, %p7691_p5  ;;  %p192_p10 = scmp.lt.s32.totalorder %s4746_s23, 3 }
  0x3b   : > { %s7694_s12 = scalar_select %p4910_p8, 1, 0 }
  0x3c   : > { %s7692_s10 = scalar_select %p4906_p6, 1, 0 }
  0x3d   : > { %7695 = sst [smem:[#allocation21_spill]] %s7694_s12  ;;  %p4915_p12 = pnand %p4326_p2, %p192_p10 }
  0x3e   : > { %7693 = sst [smem:[#allocation20_spill]] %s7692_s10  ;;  %s4749_s8 = smov [#allocation8]  }
  0x3f   : > { %s7696_s26 = scalar_select %p4915_p12, 1, 0 }
  0x40   : > { %s204_s7 = sshll.u32 %s4749_s8, 4  ;;  %p4417_p13 = pneg %p4915_p12  ;;  %s4919_s7 = int_to_ptr.vmem [resolvable:$true] %s204_s7 }
  0x41   : > { %s4933_s17 = scalar_lea.hbm %s7633_s0, %s4839_s29  ;;  %s225_s27 = scalar_lea.vmem [#allocation2], %s4836_s28 }
  0x42   : > { %p4925_p11 = pnand %p4417_p13, %p7645_p3  ;;  %s232_s1 = sshll.u32 %s225_s27, 4  ;;  %s4936_s1 = int_to_ptr.vmem [resolvable:$true] %s232_s1 }
  0x43   : > { %s4568_s22 = scalar_lea.hbm %s7636_s3, 512 }
  0x44   : > { %p4569_p1 = scmp.ne.s32.totalorder %s7636_s3, %s4568_s22  ;;  %p4570_p0 = pneg %p4925_p11 }
  0x45   : > { %p4575_p10 = scmp.lt.u32.totalorder %s4568_s22, %s7636_s3 }
  0x46   : > { %p4571_p2 = pnand %p4570_p0, %p4569_p1 }
  0x48   : > { %p4572_p5 = pneg %p4571_p2 }
  0x4a   : > { %p4577_p13 = pnand %p4575_p10, %p4572_p5 }
  0x4c   : > { %4580 = shalt.err (!%p4577_p13)
}
  0x4d   : > { %s4581_s27 = scalar_lea.vmem %s4919_s7, 512  ;;  %p4589_p4 = scmp.lt.s32.totalorder %s4919_s7, %s4919_s7 }
  0x4e   : > { %p4582_p3 = scmp.ne.s32.totalorder %s4919_s7, %s4581_s27  ;;  %p4590_p12 = scmp.lt.s32.totalorder %s4581_s27, %s4581_s27 }
  0x50   : > { %p4584_p8 = pnand %p4582_p3, %p4570_p0  ;;  %p4591_p7 = por %p4590_p12, %p4589_p4 }
  0x52   : > { %p4585_p6 = pneg %p4584_p8 }
  0x54   : > { %p4592_p9 = pnand %p4591_p7, %p4585_p6 }
  0x56   : > { %4595 = shalt.err (!%p4592_p9)
}
  0x57   : > { %s4750_s23 = smov 128   ;;  %s4751_s22 = smov 8  }
  0x58   : > { %4420 = dma.hbm_to_vmem [thread:$0]  (!%p4925_p11), %s7636_s3, 512, %s4919_s7, [#allocation9], %s4750_s23, %s4750_s23, %s4751_s22  }
  0x59   : > { %s7698_s8 = sand.u32 1, %s4734_s20   ;;  %s4596_s16 = scalar_lea.hbm %s4933_s17, 128 }
  0x5a   : > { %s222_s11 = scalar_lea.sflag [#allocation3], %s7698_s8  ;;  %p4597_p7 = scmp.ne.s32.totalorder %s4933_s17, %s4596_s16 }
  0x5b   : > { %p7699_p9 = scmp.ne.s32.totalorder %s7689_s15, 0  ;;  %s4601_s18 = scalar_lea.hbm %s7633_s0, 256 }
  0x5c   : > { %p4602_p6 = scmp.lt.u32.totalorder %s4933_s17, %s7633_s0  ;;  %p4603_p8 = scmp.lt.u32.totalorder %s4601_s18, %s4596_s16 }
  0x5d   : > { %p4599_p3 = pnand %p4597_p7, %p7699_p9  ;;  %p4605_p1 = scmp.lt.u32.totalorder %s4596_s16, %s4933_s17 }
  0x5e   : > { %p4604_p12 = por %p4603_p8, %p4602_p6 }
  0x5f   : > { %p4600_p4 = pneg %p4599_p3 }
  0x60   : > { %p4606_p0 = por %p4605_p1, %p4604_p12 }
  0x62   : > { %p4607_p11 = pnand %p4606_p0, %p4600_p4 }
  0x64   : > { %4610 = shalt.err (!%p4607_p11)
}
  0x65   : > { %s4611_s7 = scalar_lea.vmem %s4936_s1, 128  ;;  %s4752_s12 = smov [#allocation2]  }
  0x66   : > { %p4612_p2 = scmp.ne.s32.totalorder %s4936_s1, %s4611_s7  ;;  %s4616_s9 = sshll.u32 %s4752_s12, 4  ;;  %s4617_s9 = int_to_ptr.vmem [resolvable:$false] %s4616_s9 }
  0x67   : > { %s4618_s5 = scalar_lea.vmem %s4617_s9, 256  ;;  %p4619_p13 = scmp.lt.s32.totalorder %s4936_s1, %s4617_s9 }
  0x68   : > { %p4614_p5 = pnand %p4612_p2, %p7699_p9  ;;  %p4620_p7 = scmp.lt.s32.totalorder %s4618_s5, %s4611_s7 }
  0x6a   : > { %p4615_p10 = pneg %p4614_p5  ;;  %p4621_p3 = por %p4620_p7, %p4619_p13 }
  0x6c   : > { %p4622_p6 = pnand %p4621_p3, %p4615_p10 }
  0x6e   : > { %4625 = shalt.err (!%p4622_p6)
}
  0x6f   : > { %p7700_p4 = scmp.ne.s32.totalorder %s7686_s30, 0  ;;  %s4986_s23 = scalar_lea.hbm %s7635_s2, %s4839_s29 }
  0x70   : > { %s262_s22 = scalar_lea.vmem [#allocation7], %s4836_s28  ;;  %s4626_s6 = scalar_lea.hbm %s4986_s23, 128 }
  0x71   : > { %4424 = dma.hbm_to_vmem [thread:$0]  (!%p7700_p4), %s4933_s17, 128, %s4936_s1, %s222_s11  }
  0x72   : > { %s269_s24 = sshll.u32 %s262_s22, 4  ;;  %p4627_p8 = scmp.ne.s32.totalorder %s4986_s23, %s4626_s6  ;;  %s270_s24 = int_to_ptr.vmem [resolvable:$true] %s269_s24 }
  0x73   : > { %s4631_s1 = scalar_lea.hbm %s7635_s2, 256  ;;  %p4632_p0 = scmp.lt.u32.totalorder %s4986_s23, %s7635_s2 }
  0x74   : > { %p4629_p12 = pnand %p4627_p8, %p7699_p9  ;;  %p4633_p11 = scmp.lt.u32.totalorder %s4631_s1, %s4626_s6 }
  0x75   : > { %p4635_p5 = scmp.lt.u32.totalorder %s4626_s6, %s4986_s23 }
  0x76   : > { %p4630_p1 = pneg %p4629_p12  ;;  %p4634_p2 = por %p4633_p11, %p4632_p0 }
  0x78   : > { %p4636_p10 = por %p4635_p5, %p4634_p2 }
  0x7a   : > { %p4637_p13 = pnand %p4636_p10, %p4630_p1 }
  0x7c   : > { %4640 = shalt.err (!%p4637_p13)
}
  0x7d   : > { %s4641_s28 = scalar_lea.vmem %s270_s24, 128  ;;  %s4753_s29 = smov [#allocation7]  }
  0x7e   : > { %p4642_p7 = scmp.ne.s32.totalorder %s270_s24, %s4641_s28  ;;  %s4646_s27 = sshll.u32 %s4753_s29, 4  ;;  %s4647_s27 = int_to_ptr.vmem [resolvable:$false] %s4646_s27 }
  0x7f   : > { %s4648_s7 = scalar_lea.vmem %s4647_s27, 256  ;;  %p4649_p8 = scmp.lt.s32.totalorder %s270_s24, %s4647_s27 }
  0x80   : > { %p4644_p3 = pnand %p4642_p7, %p7699_p9  ;;  %p4650_p12 = scmp.lt.s32.totalorder %s4648_s7, %s4641_s28 }
  0x82   : > { %p4645_p6 = pneg %p4644_p3  ;;  %p4651_p4 = por %p4650_p12, %p4649_p8 }
  0x84   : > { %p4652_p0 = pnand %p4651_p4, %p4645_p6 }
  0x86   : > { %4655 = shalt.err (!%p4652_p0)
}
  0x87   : > { %p7701_p11 = scmp.ne.s32.totalorder %s7686_s30, 0  ;;  %p7702_p1 = scmp.ne.s32.totalorder %s7696_s26, 0 }
  0x89   : > { %4430 = dma.hbm_to_vmem [thread:$0]  (!%p7701_p11), %s4986_s23, 128, %s270_s24, %s4858_s13  }
  0x8a   : > { %278 = sbr.rel (%p7702_p1) target bundleno = 2845 (0xb1d), region = 40 }
  0x91   : > { %s5010_s15 = sand.u32 1, %s4730_s19   ;;  %p7703_p9 = scmp.ne.s32.totalorder %s7690_s25, 0 }
  0x92   : > { %s5013_s12 = sshll.u32 %s5010_s15, 3  ;;  %s281_s9 = scalar_lea.sflag [#allocation3], %s5010_s15 }
  0x93   : > { %s284_s5 = scalar_lea.vmem [#allocation2], %s5013_s12 }
  0x94   : > { %4709 = dma.done.wait (%p7703_p9), %s281_s9, 128  }
  0x95   : > { %4711 = vsyncadd (%p7703_p9), %s281_s9, 4294967168  ;;  %s289_s30 = sand.u32 1, %s4889_s14   ;;  %s293_s26 = scalar_lea.vmem [#allocation5], %s5013_s12 }
  0x96   : > { %s290_s13 = scalar_lea.sflag [#allocation6], %s289_s30 }
  0x97   : > { %4713 = dma.done.wait (%p7703_p9), %s290_s13, 256  }
  0x98   : > { %4715 = vsyncadd (%p7703_p9), %s290_s13, 4294967040  ;;  %s302_s18 = scalar_lea.vmem [#allocation7], %s5013_s12  ;;  %p7704_p4 = scmp.eq.s32.totalorder %s4889_s14, 0 }
  0x9a   : > { %4717 = dma.done.wait (%p7704_p4), [#allocation9], 512   ;;  %p7705_p2 = pmov %p7704_p4 }
  0x9b   : > { %v611_v0 = vlaneseq  ;;  %v7678_v1 = vmov 0.0   ;;  %vm7676_vm0 = vmmov 0   ;;  %vm7677_vm1 = vcmask 64512   ;;  %v346_v5 = vld [vmem:[#allocation8] sm:$0xff]  ;;  %v343_v6 = vld [vmem:[%s284_s5] sm:$0xff]  ;;  %v348_v7 = vld [vmem:[#allocation8 + $0x8] sm:$0xff] }
  0x9c   : > { %4719 = vsyncadd (%p7705_p2), [#allocation9], 4294966784  ;;  %4380 = vmatprep.subr.mxu0 %v7678_v1  ;;  %4382 = vmatprep.mubr.msk.f32.mxu0 %vm7676_vm0, %v7678_v1  ;;  %v344_v8 = vld [vmem:[%s293_s26] sm:$0xff]  ;;  %v4341_v16 = vld [vmem:[%s7637_s4] ss:$0 sm:$0xff]  ;;  %s8012_s6 = sld [smem:[#allocation20_spill]] }
  0x9d   : > { %4385 = vmatprep.subr.mxu1 %v7678_v1  ;;  %4387 = vmatprep.mubr.msk.f32.mxu1 %vm7676_vm0, %v7678_v1  ;;  %v5039_v2 = vand.u32 127, %v611_v0  ;;  %v4343_v17 = vld [vmem:[%s7637_s4 + $0x1] ss:$0 sm:$0xff]  ;;  %v5069_v42 = vshrl.u32 %v611_v0, 7  ;;  %v4756_v46 = vmov 1966171168  }
  0x9e   : > { %4381 = vmatpush3.msra.mxu0 %v346_v5  ;;  %4386 = vmatpush3.msra.mxu1 %v348_v7  ;;  %v619_v47 = vunpack.c.l.s4 %v4756_v46  ;;  %s4367_s1 = sshll.u32 %s4738_s21, 7  ;;  %s342_s17 = scalar_lea.vmem [#allocation10], %s5013_s12 }
  0x9f   : > { %7706 = vst [vmem:[#allocation22_spill] sm:$0xff] %v5039_v2  ;;  %v1950_v3 = vcvt.s32.f32 %v5039_v2  ;;  %4383 = vmatmul.mubr.msk.f32.vlgmr.msra.gmra.mrb[0].mxu0 %vm7677_vm1, %v343_v6  ;;  %4388 = vmatmul.mubr.msk.f32.vlgmr.msra.gmra.mrb[0].mxu1 %vm7677_vm1, %v344_v8  ;;  %7707 = vst [vmem:[#allocation23_spill] sm:$0xff] %v5069_v42  ;;  %v5072_v43 = vsub.s32 0, %v5069_v42  ;;  %v5075_v44 = vsub.s32 1, %v5069_v42  ;;  %v5080_v51 = vsub.s32 2, %v5069_v42  ;;  %s4191_s11 = sshll.u32 %s342_s17, 4  ;;  %s7585_s11 = int_to_ptr.vmem [resolvable:$true] %s4191_s11 }
  0xa0   : > { %4390 = vmatprep.subr.mxu0 %v7678_v1  ;;  %4392 = vmatprep.mubr.msk.f32.mxu0 %vm7676_vm0, %v7678_v1  ;;  %v620_v53 = vunpack.c.0.s8 %v619_v47  ;;  %v5085_v58 = vsub.s32 3, %v5069_v42  ;;  %v5094_v0 = vsub.s32 4, %v5069_v42  ;;  %v5105_v8 = vsub.s32 5, %v5069_v42  ;;  %s8014_s27 = sld [smem:[#allocation127_spill]]  ;;  %s4177_s9 = scalar_lea.sflag [#allocation4], %s5010_s15 }
  0xa1   : > { %v1951_v4 = vadd.f32 1.0, %v1950_v3  ;;  %4395 = vmatprep.subr.mxu1 %v7678_v1  ;;  %4397 = vmatprep.mubr.msk.f32.mxu1 %vm7676_vm0, %v7678_v1  ;;  %v1952_v10 = vadd.f32 9.0, %v1950_v3  ;;  %v1953_v11 = vsub.f32 16.0, %v1950_v3  ;;  %v1954_v14 = vsub.f32 8.0, %v1950_v3  ;;  %7708 = vst [vmem:[#allocation24_spill] sm:$0xff] %v5072_v43  ;;  %7709 = vst [vmem:[#allocation25_spill] sm:$0xff] %v5075_v44 }
  0xa2   : > { %7710 = vst [vmem:[#allocation26_spill] sm:$0xff] %v5080_v51  ;;  %7711 = vst [vmem:[#allocation27_spill] sm:$0xff] %v5085_v58  ;;  %v5088_v59 = vsub.s32 %v620_v53, %v5069_v42  ;;  %s4656_s5 = scalar_lea.vmem %s7585_s11, 128  ;;  %p8016_p10 = scmp.ne.s32.totalorder %s8012_s6, 0 }
  0xa3   : > { %v1955_v9 = vmul.f32 %v1951_v4, %v1951_v4  ;;  %v2025_v12 = vmul.f32 %v1952_v10, %v1952_v10  ;;  %v2766_v13 = vmul.f32 %v1953_v11, %v1953_v11  ;;  %v2836_v15 = vmul.f32 %v1954_v14, %v1954_v14  ;;  %7712 = vst [vmem:[#allocation28_spill] sm:$0xff] %v5094_v0  ;;  %p4657_p5 = scmp.ne.s32.totalorder %s7585_s11, %s4656_s5  ;;  %s4758_s21 = smov [#allocation10]  }
  0xa4   : > { %7713 = vst [vmem:[#allocation29_spill] sm:$0xff] %v5105_v8  ;;  %v5118_v14 = vsub.s32 6, %v5069_v42  ;;  %s4660_s12 = sshll.u32 %s4758_s21, 4  ;;  %s4661_s12 = int_to_ptr.vmem [resolvable:$false] %s4660_s12 }
  0xa5   : > { %1958 = vbcast.lane.b32.xlu0 %v1955_v9, 256  ;;  %2028 = vbcast.lane.b32.xlu1 %v2025_v12, 256  ;;  %p4658_p13 = pnand %p4657_p5, %p8016_p10  ;;  %s4662_s30 = scalar_lea.vmem %s4661_s12, 256 }
  0xa6   : > { %7714 = vst [vmem:[#allocation30_spill] sm:$0xff] %v5118_v14  ;;  %s7583_s7 = scalar_lea.hbm %s8014_s27, %s4367_s1  ;;  %p4663_p3 = scmp.lt.s32.totalorder %s7585_s11, %s4661_s12 }
  0xa7   : > { %p4659_p7 = pneg %p4658_p13  ;;  %p4664_p6 = scmp.lt.s32.totalorder %s4662_s30, %s4656_s5 }
  0xa9   : > { %2769 = vbcast.lane.b32.xlu1 %v2766_v13, 256  ;;  %p4665_p8 = por %p4664_p6, %p4663_p3 }
  0xab   : > { %p4666_p12 = pnand %p4665_p8, %p4659_p7 }
  0xad   : > { %2839 = vbcast.lane.b32.xlu1 %v2836_v15, 256 }
 0x117   : > { %v5058_v26 = vpop.permute.xlu0 %1958  ;;  %v5062_v37 = vpop.permute.xlu1 %2028 }
 0x11b   : > { %v5064_v38 = vpop.permute.xlu1 %2769 }
 0x11f   : > { %v5066_v39 = vpop.permute.xlu1 %2839 }
 0x172   : > { %v431_v18 = vpop.f32.mrb[0].mxu0  ;;  %v519_v19 = vpop.f32.mrb[0].mxu1 }
 0x173   : > { %v432_v20 = vadd.f32 %v4341_v16, %v431_v18  ;;  %v4384_v21 = vpop.f32.mrb[1].mxu0  ;;  %v520_v22 = vadd.f32 %v4343_v17, %v519_v19  ;;  %v4389_v23 = vpop.f32.mrb[1].mxu1  ;;  %v5123_v17 = vsub.s32 7, %v5069_v42 }
 0x175   : > { %v435_v24 = vsel %vm7677_vm1, %v432_v20, -inf  ;;  %v523_v25 = vsel %vm7677_vm1, %v520_v22, -inf  ;;  %7715 = vst [vmem:[#allocation31_spill] sm:$0xff] %v5123_v17 }
 0x176   : > { %436 = vmax.xlane.f32.xlu0 %v435_v24 }
 0x17a   : > { %524 = vmax.xlane.f32.xlu0 %v523_v25 }
 0x203   : > { %v437_v27 = vpop.xlane.xlu0 %436 }
 0x204   : > { %v438_v28 = vsub.f32 %v432_v20, %v437_v27 }
 0x206   : > { %v439_v29 = vmul.f32 1.442695, %v438_v28 }
 0x207   : > { %v525_v30 = vpop.xlane.xlu0 %524 }
 0x208   : > { %4496 = vpow2.f32 %v439_v29  ;;  %v526_v31 = vsub.f32 %v520_v22, %v525_v30 }
 0x20a   : > { %v527_v32 = vmul.f32 1.442695, %v526_v31 }
 0x20c   : > { %4498 = vpow2.f32 %v527_v32 }
 0x212   : > { %v4497_v33 = vpop.eup %4496 }
 0x213   : > { %v441_v34 = vsel %vm7677_vm1, %v4497_v33, 0.0 }
 0x214   : > { %442 = vadd.xlane.f32.xlu1 %v441_v34 }
 0x216   : > { %v4499_v35 = vpop.eup %4498 }
 0x217   : > { %v529_v36 = vsel %vm7677_vm1, %v4499_v35, 0.0 }
 0x218   : > { %530 = vadd.xlane.f32.xlu1 %v529_v36 }
 0x2a1   : > { %v443_v40 = vpop.xlane.xlu1 %442 }
 0x2a2   : > { %4500 = vrcp.f32 %v443_v40 }
 0x2a5   : > { %v531_v41 = vpop.xlane.xlu1 %530 }
 0x2a6   : > { %4502 = vrcp.f32 %v531_v41 }
 0x2ac   : > { %v4501_v45 = vpop.eup %4500 }
 0x2ad   : > { %v445_v48 = vmul.f32 %v4501_v45, %v4497_v33 }
 0x2af   : > { %v669_v49 = vrot.slane %v445_v48, %v5072_v43  ;;  %v676_v50 = vrot.slane %v445_v48, %v5075_v44  ;;  %v617_v55 = vcombine.high %v445_v48, %v445_v48  ;;  %v683_v56 = vrot.slane %v445_v48, %v5080_v51 }
 0x2b0   : > { %v4503_v52 = vpop.eup %4502  ;;  %v690_v62 = vrot.slane %v445_v48, %v5085_v58  ;;  %v697_v6 = vrot.slane %v445_v48, %v5094_v0  ;;  %v704_v12 = vrot.slane %v445_v48, %v5105_v8  ;;  %v711_v15 = vrot.slane %v445_v48, %v5118_v14 }
 0x2b1   : > { %v533_v54 = vmul.f32 %v4503_v52, %v4499_v35  ;;  %671 = vbcast.lane.b32.xlu0 %v669_v49, 256  ;;  %678 = vbcast.lane.b32.xlu1 %v676_v50, 256  ;;  %v631_v61 = vrot.slane %v617_v55, %v5088_v59  ;;  %v718_v18 = vrot.slane %v445_v48, %v5123_v17 }
 0x2b2   : > { %v624_v24 = vrot.slane %v445_v48, %v5088_v59 }
 0x2b3   : > { %v881_v57 = vrot.slane %v533_v54, %v5072_v43  ;;  %v829_v60 = vcombine.high %v533_v54, %v533_v54  ;;  %v888_v63 = vrot.slane %v533_v54, %v5075_v44  ;;  %v5100_v4 = vrot.slane %v631_v61, %v5088_v59 }
 0x2b4   : > { %v633_v5 = vcombine.high %v631_v61, %v631_v61  ;;  %v895_v7 = vrot.slane %v533_v54, %v5080_v51  ;;  %v902_v13 = vrot.slane %v533_v54, %v5085_v58  ;;  %v909_v16 = vrot.slane %v533_v54, %v5094_v0 }
 0x2b5   : > { %685 = vbcast.lane.b32.xlu0 %v683_v56, 256  ;;  %883 = vbcast.lane.b32.xlu1 %v881_v57, 256  ;;  %v5097_v3 = vrot.slane %v829_v60, %v5088_v59  ;;  %v916_v19 = vrot.slane %v533_v54, %v5105_v8  ;;  %v923_v20 = vrot.slane %v533_v54, %v5118_v14 }
 0x2b6   : > { %v5110_v10 = vrot.slane %v633_v5, %v5088_v59  ;;  %v930_v21 = vrot.slane %v533_v54, %v5123_v17  ;;  %v836_v22 = vrot.slane %v533_v54, %v5088_v59  ;;  %v632_v28 = vcombine.high %v624_v24, %v624_v24 }
 0x2b7   : > { %v845_v9 = vcombine.high %v5097_v3, %v5097_v3  ;;  %v640_v32 = vrot.slane %v624_v24, %v5088_v59 }
 0x2b8   : > { %v844_v23 = vcombine.high %v836_v22, %v836_v22  ;;  %v852_v25 = vrot.slane %v836_v22, %v5088_v59  ;;  %v5143_v31 = vrot.slane %v632_v28, %v5088_v59 }
 0x2b9   : > { %692 = vbcast.lane.b32.xlu0 %v690_v62, 256  ;;  %890 = vbcast.lane.b32.xlu1 %v888_v63, 256  ;;  %v5113_v11 = vrot.slane %v845_v9, %v5088_v59  ;;  %v5167_v46 = vrot.slane %v640_v32, %v5072_v43  ;;  %v662_v9 = vcombine.high %v640_v32, %v640_v32 }
 0x2ba   : > { %v5133_v27 = vrot.slane %v844_v23, %v5088_v59  ;;  %v5136_v29 = vrot.slane %v852_v25, %v5072_v43  ;;  %v5164_v45 = vrot.slane %v5143_v31, %v5072_v43  ;;  %v874_v61 = vcombine.high %v852_v25, %v852_v25 }
 0x2bc   : > { %v5140_v30 = vrot.slane %v5133_v27, %v5072_v43 }
 0x2bd   : > { %699 = vbcast.lane.b32.xlu0 %v697_v6, 256  ;;  %897 = vbcast.lane.b32.xlu1 %v895_v7, 256  ;;  %v5200_v7 = vrot.slane %v874_v61, %v5072_v43 }
 0x2c1   : > { %706 = vbcast.lane.b32.xlu0 %v704_v12, 256  ;;  %904 = vbcast.lane.b32.xlu1 %v902_v13, 256 }
 0x2c5   : > { %713 = vbcast.lane.b32.xlu0 %v711_v15, 256  ;;  %911 = vbcast.lane.b32.xlu1 %v909_v16, 256 }
 0x2c9   : > { %720 = vbcast.lane.b32.xlu0 %v718_v18, 256  ;;  %918 = vbcast.lane.b32.xlu1 %v916_v19, 256  ;;  %v5211_v18 = vrot.slane %v662_v9, %v5072_v43 }
 0x2cd   : > { %925 = vbcast.lane.b32.xlu1 %v923_v20, 256 }
 0x2d1   : > { %932 = vbcast.lane.b32.xlu1 %v930_v21, 256 }
 0x323   : > { %v5146_v33 = vpop.permute.xlu1 %678  ;;  %v5148_v34 = vpop.permute.xlu0 %671 }
 0x324   : > { %vm1055_vm2 = vcmp.lt.f32.partialorder %v5136_v29, %v5146_v33  ;;  %vm1054_vm3 = vcmp.lt.f32.partialorder %v5136_v29, %v5148_v34  ;;  %vm1063_vm4 = vcmp.lt.f32.partialorder %v5140_v30, %v5146_v33  ;;  %vm1062_vm5 = vcmp.lt.f32.partialorder %v5140_v30, %v5148_v34 }
 0x325   : > { %v1119_v35 = vsel %vm1055_vm2, 1.0, %v7678_v1  ;;  %v1118_v36 = vsel %vm1054_vm3, 1.0, %v7678_v1  ;;  %v1127_v48 = vsel %vm1063_vm4, 1.0, %v7678_v1  ;;  %v1126_v49 = vsel %vm1062_vm5, 1.0, %v7678_v1 }
 0x326   : > { %v1185_v40 = vsel %vm7677_vm1, %v1119_v35, 0.0  ;;  %v1182_v41 = vsel %vm7677_vm1, %v1118_v36, 0.0  ;;  %v1209_v50 = vsel %vm7677_vm1, %v1127_v48, 0.0  ;;  %v1206_v52 = vsel %vm7677_vm1, %v1126_v49, 0.0 }
 0x327   : > { %1186 = vadd.xlane.f32.xlu1 %v1185_v40  ;;  %v5169_v47 = vpop.permute.xlu1 %883  ;;  %1183 = vadd.xlane.f32.xlu0 %v1182_v41  ;;  %v5187_v56 = vpop.permute.xlu0 %685  ;;  %vm1071_vm12 = vcmp.lt.f32.partialorder %v5200_v7, %v5146_v33  ;;  %vm1070_vm13 = vcmp.lt.f32.partialorder %v5200_v7, %v5148_v34  ;;  %v876_v36 = vcombine.high %v5133_v27, %v5133_v27 }
 0x328   : > { %vm1503_vm6 = vcmp.le.f32.partialorder %v5164_v45, %v5169_v47  ;;  %vm1502_vm7 = vcmp.le.f32.partialorder %v5167_v46, %v5169_v47  ;;  %vm1064_vm10 = vcmp.lt.f32.partialorder %v5140_v30, %v5187_v56  ;;  %vm1056_vm11 = vcmp.lt.f32.partialorder %v5136_v29, %v5187_v56 }
 0x329   : > { %v1567_v54 = vsel %vm1503_vm6, 1.0, %v7678_v1  ;;  %v1566_v55 = vsel %vm1502_vm7, 1.0, %v7678_v1  ;;  %v1128_v12 = vsel %vm1064_vm10, 1.0, %v7678_v1  ;;  %v1120_v13 = vsel %vm1056_vm11, 1.0, %v7678_v1 }
 0x32a   : > { %v1633_v57 = vsel %vm7677_vm1, %v1567_v54, 0.0  ;;  %v1630_v60 = vsel %vm7677_vm1, %v1566_v55, 0.0  ;;  %v1212_v15 = vsel %vm7677_vm1, %v1128_v12, 0.0  ;;  %v1188_v16 = vsel %vm7677_vm1, %v1120_v13, 0.0 }
 0x32b   : > { %1210 = vadd.xlane.f32.xlu1 %v1209_v50  ;;  %v5179_v53 = vpop.permute.xlu1 %890  ;;  %1207 = vadd.xlane.f32.xlu0 %v1206_v52  ;;  %v1135_v19 = vsel %vm1071_vm12, 1.0, %v7678_v1  ;;  %v1134_v20 = vsel %vm1070_vm13, 1.0, %v7678_v1  ;;  %vm1504_vm15 = vcmp.le.f32.partialorder %v5211_v18, %v5169_v47  ;;  %v5229_v28 = vpop.permute.xlu0 %692  ;;  %v5244_v50 = vrot.slane %v876_v36, %v5072_v43 }
 0x32c   : > { %vm1511_vm8 = vcmp.le.f32.partialorder %v5164_v45, %v5179_v53  ;;  %vm1510_vm9 = vcmp.le.f32.partialorder %v5167_v46, %v5179_v53  ;;  %vm1512_vm14 = vcmp.le.f32.partialorder %v5211_v18, %v5179_v53  ;;  %v1233_v22 = vsel %vm7677_vm1, %v1135_v19, 0.0 }
 0x32d   : > { %v1575_v62 = vsel %vm1511_vm8, 1.0, %v7678_v1  ;;  %v1574_v63 = vsel %vm1510_vm9, 1.0, %v7678_v1  ;;  %v1230_v23 = vsel %vm7677_vm1, %v1134_v20, 0.0  ;;  %v1576_v24 = vsel %vm1512_vm14, 1.0, %v7678_v1 }
 0x32e   : > { %v1657_v5 = vsel %vm7677_vm1, %v1575_v62, 0.0  ;;  %v1654_v6 = vsel %vm7677_vm1, %v1574_v63, 0.0  ;;  %v1568_v25 = vsel %vm1504_vm15, 1.0, %v7678_v1  ;;  %v1660_v32 = vsel %vm7677_vm1, %v1576_v24, 0.0 }
 0x32f   : > { %1634 = vadd.xlane.f32.xlu1 %v1633_v57  ;;  %1631 = vadd.xlane.f32.xlu0 %v1630_v60  ;;  %v5219_v21 = vpop.permute.xlu1 %897  ;;  %v1636_v35 = vsel %vm7677_vm1, %v1568_v25, 0.0  ;;  %vm1065_vm4 = vcmp.lt.f32.partialorder %v5140_v30, %v5229_v28  ;;  %vm1057_vm5 = vcmp.lt.f32.partialorder %v5136_v29, %v5229_v28  ;;  %v664_v27 = vcombine.high %v5143_v31, %v5143_v31  ;;  %v5283_v19 = vpop.permute.xlu0 %699 }
 0x330   : > { %vm1519_vm2 = vcmp.le.f32.partialorder %v5164_v45, %v5219_v21  ;;  %vm1518_vm3 = vcmp.le.f32.partialorder %v5167_v46, %v5219_v21  ;;  %v1129_v52 = vsel %vm1065_vm4, 1.0, %v7678_v1  ;;  %v1121_v54 = vsel %vm1057_vm5, 1.0, %v7678_v1 }
 0x331   : > { %v1583_v40 = vsel %vm1519_vm2, 1.0, %v7678_v1  ;;  %v1582_v41 = vsel %vm1518_vm3, 1.0, %v7678_v1  ;;  %vm1078_vm6 = vcmp.lt.f32.partialorder %v5244_v50, %v5148_v34  ;;  %vm1072_vm7 = vcmp.lt.f32.partialorder %v5200_v7, %v5187_v56 }
 0x332   : > { %v1681_v48 = vsel %vm7677_vm1, %v1583_v40, 0.0  ;;  %v1678_v49 = vsel %vm7677_vm1, %v1582_v41, 0.0  ;;  %v1215_v55 = vsel %vm7677_vm1, %v1129_v52, 0.0  ;;  %v1191_v57 = vsel %vm7677_vm1, %v1121_v54, 0.0 }
 0x333   : > { %1658 = vadd.xlane.f32.xlu1 %v1657_v5  ;;  %1655 = vadd.xlane.f32.xlu0 %v1654_v6  ;;  %v5257_v60 = vrot.slane %v664_v27, %v5072_v43  ;;  %v1142_v31 = vsel %vm1078_vm6, 1.0, %v7678_v1  ;;  %v1136_v61 = vsel %vm1072_vm7, 1.0, %v7678_v1  ;;  %vm1079_vm9 = vcmp.lt.f32.partialorder %v5244_v50, %v5146_v33  ;;  %v5273_v9 = vpop.permute.xlu1 %904 }
 0x334   : > { %v1254_v62 = vsel %vm7677_vm1, %v1142_v31, 0.0  ;;  %v1236_v63 = vsel %vm7677_vm1, %v1136_v61, 0.0  ;;  %v1143_v6 = vsel %vm1079_vm9, 1.0, %v7678_v1  ;;  %vm1520_vm10 = vcmp.le.f32.partialorder %v5211_v18, %v5219_v21 }
 0x335   : > { %vm1505_vm8 = vcmp.le.f32.partialorder %v5257_v60, %v5169_v47  ;;  %vm1513_vm11 = vcmp.le.f32.partialorder %v5257_v60, %v5179_v53  ;;  %v1257_v13 = vsel %vm7677_vm1, %v1143_v6, 0.0  ;;  %vm1527_vm12 = vcmp.le.f32.partialorder %v5164_v45, %v5273_v9 }
 0x336   : > { %v1569_v5 = vsel %vm1505_vm8, 1.0, %v7678_v1  ;;  %vm1526_vm13 = vcmp.le.f32.partialorder %v5167_v46, %v5273_v9  ;;  %vm1066_vm14 = vcmp.lt.f32.partialorder %v5140_v30, %v5283_v19  ;;  %vm1058_vm15 = vcmp.lt.f32.partialorder %v5136_v29, %v5283_v19 }
 0x337   : > { %1213 = vadd.xlane.f32.xlu1 %v1212_v15  ;;  %1189 = vadd.xlane.f32.xlu0 %v1188_v16  ;;  %v1639_v12 = vsel %vm7677_vm1, %v1569_v5, 0.0  ;;  %v1584_v15 = vsel %vm1520_vm10, 1.0, %v7678_v1  ;;  %v1577_v16 = vsel %vm1513_vm11, 1.0, %v7678_v1  ;;  %v1590_v24 = vsel %vm1526_vm13, 1.0, %v7678_v1  ;;  %v5337_v5 = vpop.permute.xlu1 %911 }
 0x338   : > { %v1684_v20 = vsel %vm7677_vm1, %v1584_v15, 0.0  ;;  %v1130_v36 = vsel %vm1066_vm14, 1.0, %v7678_v1  ;;  %v1122_v40 = vsel %vm1058_vm15, 1.0, %v7678_v1  ;;  %vm1080_vm2 = vcmp.lt.f32.partialorder %v5244_v50, %v5187_v56 }
 0x339   : > { %vm1073_vm3 = vcmp.lt.f32.partialorder %v5200_v7, %v5229_v28  ;;  %v1218_v41 = vsel %vm7677_vm1, %v1130_v36, 0.0  ;;  %v5321_v54 = vrot.slane %v5100_v4, %v5072_v43  ;;  %vm1528_vm8 = vcmp.le.f32.partialorder %v5211_v18, %v5273_v9 }
 0x33a   : > { %vm1521_vm9 = vcmp.le.f32.partialorder %v5257_v60, %v5219_v21  ;;  %vm1535_vm10 = vcmp.le.f32.partialorder %v5164_v45, %v5337_v5  ;;  %vm1534_vm11 = vcmp.le.f32.partialorder %v5167_v46, %v5337_v5  ;;  %vm1081_vm14 = vcmp.lt.f32.partialorder %v5244_v50, %v5229_v28 }
 0x33b   : > { %1234 = vadd.xlane.f32.xlu1 %v1233_v22  ;;  %1231 = vadd.xlane.f32.xlu0 %v1230_v23  ;;  %v1663_v22 = vsel %vm7677_vm1, %v1577_v16, 0.0  ;;  %v1591_v23 = vsel %vm1527_vm12, 1.0, %v7678_v1  ;;  %vm1514_vm6 = vcmp.le.f32.partialorder %v5321_v54, %v5179_v53  ;;  %vm1506_vm7 = vcmp.le.f32.partialorder %v5321_v54, %v5169_v47  ;;  %v5347_v16 = vpop.permute.xlu0 %706 }
 0x33c   : > { %v1705_v25 = vsel %vm7677_vm1, %v1591_v23, 0.0  ;;  %v1585_v15 = vsel %vm1521_vm9, 1.0, %v7678_v1  ;;  %v1599_v23 = vsel %vm1535_vm10, 1.0, %v7678_v1  ;;  %vm1067_vm12 = vcmp.lt.f32.partialorder %v5140_v30, %v5347_v16 }
 0x33d   : > { %vm1059_vm13 = vcmp.lt.f32.partialorder %v5136_v29, %v5347_v16  ;;  %v1131_v36 = vsel %vm1067_vm12, 1.0, %v7678_v1  ;;  %vm1074_vm15 = vcmp.lt.f32.partialorder %v5200_v7, %v5283_v19  ;;  %vm1529_vm9 = vcmp.le.f32.partialorder %v5257_v60, %v5273_v9 }
 0x33f   : > { %1661 = vadd.xlane.f32.xlu1 %v1660_v32  ;;  %1637 = vadd.xlane.f32.xlu0 %v1636_v35  ;;  %v1702_v32 = vsel %vm7677_vm1, %v1590_v24, 0.0  ;;  %v5297_v35 = vrot.slane %v5097_v3, %v5088_v59  ;;  %v1144_v3 = vsel %vm1080_vm2, 1.0, %v7678_v1  ;;  %v1598_v24 = vsel %vm1534_vm11, 1.0, %v7678_v1 }
 0x340   : > { %v1260_v27 = vsel %vm7677_vm1, %v1144_v3, 0.0  ;;  %v5369_v3 = vrot.slane %v5113_v11, %v5072_v43 }
 0x341   : > { %v5309_v59 = vrot.slane %v5297_v35, %v5072_v43 }
 0x342   : > { %vm1094_vm2 = vcmp.lt.f32.partialorder %v5369_v3, %v5148_v34 }
 0x343   : > { %1682 = vadd.xlane.f32.xlu1 %v1681_v48  ;;  %1679 = vadd.xlane.f32.xlu0 %v1678_v49  ;;  %v1194_v48 = vsel %vm7677_vm1, %v1122_v40, 0.0  ;;  %v1137_v49 = vsel %vm1073_vm3, 1.0, %v7678_v1  ;;  %vm1087_vm4 = vcmp.lt.f32.partialorder %v5309_v59, %v5146_v33  ;;  %vm1086_vm5 = vcmp.lt.f32.partialorder %v5309_v59, %v5148_v34 }
 0x344   : > { %v1239_v52 = vsel %vm7677_vm1, %v1137_v49, 0.0  ;;  %v1123_v40 = vsel %vm1059_vm13, 1.0, %v7678_v1  ;;  %v1145_v49 = vsel %vm1081_vm14, 1.0, %v7678_v1  ;;  %vm1088_vm3 = vcmp.lt.f32.partialorder %v5309_v59, %v5187_v56 }
 0x345   : > { %vm1082_vm14 = vcmp.lt.f32.partialorder %v5244_v50, %v5283_v19 }
 0x347   : > { %1216 = vadd.xlane.f32.xlu1 %v1215_v55  ;;  %1192 = vadd.xlane.f32.xlu0 %v1191_v57  ;;  %v1151_v55 = vsel %vm1087_vm4, 1.0, %v7678_v1  ;;  %v1150_v57 = vsel %vm1086_vm5, 1.0, %v7678_v1  ;;  %vm1095_vm5 = vcmp.lt.f32.partialorder %v5369_v3, %v5146_v33 }
 0x348   : > { %v1281_v31 = vsel %vm7677_vm1, %v1151_v55, 0.0  ;;  %v1278_v61 = vsel %vm7677_vm1, %v1150_v57, 0.0  ;;  %v5381_v57 = vrot.slane %v5110_v10, %v5072_v43 }
 0x34a   : > { %vm1507_vm4 = vcmp.le.f32.partialorder %v5381_v57, %v5169_v47 }
 0x34b   : > { %1255 = vadd.xlane.f32.xlu1 %v1254_v62  ;;  %1237 = vadd.xlane.f32.xlu0 %v1236_v63  ;;  %v1578_v62 = vsel %vm1514_vm6, 1.0, %v7678_v1  ;;  %v1570_v63 = vsel %vm1506_vm7, 1.0, %v7678_v1  ;;  %vm1522_vm6 = vcmp.le.f32.partialorder %v5321_v54, %v5219_v21  ;;  %vm1515_vm7 = vcmp.le.f32.partialorder %v5381_v57, %v5179_v53 }
 0x34c   : > { %v1666_v6 = vsel %vm7677_vm1, %v1578_v62, 0.0 }
 0x34f   : > { %1640 = vadd.xlane.f32.xlu1 %v1639_v12  ;;  %1258 = vadd.xlane.f32.xlu0 %v1257_v13  ;;  %v1642_v12 = vsel %vm7677_vm1, %v1570_v63, 0.0  ;;  %v1592_v13 = vsel %vm1528_vm8, 1.0, %v7678_v1  ;;  %vm1536_vm8 = vcmp.le.f32.partialorder %v5211_v18, %v5337_v5 }
 0x353   : > { %1685 = vadd.xlane.f32.xlu1 %v1684_v20  ;;  %1664 = vadd.xlane.f32.xlu0 %v1663_v22  ;;  %v1708_v20 = vsel %vm7677_vm1, %v1592_v13, 0.0  ;;  %v1687_v22 = vsel %vm7677_vm1, %v1585_v15, 0.0 }
 0x357   : > { %1706 = vadd.xlane.f32.xlu1 %v1705_v25  ;;  %1703 = vadd.xlane.f32.xlu0 %v1702_v32  ;;  %v1729_v25 = vsel %vm7677_vm1, %v1599_v23, 0.0  ;;  %v1726_v32 = vsel %vm7677_vm1, %v1598_v24, 0.0  ;;  %v5405_v23 = vpop.permute.xlu1 %918 }
 0x358   : > { %vm1543_vm10 = vcmp.le.f32.partialorder %v5164_v45, %v5405_v23  ;;  %vm1542_vm11 = vcmp.le.f32.partialorder %v5167_v46, %v5405_v23 }
 0x35b   : > { %1219 = vadd.xlane.f32.xlu1 %v1218_v41  ;;  %1195 = vadd.xlane.f32.xlu0 %v1194_v48  ;;  %v1221_v41 = vsel %vm7677_vm1, %v1131_v36, 0.0  ;;  %v1197_v48 = vsel %vm7677_vm1, %v1123_v40, 0.0  ;;  %v1593_v36 = vsel %vm1529_vm9, 1.0, %v7678_v1  ;;  %v5415_v40 = vpop.permute.xlu0 %713 }
 0x35c   : > { %vm1068_vm12 = vcmp.lt.f32.partialorder %v5140_v30, %v5415_v40  ;;  %vm1060_vm13 = vcmp.lt.f32.partialorder %v5136_v29, %v5415_v40 }
 0x35f   : > { %1261 = vadd.xlane.f32.xlu1 %v1260_v27  ;;  %1240 = vadd.xlane.f32.xlu0 %v1239_v52  ;;  %v1138_v27 = vsel %vm1074_vm15, 1.0, %v7678_v1  ;;  %v1263_v52 = vsel %vm7677_vm1, %v1145_v49, 0.0  ;;  %v1607_v49 = vsel %vm1543_vm10, 1.0, %v7678_v1  ;;  %vm1075_vm15 = vcmp.lt.f32.partialorder %v5200_v7, %v5347_v16 }
 0x360   : > { %v1242_v55 = vsel %vm7677_vm1, %v1138_v27, 0.0  ;;  %v1606_v27 = vsel %vm1542_vm11, 1.0, %v7678_v1 }
 0x363   : > { %1282 = vadd.xlane.f32.xlu1 %v1281_v31  ;;  %1279 = vadd.xlane.f32.xlu0 %v1278_v61  ;;  %v1158_v31 = vsel %vm1094_vm2, 1.0, %v7678_v1  ;;  %v1152_v61 = vsel %vm1088_vm3, 1.0, %v7678_v1  ;;  %vm1096_vm2 = vcmp.lt.f32.partialorder %v5369_v3, %v5187_v56  ;;  %vm1089_vm3 = vcmp.lt.f32.partialorder %v5309_v59, %v5229_v28 }
 0x364   : > { %v1302_v62 = vsel %vm7677_vm1, %v1158_v31, 0.0  ;;  %v1284_v63 = vsel %vm7677_vm1, %v1152_v61, 0.0  ;;  %v1132_v31 = vsel %vm1068_vm12, 1.0, %v7678_v1  ;;  %v1124_v61 = vsel %vm1060_vm13, 1.0, %v7678_v1 }
 0x367   : > { %1667 = vadd.xlane.f32.xlu1 %v1666_v6  ;;  %1643 = vadd.xlane.f32.xlu0 %v1642_v12  ;;  %v1571_v6 = vsel %vm1507_vm4, 1.0, %v7678_v1  ;;  %v1159_v12 = vsel %vm1095_vm5, 1.0, %v7678_v1 }
 0x368   : > { %v1645_v13 = vsel %vm7677_vm1, %v1571_v6, 0.0  ;;  %v1305_v15 = vsel %vm7677_vm1, %v1159_v12, 0.0  ;;  %v875_v6 = vcombine.high %v5297_v35, %v5297_v35  ;;  %v1146_v12 = vsel %vm1082_vm14, 1.0, %v7678_v1 }
 0x36a   : > { %v5448_v35 = vrot.slane %v875_v6, %v5072_v43 }
 0x36b   : > { %1709 = vadd.xlane.f32.xlu1 %v1708_v20  ;;  %1688 = vadd.xlane.f32.xlu0 %v1687_v22  ;;  %v1586_v20 = vsel %vm1522_vm6, 1.0, %v7678_v1  ;;  %v1579_v22 = vsel %vm1515_vm7, 1.0, %v7678_v1 }
 0x36c   : > { %v1690_v24 = vsel %vm7677_vm1, %v1586_v20, 0.0  ;;  %v1266_v20 = vsel %vm7677_vm1, %v1146_v12, 0.0  ;;  %vm1103_vm4 = vcmp.lt.f32.partialorder %v5448_v35, %v5146_v33  ;;  %vm1102_vm5 = vcmp.lt.f32.partialorder %v5448_v35, %v5148_v34 }
 0x36f   : > { %1730 = vadd.xlane.f32.xlu1 %v1729_v25  ;;  %1727 = vadd.xlane.f32.xlu0 %v1726_v32  ;;  %v1669_v25 = vsel %vm7677_vm1, %v1579_v22, 0.0  ;;  %v1600_v32 = vsel %vm1536_vm8, 1.0, %v7678_v1  ;;  %vm5475_vm8 = vcmp.lt.s32.totalorder %v5039_v2, %v5069_v42 }
 0x373   : > { %1222 = vadd.xlane.f32.xlu1 %v1221_v41  ;;  %1198 = vadd.xlane.f32.xlu0 %v1197_v48  ;;  %v1732_v41 = vsel %vm7677_vm1, %v1600_v32, 0.0  ;;  %v1711_v48 = vsel %vm7677_vm1, %v1593_v36, 0.0  ;;  %v1153_v32 = vsel %vm1089_vm3, 1.0, %v7678_v1  ;;  %v877_v36 = vcombine.high %v5113_v11, %v5113_v11 }
 0x377   : > { %1264 = vadd.xlane.f32.xlu1 %v1263_v52  ;;  %1243 = vadd.xlane.f32.xlu0 %v1242_v55  ;;  %v1753_v52 = vsel %vm7677_vm1, %v1607_v49, 0.0  ;;  %v1750_v55 = vsel %vm7677_vm1, %v1606_v27, 0.0  ;;  %v1167_v27 = vsel %vm1103_vm4, 1.0, %v7678_v1 }
 0x37b   : > { %1303 = vadd.xlane.f32.xlu1 %v1302_v62  ;;  %1285 = vadd.xlane.f32.xlu0 %v1284_v63  ;;  %v1224_v62 = vsel %vm7677_vm1, %v1132_v31, 0.0  ;;  %v1200_v63 = vsel %vm7677_vm1, %v1124_v61, 0.0  ;;  %v1329_v31 = vsel %vm7677_vm1, %v1167_v27, 0.0 }
 0x37f   : > { %1646 = vadd.xlane.f32.xlu1 %v1645_v13  ;;  %1306 = vadd.xlane.f32.xlu0 %v1305_v15  ;;  %v1139_v13 = vsel %vm1075_vm15, 1.0, %v7678_v1  ;;  %v5443_v15 = vpop.permute.xlu1 %925  ;;  %vm1530_vm15 = vcmp.le.f32.partialorder %v5321_v54, %v5273_v9 }
 0x380   : > { %v1245_v22 = vsel %vm7677_vm1, %v1139_v13, 0.0  ;;  %vm988_vm6 = vcmp.eq.f32.partialorder %v5448_v35, %v5443_v15  ;;  %vm980_vm7 = vcmp.lt.f32.partialorder %v5448_v35, %v5443_v15 }
 0x381   : > { %vm996_vm11 = vmand %vm988_vm6, %vm5475_vm8 }
 0x382   : > { %vm5492_vm12 = vmor %vm980_vm7, %vm996_vm11  ;;  %vm1544_vm7 = vcmp.le.f32.partialorder %v5211_v18, %v5405_v23 }
 0x383   : > { %1691 = vadd.xlane.f32.xlu1 %v1690_v24  ;;  %1670 = vadd.xlane.f32.xlu0 %v1669_v25  ;;  %v663_v24 = vcombine.high %v5100_v4, %v5100_v4  ;;  %v1160_v25 = vsel %vm1096_vm2, 1.0, %v7678_v1  ;;  %v5467_v49 = vpop.permute.xlu1 %932  ;;  %vm1523_vm2 = vcmp.le.f32.partialorder %v5381_v57, %v5219_v21  ;;  %v1608_v27 = vsel %vm1544_vm7, 1.0, %v7678_v1 }
 0x385   : > { %v5463_v4 = vrot.slane %v663_v24, %v5072_v43  ;;  %v7720_v24 = vmov 0 }
 0x387   : > { %1733 = vadd.xlane.f32.xlu1 %v1732_v41  ;;  %1712 = vadd.xlane.f32.xlu0 %v1711_v48  ;;  %v1308_v41 = vsel %vm7677_vm1, %v1160_v25, 0.0  ;;  %v1287_v48 = vsel %vm7677_vm1, %v1153_v32, 0.0  ;;  %vm1516_vm9 = vcmp.le.f32.partialorder %v5463_v4, %v5179_v53  ;;  %vm1508_vm10 = vcmp.le.f32.partialorder %v5463_v4, %v5169_v47 }
 0x388   : > { %v1580_v6 = vsel %vm1516_vm9, 1.0, %v7678_v1  ;;  %v1572_v12 = vsel %vm1508_vm10, 1.0, %v7678_v1  ;;  %v1594_v25 = vsel %vm1530_vm15, 1.0, %v7678_v1  ;;  %v1587_v32 = vsel %vm1523_vm2, 1.0, %v7678_v1 }
 0x389   : > { %v1672_v13 = vsel %vm7677_vm1, %v1580_v6, 0.0  ;;  %vm768_vm6 = vcmp.lt.f32.partialorder %v5463_v4, %v5415_v40  ;;  %vm1537_vm9 = vcmp.le.f32.partialorder %v5257_v60, %v5337_v5  ;;  %vm1551_vm2 = vcmp.le.f32.partialorder %v5164_v45, %v5443_v15 }
 0x38a   : > { %v1615_v6 = vsel %vm1551_vm2, 1.0, %v7678_v1  ;;  %vm1104_vm2 = vcmp.lt.f32.partialorder %v5448_v35, %v5187_v56 }
 0x38b   : > { %1754 = vadd.xlane.f32.xlu1 %v1753_v52  ;;  %1751 = vadd.xlane.f32.xlu0 %v1750_v55  ;;  %v1166_v52 = vsel %vm1102_vm5, 1.0, %v7678_v1  ;;  %v5484_v55 = vrot.slane %v877_v36, %v5072_v43  ;;  %vm776_vm5 = vcmp.eq.f32.partialorder %v5463_v4, %v5415_v40  ;;  %v1714_v36 = vsel %vm7677_vm1, %v1594_v25, 0.0 }
 0x38c   : > { %v1326_v61 = vsel %vm7677_vm1, %v1166_v52, 0.0  ;;  %vm786_vm11 = vmand %vm776_vm5, %vm5475_vm8  ;;  %v1601_v52 = vsel %vm1537_vm9, 1.0, %v7678_v1  ;;  %vm1083_vm9 = vcmp.lt.f32.partialorder %v5244_v50, %v5347_v16 }
 0x38d   : > { %vm989_vm13 = vcmp.eq.f32.partialorder %v5484_v55, %v5467_v49  ;;  %vm981_vm14 = vcmp.lt.f32.partialorder %v5484_v55, %v5467_v49 }
 0x38e   : > { %vm997_vm3 = vmand %vm989_vm13, %vm5475_vm8 }
 0x38f   : > { %1225 = vadd.xlane.f32.xlu1 %v1224_v62  ;;  %1201 = vadd.xlane.f32.xlu0 %v1200_v63  ;;  %v665_v62 = vcombine.high %v5110_v10, %v5110_v10  ;;  %v5506_v10 = vpop.permute.xlu0 %720  ;;  %vm5515_vm4 = vmor %vm981_vm14, %vm997_vm3  ;;  %vm1550_vm3 = vcmp.le.f32.partialorder %v5167_v46, %v5443_v15 }
 0x390   : > { %v7721_v24 = vsel %vm5515_vm4, 4294967295, %v7720_v24  ;;  %vm5537_vm14 = vmor %vm768_vm6, %vm786_vm11  ;;  %vm1069_vm6 = vcmp.lt.f32.partialorder %v5140_v30, %v5506_v10  ;;  %vm1061_vm7 = vcmp.lt.f32.partialorder %v5136_v29, %v5506_v10  ;;  %vm1097_vm11 = vcmp.lt.f32.partialorder %v5369_v3, %v5229_v28 }
 0x391   : > { %v1133_v25 = vsel %vm1069_vm6, 1.0, %v7678_v1  ;;  %vm1111_vm6 = vcmp.lt.f32.partialorder %v5484_v55, %v5146_v33 }
 0x393   : > { %1267 = vadd.xlane.f32.xlu1 %v1266_v20  ;;  %1246 = vadd.xlane.f32.xlu0 %v1245_v22  ;;  %v1648_v20 = vsel %vm7677_vm1, %v1572_v12, 0.0  ;;  %v5513_v22 = vrot.slane %v665_v62, %v5072_v43  ;;  %v1735_v62 = vsel %vm7677_vm1, %v1601_v52, 0.0  ;;  %v1614_v12 = vsel %vm1550_vm3, 1.0, %v7678_v1 }
 0x395   : > { %vm777_vm10 = vcmp.eq.f32.partialorder %v5513_v22, %v5506_v10  ;;  %vm769_vm13 = vcmp.lt.f32.partialorder %v5513_v22, %v5506_v10  ;;  %vm1509_vm3 = vcmp.le.f32.partialorder %v5513_v22, %v5169_v47 }
 0x396   : > { %vm787_vm15 = vmand %vm777_vm10, %vm5475_vm8  ;;  %vm1076_vm10 = vcmp.lt.f32.partialorder %v5200_v7, %v5415_v40 }
 0x397   : > { %1309 = vadd.xlane.f32.xlu1 %v1308_v41  ;;  %1288 = vadd.xlane.f32.xlu0 %v1287_v48  ;;  %v1693_v41 = vsel %vm7677_vm1, %v1587_v32, 0.0  ;;  %v7722_v48 = vmov 0  ;;  %vm5549_vm5 = vmor %vm769_vm13, %vm787_vm15  ;;  %v1125_v32 = vsel %vm1061_vm7, 1.0, %v7678_v1  ;;  %v1140_v52 = vsel %vm1076_vm10, 1.0, %v7678_v1 }
 0x398   : > { %v7723_v48 = vsel %vm5537_vm14, 4294967295, %v7722_v48  ;;  %vm1090_vm13 = vcmp.lt.f32.partialorder %v5309_v59, %v5283_v19  ;;  %vm1110_vm15 = vcmp.lt.f32.partialorder %v5484_v55, %v5148_v34  ;;  %vm1524_vm7 = vcmp.le.f32.partialorder %v5463_v4, %v5219_v21 }
 0x399   : > { %vm1538_vm10 = vcmp.le.f32.partialorder %v5321_v54, %v5337_v5  ;;  %vm772_vm14 = vcmp.eq.f32.partialorder %v5211_v18, %v5187_v56 }
 0x39b   : > { %1330 = vadd.xlane.f32.xlu1 %v1329_v31  ;;  %1327 = vadd.xlane.f32.xlu0 %v1326_v61  ;;  %v7724_v31 = vmov 0  ;;  %v1756_v61 = vsel %vm7677_vm1, %v1608_v27, 0.0  ;;  %v1147_v27 = vsel %vm1083_vm9, 1.0, %v7678_v1  ;;  %vm1517_vm9 = vcmp.le.f32.partialorder %v5513_v22, %v5179_v53 }
 0x39c   : > { %v7725_v31 = vsel %vm5549_vm5, 4294967295, %v7724_v31 }
 0x39f   : > { %1673 = vadd.xlane.f32.xlu1 %v1672_v13  ;;  %1649 = vadd.xlane.f32.xlu0 %v1648_v20  ;;  %v1777_v13 = vsel %vm7677_vm1, %v1615_v6, 0.0  ;;  %v1774_v20 = vsel %vm7677_vm1, %v1614_v12, 0.0  ;;  %v1161_v6 = vsel %vm1097_vm11, 1.0, %v7678_v1  ;;  %v1154_v12 = vsel %vm1090_vm13, 1.0, %v7678_v1 }
 0x3a0   : > { %vm1531_vm11 = vcmp.le.f32.partialorder %v5381_v57, %v5273_v9  ;;  %vm1552_vm13 = vcmp.le.f32.partialorder %v5211_v18, %v5443_v15 }
 0x3a3   : > { %1715 = vadd.xlane.f32.xlu1 %v1714_v36  ;;  %1694 = vadd.xlane.f32.xlu0 %v1693_v41  ;;  %v1227_v36 = vsel %vm7677_vm1, %v1133_v25, 0.0  ;;  %v1203_v41 = vsel %vm7677_vm1, %v1125_v32, 0.0  ;;  %v1311_v25 = vsel %vm7677_vm1, %v1161_v6, 0.0  ;;  %v1290_v32 = vsel %vm7677_vm1, %v1154_v12, 0.0 }
 0x3a4   : > { %v1573_v6 = vsel %vm1509_vm3, 1.0, %v7678_v1  ;;  %v1175_v12 = vsel %vm1111_vm6, 1.0, %v7678_v1  ;;  %vm1558_vm3 = vcmp.le.f32.partialorder %v5167_v46, %v5467_v49  ;;  %vm1084_vm6 = vcmp.lt.f32.partialorder %v5244_v50, %v5415_v40 }
 0x3a7   : > { %1757 = vadd.xlane.f32.xlu1 %v1756_v61  ;;  %1736 = vadd.xlane.f32.xlu0 %v1735_v62  ;;  %v1269_v61 = vsel %vm7677_vm1, %v1147_v27, 0.0  ;;  %v1248_v62 = vsel %vm7677_vm1, %v1140_v52, 0.0 }
 0x3ab   : > { %1778 = vadd.xlane.f32.xlu1 %v1777_v13  ;;  %1775 = vadd.xlane.f32.xlu0 %v1774_v20 }
 0x3af   : > { %1228 = vadd.xlane.f32.xlu1 %v1227_v36  ;;  %1204 = vadd.xlane.f32.xlu0 %v1203_v41  ;;  %v1174_v36 = vsel %vm1110_vm15, 1.0, %v7678_v1  ;;  %v1168_v41 = vsel %vm1104_vm2, 1.0, %v7678_v1  ;;  %vm1545_vm15 = vcmp.le.f32.partialorder %v5257_v60, %v5405_v23  ;;  %vm1559_vm2 = vcmp.le.f32.partialorder %v5164_v45, %v5467_v49 }
 0x3b3   : > { %1270 = vadd.xlane.f32.xlu1 %v1269_v61  ;;  %1249 = vadd.xlane.f32.xlu0 %v1248_v62  ;;  %v1350_v61 = vsel %vm7677_vm1, %v1174_v36, 0.0  ;;  %v1332_v62 = vsel %vm7677_vm1, %v1168_v41, 0.0  ;;  %v1651_v36 = vsel %vm7677_vm1, %v1573_v6, 0.0  ;;  %v1353_v41 = vsel %vm7677_vm1, %v1175_v12, 0.0 }
 0x3b4   : > { %v5581_v13 = vpop.xlane.xlu1 %1186  ;;  %v5583_v20 = vpop.xlane.xlu0 %1183 }
 0x3b7   : > { %1312 = vadd.xlane.f32.xlu1 %v1311_v25  ;;  %1291 = vadd.xlane.f32.xlu0 %v1290_v32 }
 0x3b8   : > { %v5593_v27 = vpop.xlane.xlu1 %1210  ;;  %v5595_v52 = vpop.xlane.xlu0 %1207 }
 0x3bb   : > { %1351 = vadd.xlane.f32.xlu1 %v1350_v61  ;;  %1333 = vadd.xlane.f32.xlu0 %v1332_v62  ;;  %v1588_v61 = vsel %vm1524_vm7, 1.0, %v7678_v1  ;;  %v1581_v62 = vsel %vm1517_vm9, 1.0, %v7678_v1  ;;  %vm1077_vm7 = vcmp.lt.f32.partialorder %v5200_v7, %v5506_v10  ;;  %vm1098_vm9 = vcmp.lt.f32.partialorder %v5369_v3, %v5283_v19 }
 0x3bc   : > { %v5605_v25 = vpop.xlane.xlu1 %1634  ;;  %v5607_v32 = vpop.xlane.xlu0 %1631  ;;  %v1696_v6 = vsel %vm7677_vm1, %v1588_v61, 0.0  ;;  %v1675_v12 = vsel %vm7677_vm1, %v1581_v62, 0.0 }
 0x3bf   : > { %1652 = vadd.xlane.f32.xlu1 %v1651_v36  ;;  %1354 = vadd.xlane.f32.xlu0 %v1353_v41  ;;  %v1602_v36 = vsel %vm1538_vm10, 1.0, %v7678_v1  ;;  %v1595_v41 = vsel %vm1531_vm11, 1.0, %v7678_v1  ;;  %vm1091_vm10 = vcmp.lt.f32.partialorder %v5309_v59, %v5347_v16  ;;  %vm1112_vm11 = vcmp.lt.f32.partialorder %v5484_v55, %v5187_v56 }
 0x3c0   : > { %v5617_v17 = vpop.xlane.xlu1 %1658  ;;  %v5619_v8 = vpop.xlane.xlu0 %1655  ;;  %v1738_v61 = vsel %vm7677_vm1, %v1602_v36, 0.0  ;;  %v1717_v62 = vsel %vm7677_vm1, %v1595_v41, 0.0 }
 0x3c3   : > { %1697 = vadd.xlane.f32.xlu1 %v1696_v6  ;;  %1676 = vadd.xlane.f32.xlu0 %v1675_v12  ;;  %v1616_v6 = vsel %vm1552_vm13, 1.0, %v7678_v1  ;;  %v1609_v12 = vsel %vm1545_vm15, 1.0, %v7678_v1  ;;  %vm1105_vm13 = vcmp.lt.f32.partialorder %v5448_v35, %v5229_v28  ;;  %vm1532_vm15 = vcmp.le.f32.partialorder %v5463_v4, %v5273_v9 }
 0x3c4   : > { %v5629_v58 = vpop.xlane.xlu1 %1213  ;;  %v5631_v14 = vpop.xlane.xlu0 %1189  ;;  %v1780_v36 = vsel %vm7677_vm1, %v1616_v6, 0.0  ;;  %v1759_v41 = vsel %vm7677_vm1, %v1609_v12, 0.0 }
 0x3c7   : > { %1739 = vadd.xlane.f32.xlu1 %v1738_v61  ;;  %1718 = vadd.xlane.f32.xlu0 %v1717_v62  ;;  %v1623_v61 = vsel %vm1559_vm2, 1.0, %v7678_v1  ;;  %v1622_v62 = vsel %vm1558_vm3, 1.0, %v7678_v1  ;;  %vm1525_vm2 = vcmp.le.f32.partialorder %v5513_v22, %v5219_v21  ;;  %vm1546_vm3 = vcmp.le.f32.partialorder %v5321_v54, %v5405_v23 }
 0x3c8   : > { %v5641_v0 = vpop.xlane.xlu1 %1234  ;;  %v5643_v51 = vpop.xlane.xlu0 %1231  ;;  %v1801_v6 = vsel %vm7677_vm1, %v1623_v61, 0.0  ;;  %v1798_v12 = vsel %vm7677_vm1, %v1622_v62, 0.0 }
 0x3c9   : > { %7726 = vst [vmem:[#allocation32_spill] sm:$0xff] %v5641_v0  ;;  %7727 = vst [vmem:[#allocation33_spill] sm:$0xff] %v5643_v51 }
 0x3cb   : > { %1781 = vadd.xlane.f32.xlu1 %v1780_v36  ;;  %1760 = vadd.xlane.f32.xlu0 %v1759_v41  ;;  %v1148_v36 = vsel %vm1084_vm6, 1.0, %v7678_v1  ;;  %v1141_v41 = vsel %vm1077_vm7, 1.0, %v7678_v1  ;;  %vm1539_vm6 = vcmp.le.f32.partialorder %v5381_v57, %v5337_v5  ;;  %vm1560_vm7 = vcmp.le.f32.partialorder %v5211_v18, %v5467_v49 }
 0x3cc   : > { %v5653_v44 = vpop.xlane.xlu1 %1661  ;;  %v5655_v43 = vpop.xlane.xlu0 %1637  ;;  %v1272_v61 = vsel %vm7677_vm1, %v1148_v36, 0.0  ;;  %v1251_v62 = vsel %vm7677_vm1, %v1141_v41, 0.0 }
 0x3cf   : > { %1802 = vadd.xlane.f32.xlu1 %v1801_v6  ;;  %1799 = vadd.xlane.f32.xlu0 %v1798_v12  ;;  %v1162_v6 = vsel %vm1098_vm9, 1.0, %v7678_v1  ;;  %v1155_v12 = vsel %vm1091_vm10, 1.0, %v7678_v1  ;;  %vm1553_vm9 = vcmp.le.f32.partialorder %v5257_v60, %v5443_v15  ;;  %vm1092_vm10 = vcmp.lt.f32.partialorder %v5309_v59, %v5415_v40 }
 0x3d0   : > { %v5665_v2 = vpop.xlane.xlu1 %1682  ;;  %v5667_v42 = vpop.xlane.xlu0 %1679  ;;  %v1314_v36 = vsel %vm7677_vm1, %v1162_v6, 0.0  ;;  %v1293_v41 = vsel %vm7677_vm1, %v1155_v12, 0.0 }
 0x3d1   : > { %7728 = vst [vmem:[#allocation34_spill] sm:$0xff] %v5667_v42 }
 0x3d3   : > { %1273 = vadd.xlane.f32.xlu1 %v1272_v61  ;;  %1252 = vadd.xlane.f32.xlu0 %v1251_v62  ;;  %v1176_v61 = vsel %vm1112_vm11, 1.0, %v7678_v1  ;;  %v1169_v62 = vsel %vm1105_vm13, 1.0, %v7678_v1  ;;  %vm1085_vm11 = vcmp.lt.f32.partialorder %v5244_v50, %v5506_v10  ;;  %vm1106_vm13 = vcmp.lt.f32.partialorder %v5448_v35, %v5283_v19 }
 0x3d4   : > { %v5677_v51 = vpop.xlane.xlu1 %1216  ;;  %v5679_v0 = vpop.xlane.xlu0 %1192  ;;  %v1356_v6 = vsel %vm7677_vm1, %v1176_v61, 0.0  ;;  %v1335_v12 = vsel %vm7677_vm1, %v1169_v62, 0.0 }
 0x3d5   : > { %7729 = vst [vmem:[#allocation35_spill] sm:$0xff] %v5677_v51  ;;  %7730 = vst [vmem:[#allocation36_spill] sm:$0xff] %v5679_v0 }
 0x3d7   : > { %1315 = vadd.xlane.f32.xlu1 %v1314_v36  ;;  %1294 = vadd.xlane.f32.xlu0 %v1293_v41  ;;  %v1596_v36 = vsel %vm1532_vm15, 1.0, %v7678_v1  ;;  %v1589_v41 = vsel %vm1525_vm2, 1.0, %v7678_v1  ;;  %vm1099_vm15 = vcmp.lt.f32.partialorder %v5369_v3, %v5347_v16  ;;  %vm1533_vm2 = vcmp.le.f32.partialorder %v5513_v22, %v5273_v9 }
 0x3d8   : > { %v5689_v42 = vpop.xlane.xlu1 %1255  ;;  %v5691_v51 = vpop.xlane.xlu0 %1237  ;;  %v1720_v61 = vsel %vm7677_vm1, %v1596_v36, 0.0  ;;  %v1699_v62 = vsel %vm7677_vm1, %v1589_v41, 0.0 }
 0x3d9   : > { %7731 = vst [vmem:[#allocation37_spill] sm:$0xff] %v5689_v42  ;;  %7732 = vst [vmem:[#allocation38_spill] sm:$0xff] %v5691_v51 }
 0x3db   : > { %1357 = vadd.xlane.f32.xlu1 %v1356_v6  ;;  %1336 = vadd.xlane.f32.xlu0 %v1335_v12  ;;  %v1610_v6 = vsel %vm1546_vm3, 1.0, %v7678_v1  ;;  %v1603_v12 = vsel %vm1539_vm6, 1.0, %v7678_v1  ;;  %vm1113_vm3 = vcmp.lt.f32.partialorder %v5484_v55, %v5229_v28  ;;  %vm1547_vm6 = vcmp.le.f32.partialorder %v5381_v57, %v5405_v23 }
 0x3dc   : > { %v5701_v0 = vpop.xlane.xlu1 %1640  ;;  %v5703_v42 = vpop.xlane.xlu0 %1258  ;;  %v1762_v36 = vsel %vm7677_vm1, %v1610_v6, 0.0  ;;  %v1741_v41 = vsel %vm7677_vm1, %v1603_v12, 0.0 }
 0x3dd   : > { %7733 = vst [vmem:[#allocation39_spill] sm:$0xff] %v5701_v0  ;;  %7734 = vst [vmem:[#allocation40_spill] sm:$0xff] %v5703_v42 }
 0x3df   : > { %1721 = vadd.xlane.f32.xlu1 %v1720_v61  ;;  %1700 = vadd.xlane.f32.xlu0 %v1699_v62  ;;  %v1624_v61 = vsel %vm1560_vm7, 1.0, %v7678_v1  ;;  %v1617_v62 = vsel %vm1553_vm9, 1.0, %v7678_v1  ;;  %vm1540_vm7 = vcmp.le.f32.partialorder %v5463_v4, %v5337_v5  ;;  %vm1561_vm9 = vcmp.le.f32.partialorder %v5257_v60, %v5467_v49 }
 0x3e0   : > { %v5713_v51 = vpop.xlane.xlu1 %1685  ;;  %v5715_v0 = vpop.xlane.xlu0 %1664  ;;  %v1804_v6 = vsel %vm7677_vm1, %v1624_v61, 0.0  ;;  %v1783_v12 = vsel %vm7677_vm1, %v1617_v62, 0.0 }
 0x3e1   : > { %7735 = vst [vmem:[#allocation41_spill] sm:$0xff] %v5713_v51  ;;  %7736 = vst [vmem:[#allocation42_spill] sm:$0xff] %v5715_v0 }
 0x3e3   : > { %1763 = vadd.xlane.f32.xlu1 %v1762_v36  ;;  %1742 = vadd.xlane.f32.xlu0 %v1741_v41  ;;  %v1156_v36 = vsel %vm1092_vm10, 1.0, %v7678_v1  ;;  %v1149_v41 = vsel %vm1085_vm11, 1.0, %v7678_v1  ;;  %vm1554_vm10 = vcmp.le.f32.partialorder %v5321_v54, %v5443_v15  ;;  %vm1100_vm11 = vcmp.lt.f32.partialorder %v5369_v3, %v5415_v40 }
 0x3e4   : > { %v5725_v42 = vpop.xlane.xlu1 %1706  ;;  %v5727_v51 = vpop.xlane.xlu0 %1703  ;;  %v1296_v61 = vsel %vm7677_vm1, %v1156_v36, 0.0  ;;  %v1275_v62 = vsel %vm7677_vm1, %v1149_v41, 0.0 }
 0x3e5   : > { %7737 = vst [vmem:[#allocation43_spill] sm:$0xff] %v5725_v42  ;;  %7738 = vst [vmem:[#allocation44_spill] sm:$0xff] %v5727_v51 }
 0x3e7   : > { %1805 = vadd.xlane.f32.xlu1 %v1804_v6  ;;  %1784 = vadd.xlane.f32.xlu0 %v1783_v12  ;;  %v1170_v6 = vsel %vm1106_vm13, 1.0, %v7678_v1  ;;  %v1163_v12 = vsel %vm1099_vm15, 1.0, %v7678_v1  ;;  %vm1093_vm13 = vcmp.lt.f32.partialorder %v5309_v59, %v5506_v10  ;;  %vm1114_vm15 = vcmp.lt.f32.partialorder %v5484_v55, %v5283_v19 }
 0x3e8   : > { %v5737_v0 = vpop.xlane.xlu1 %1219  ;;  %v5739_v42 = vpop.xlane.xlu0 %1195  ;;  %v1338_v36 = vsel %vm7677_vm1, %v1170_v6, 0.0  ;;  %v1317_v41 = vsel %vm7677_vm1, %v1163_v12, 0.0 }
 0x3e9   : > { %7739 = vst [vmem:[#allocation45_spill] sm:$0xff] %v5737_v0  ;;  %7740 = vst [vmem:[#allocation46_spill] sm:$0xff] %v5739_v42 }
 0x3eb   : > { %1297 = vadd.xlane.f32.xlu1 %v1296_v61  ;;  %1276 = vadd.xlane.f32.xlu0 %v1275_v62  ;;  %v1597_v61 = vsel %vm1533_vm2, 1.0, %v7678_v1  ;;  %v1177_v62 = vsel %vm1113_vm3, 1.0, %v7678_v1  ;;  %vm1107_vm2 = vcmp.lt.f32.partialorder %v5448_v35, %v5347_v16  ;;  %vm1548_vm3 = vcmp.le.f32.partialorder %v5463_v4, %v5405_v23 }
 0x3ec   : > { %v5749_v51 = vpop.xlane.xlu1 %1261  ;;  %v5751_v0 = vpop.xlane.xlu0 %1240  ;;  %v1723_v6 = vsel %vm7677_vm1, %v1597_v61, 0.0  ;;  %v1359_v12 = vsel %vm7677_vm1, %v1177_v62, 0.0 }
 0x3ed   : > { %7741 = vst [vmem:[#allocation47_spill] sm:$0xff] %v5749_v51  ;;  %7742 = vst [vmem:[#allocation48_spill] sm:$0xff] %v5751_v0 }
 0x3ef   : > { %1339 = vadd.xlane.f32.xlu1 %v1338_v36  ;;  %1318 = vadd.xlane.f32.xlu0 %v1317_v41  ;;  %v1611_v36 = vsel %vm1547_vm6, 1.0, %v7678_v1  ;;  %v1604_v41 = vsel %vm1540_vm7, 1.0, %v7678_v1  ;;  %vm1541_vm6 = vcmp.le.f32.partialorder %v5513_v22, %v5337_v5  ;;  %vm1562_vm7 = vcmp.le.f32.partialorder %v5321_v54, %v5467_v49 }
 0x3f0   : > { %v5761_v42 = vpop.xlane.xlu1 %1282  ;;  %v5763_v51 = vpop.xlane.xlu0 %1279  ;;  %v1765_v61 = vsel %vm7677_vm1, %v1611_v36, 0.0  ;;  %v1744_v62 = vsel %vm7677_vm1, %v1604_v41, 0.0 }
 0x3f1   : > { %7743 = vst [vmem:[#allocation49_spill] sm:$0xff] %v5761_v42  ;;  %7744 = vst [vmem:[#allocation50_spill] sm:$0xff] %v5763_v51 }
 0x3f3   : > { %1724 = vadd.xlane.f32.xlu1 %v1723_v6  ;;  %1360 = vadd.xlane.f32.xlu0 %v1359_v12  ;;  %v1625_v6 = vsel %vm1561_vm9, 1.0, %v7678_v1  ;;  %v1618_v12 = vsel %vm1554_vm10, 1.0, %v7678_v1  ;;  %vm1555_vm9 = vcmp.le.f32.partialorder %v5381_v57, %v5443_v15  ;;  %vm1108_vm10 = vcmp.lt.f32.partialorder %v5448_v35, %v5415_v40 }
 0x3f4   : > { %v5773_v0 = vpop.xlane.xlu1 %1667  ;;  %v5775_v42 = vpop.xlane.xlu0 %1643  ;;  %v1807_v36 = vsel %vm7677_vm1, %v1625_v6, 0.0  ;;  %v1786_v41 = vsel %vm7677_vm1, %v1618_v12, 0.0 }
 0x3f5   : > { %7745 = vst [vmem:[#allocation51_spill] sm:$0xff] %v5773_v0  ;;  %7746 = vst [vmem:[#allocation52_spill] sm:$0xff] %v5775_v42 }
 0x3f7   : > { %1766 = vadd.xlane.f32.xlu1 %v1765_v61  ;;  %1745 = vadd.xlane.f32.xlu0 %v1744_v62  ;;  %v1164_v61 = vsel %vm1100_vm11, 1.0, %v7678_v1  ;;  %v1157_v62 = vsel %vm1093_vm13, 1.0, %v7678_v1  ;;  %vm1101_vm11 = vcmp.lt.f32.partialorder %v5369_v3, %v5506_v10  ;;  %vm1549_vm13 = vcmp.le.f32.partialorder %v5513_v22, %v5405_v23 }
 0x3f8   : > { %v5785_v51 = vpop.xlane.xlu1 %1709  ;;  %v5787_v0 = vpop.xlane.xlu0 %1688  ;;  %v1320_v6 = vsel %vm7677_vm1, %v1164_v61, 0.0  ;;  %v1299_v12 = vsel %vm7677_vm1, %v1157_v62, 0.0 }
 0x3f9   : > { %7747 = vst [vmem:[#allocation53_spill] sm:$0xff] %v5785_v51  ;;  %7748 = vst [vmem:[#allocation54_spill] sm:$0xff] %v5787_v0 }
 0x3fb   : > { %1808 = vadd.xlane.f32.xlu1 %v1807_v36  ;;  %1787 = vadd.xlane.f32.xlu0 %v1786_v41  ;;  %v1178_v36 = vsel %vm1114_vm15, 1.0, %v7678_v1  ;;  %v1171_v41 = vsel %vm1107_vm2, 1.0, %v7678_v1  ;;  %vm1115_vm15 = vcmp.lt.f32.partialorder %v5484_v55, %v5347_v16  ;;  %vm1563_vm2 = vcmp.le.f32.partialorder %v5381_v57, %v5467_v49 }
 0x3fc   : > { %v5797_v42 = vpop.xlane.xlu1 %1730  ;;  %v5799_v51 = vpop.xlane.xlu0 %1727  ;;  %v1362_v61 = vsel %vm7677_vm1, %v1178_v36, 0.0  ;;  %v1341_v62 = vsel %vm7677_vm1, %v1171_v41, 0.0 }
 0x3fd   : > { %7749 = vst [vmem:[#allocation55_spill] sm:$0xff] %v5797_v42  ;;  %7750 = vst [vmem:[#allocation56_spill] sm:$0xff] %v5799_v51 }
 0x3ff   : > { %1321 = vadd.xlane.f32.xlu1 %v1320_v6  ;;  %1300 = vadd.xlane.f32.xlu0 %v1299_v12  ;;  %v1612_v6 = vsel %vm1548_vm3, 1.0, %v7678_v1  ;;  %v1605_v12 = vsel %vm1541_vm6, 1.0, %v7678_v1  ;;  %vm1556_vm3 = vcmp.le.f32.partialorder %v5463_v4, %v5443_v15  ;;  %vm1116_vm6 = vcmp.lt.f32.partialorder %v5484_v55, %v5415_v40 }
 0x400   : > { %v5809_v0 = vpop.xlane.xlu1 %1222  ;;  %v5811_v42 = vpop.xlane.xlu0 %1198  ;;  %v1768_v36 = vsel %vm7677_vm1, %v1612_v6, 0.0  ;;  %v1747_v41 = vsel %vm7677_vm1, %v1605_v12, 0.0 }
 0x401   : > { %7751 = vst [vmem:[#allocation57_spill] sm:$0xff] %v5809_v0  ;;  %7752 = vst [vmem:[#allocation58_spill] sm:$0xff] %v5811_v42 }
 0x403   : > { %1363 = vadd.xlane.f32.xlu1 %v1362_v61  ;;  %1342 = vadd.xlane.f32.xlu0 %v1341_v62  ;;  %v1626_v61 = vsel %vm1562_vm7, 1.0, %v7678_v1  ;;  %v1619_v62 = vsel %vm1555_vm9, 1.0, %v7678_v1  ;;  %vm1109_vm7 = vcmp.lt.f32.partialorder %v5448_v35, %v5506_v10  ;;  %vm1564_vm9 = vcmp.le.f32.partialorder %v5463_v4, %v5467_v49 }
 0x404   : > { %v5821_v51 = vpop.xlane.xlu1 %1264  ;;  %v5823_v0 = vpop.xlane.xlu0 %1243  ;;  %v1810_v6 = vsel %vm7677_vm1, %v1626_v61, 0.0  ;;  %v1789_v12 = vsel %vm7677_vm1, %v1619_v62, 0.0  ;;  %v1628_v4 = vsel %vm1564_vm9, 1.0, %v7678_v1  ;;  %vm762_vm9 = vcmp.lt.f32.partialorder %v5167_v46, %v5148_v34 }
 0x405   : > { %7753 = vst [vmem:[#allocation59_spill] sm:$0xff] %v5821_v51  ;;  %7754 = vst [vmem:[#allocation60_spill] sm:$0xff] %v5823_v0 }
 0x407   : > { %1769 = vadd.xlane.f32.xlu1 %v1768_v36  ;;  %1748 = vadd.xlane.f32.xlu0 %v1747_v41  ;;  %v1172_v36 = vsel %vm1108_vm10, 1.0, %v7678_v1  ;;  %v1165_v41 = vsel %vm1101_vm11, 1.0, %v7678_v1  ;;  %vm1557_vm10 = vcmp.le.f32.partialorder %v5513_v22, %v5443_v15  ;;  %vm771_vm11 = vcmp.eq.f32.partialorder %v5164_v45, %v5146_v33 }
 0x408   : > { %v5833_v42 = vpop.xlane.xlu1 %1303  ;;  %v5835_v51 = vpop.xlane.xlu0 %1285  ;;  %v1344_v61 = vsel %vm7677_vm1, %v1172_v36, 0.0  ;;  %v1323_v62 = vsel %vm7677_vm1, %v1165_v41, 0.0 }
 0x409   : > { %7755 = vst [vmem:[#allocation61_spill] sm:$0xff] %v5833_v42  ;;  %7756 = vst [vmem:[#allocation62_spill] sm:$0xff] %v5835_v51 }
 0x40b   : > { %1811 = vadd.xlane.f32.xlu1 %v1810_v6  ;;  %1790 = vadd.xlane.f32.xlu0 %v1789_v12  ;;  %v1613_v6 = vsel %vm1549_vm13, 1.0, %v7678_v1  ;;  %v1179_v12 = vsel %vm1115_vm15, 1.0, %v7678_v1  ;;  %vm770_vm13 = vcmp.eq.f32.partialorder %v5167_v46, %v5148_v34  ;;  %vm984_vm15 = vcmp.eq.f32.partialorder %v5200_v7, %v5219_v21 }
 0x40c   : > { %v5845_v0 = vpop.xlane.xlu1 %1646  ;;  %v5847_v42 = vpop.xlane.xlu0 %1306  ;;  %v1771_v36 = vsel %vm7677_vm1, %v1613_v6, 0.0  ;;  %v1365_v41 = vsel %vm7677_vm1, %v1179_v12, 0.0  ;;  %vm992_vm0 = vmand %vm984_vm15, %vm5475_vm8  ;;  %vm985_vm15 = vcmp.eq.f32.partialorder %v5244_v50, %v5273_v9 }
 0x40d   : > { %7757 = vst [vmem:[#allocation63_spill] sm:$0xff] %v5845_v0  ;;  %7758 = vst [vmem:[#allocation64_spill] sm:$0xff] %v5847_v42 }
 0x40f   : > { %1345 = vadd.xlane.f32.xlu1 %v1344_v61  ;;  %1324 = vadd.xlane.f32.xlu0 %v1323_v62  ;;  %v1627_v61 = vsel %vm1563_vm2, 1.0, %v7678_v1  ;;  %v1620_v62 = vsel %vm1556_vm3, 1.0, %v7678_v1  ;;  %vm763_vm2 = vcmp.lt.f32.partialorder %v5164_v45, %v5146_v33  ;;  %vm781_vm3 = vmand %vm771_vm11, %vm5475_vm8  ;;  %vm976_vm11 = vcmp.lt.f32.partialorder %v5200_v7, %v5219_v21 }
 0x410   : > { %v5857_v51 = vpop.xlane.xlu1 %1691  ;;  %v5859_v0 = vpop.xlane.xlu0 %1670  ;;  %v1813_v6 = vsel %vm7677_vm1, %v1627_v61, 0.0  ;;  %v1792_v12 = vsel %vm7677_vm1, %v1620_v62, 0.0  ;;  %v1621_v61 = vsel %vm1557_vm10, 1.0, %v7678_v1  ;;  %vm780_vm10 = vmand %vm770_vm13, %vm5475_vm8  ;;  %v1816_v33 = vsel %vm7677_vm1, %v1628_v4, 0.0 }
 0x411   : > { %7759 = vst [vmem:[#allocation65_spill] sm:$0xff] %v5857_v51  ;;  %7760 = vst [vmem:[#allocation66_spill] sm:$0xff] %v5859_v0  ;;  %v1795_v45 = vsel %vm7677_vm1, %v1621_v61, 0.0 }
 0x412   : > { %vm5924_vm5 = vmor %vm763_vm2, %vm781_vm3  ;;  %vm982_vm3 = vcmp.eq.f32.partialorder %v5136_v29, %v5169_v47 }
 0x413   : > { %1772 = vadd.xlane.f32.xlu1 %v1771_v36  ;;  %1366 = vadd.xlane.f32.xlu0 %v1365_v41  ;;  %v1180_v36 = vsel %vm1116_vm6, 1.0, %v7678_v1  ;;  %v1173_v41 = vsel %vm1109_vm7, 1.0, %v7678_v1  ;;  %vm1565_vm6 = vcmp.le.f32.partialorder %v5513_v22, %v5467_v49  ;;  %vm1117_vm7 = vcmp.lt.f32.partialorder %v5484_v55, %v5506_v10  ;;  %vm788_vm13 = vmor %vm762_vm9, %vm780_vm10 }
 0x414   : > { %v5869_v42 = vpop.xlane.xlu1 %1733  ;;  %v5871_v51 = vpop.xlane.xlu0 %1712  ;;  %v1368_v40 = vsel %vm7677_vm1, %v1180_v36, 0.0  ;;  %v1347_v35 = vsel %vm7677_vm1, %v1173_v41, 0.0  ;;  %v1629_v34 = vsel %vm1565_vm6, 1.0, %v7678_v1  ;;  %v1181_v46 = vsel %vm1117_vm7, 1.0, %v7678_v1  ;;  %vm5938_vm2 = vmor %vm976_vm11, %vm992_vm0 }
 0x415   : > { %7761 = vst [vmem:[#allocation67_spill] sm:$0xff] %v5869_v42  ;;  %vm764_vm6 = vcmp.lt.f32.partialorder %v5211_v18, %v5187_v56  ;;  %vm782_vm7 = vmand %vm772_vm14, %vm5475_vm8  ;;  %v1819_v10 = vsel %vm7677_vm1, %v1629_v34, 0.0  ;;  %v1371_v22 = vsel %vm7677_vm1, %v1181_v46, 0.0  ;;  %vm977_vm9 = vcmp.lt.f32.partialorder %v5244_v50, %v5273_v9 }
 0x416   : > { %vm993_vm0 = vmand %vm985_vm15, %vm5475_vm8  ;;  %v796_v56 = vsel %vm788_vm13, 1.0, %v7678_v1  ;;  %vm974_vm14 = vcmp.lt.f32.partialorder %v5136_v29, %v5169_v47  ;;  %vm986_vm15 = vcmp.eq.f32.partialorder %v5309_v59, %v5337_v5  ;;  %vm7768_vm13 = vcmask 64512  }
 0x417   : > { %1814 = vadd.xlane.f32.xlu1 %v1813_v6  ;;  %1793 = vadd.xlane.f32.xlu0 %v1792_v12  ;;  %v797_v6 = vsel %vm5924_vm5, 1.0, %v7678_v1  ;;  %vm990_vm10 = vmand %vm982_vm3, %vm5475_vm8  ;;  %vm983_vm5 = vcmp.eq.f32.partialorder %v5140_v30, %v5179_v53  ;;  %v1008_v36 = vsel %vm5938_vm2, 1.0, %v7678_v1  ;;  %vm987_vm2 = vcmp.eq.f32.partialorder %v5369_v3, %v5405_v23 }
 0x418   : > { %v5881_v0 = vpop.xlane.xlu1 %1754  ;;  %v5883_v42 = vpop.xlane.xlu0 %1751  ;;  %vm790_vm11 = vmor %vm764_vm6, %vm782_vm7  ;;  %v807_v29 = vsel %vm7768_vm13, %v797_v6, 0.0  ;;  %vm978_vm6 = vcmp.lt.f32.partialorder %v5309_v59, %v5337_v5 }
 0x419   : > { %vm5968_vm1 = vmor %vm977_vm9, %vm993_vm0  ;;  %v798_v41 = vsel %vm790_vm11, 1.0, %v7678_v1  ;;  %vm773_vm11 = vcmp.eq.f32.partialorder %v5257_v60, %v5229_v28 }
 0x41a   : > { %vm7769_vm4 = vmmov %vm7768_vm13 }
 0x41b   : > { %1369 = vadd.xlane.f32.xlu1 %v1368_v40  ;;  %1348 = vadd.xlane.f32.xlu0 %v1347_v35  ;;  %v804_v47 = vsel %vm7769_vm4, %v796_v56, 0.0  ;;  %vm5976_vm3 = vmor %vm974_vm14, %vm990_vm10  ;;  %vm975_vm4 = vcmp.lt.f32.partialorder %v5140_v30, %v5179_v53  ;;  %v1009_v30 = vsel %vm5968_vm1, 1.0, %v7678_v1  ;;  %v1012_v56 = vsel %vm5492_vm12, 1.0, %v7678_v1 }
 0x41c   : > { %v5903_v15 = vpop.xlane.xlu1 %1225  ;;  %v5905_v62 = vpop.xlane.xlu0 %1201  ;;  %vm994_vm7 = vmand %vm986_vm15, %vm5475_vm8  ;;  %v1006_v53 = vsel %vm5976_vm3, 1.0, %v7678_v1 }
 0x41d   : > { %vm991_vm9 = vmand %vm983_vm5, %vm5475_vm8  ;;  %vm979_vm5 = vcmp.lt.f32.partialorder %v5369_v3, %v5405_v23 }
 0x41e   : > { %vm7772_vm0 = vmmov %vm7768_vm13 }
 0x41f   : > { %1817 = vadd.xlane.f32.xlu1 %v1816_v33  ;;  %1796 = vadd.xlane.f32.xlu0 %v1795_v45  ;;  %v1020_v4 = vsel %vm7772_vm0, %v1008_v36, 0.0  ;;  %vm7773_vm14 = vmmov %vm7772_vm0 }
 0x420   : > { %v5934_v7 = vpop.xlane.xlu1 %1267  ;;  %v5936_v21 = vpop.xlane.xlu0 %1246  ;;  %v810_v59 = vsel %vm7773_vm14, %v798_v41, 0.0  ;;  %vm6000_vm10 = vmor %vm978_vm6, %vm994_vm7  ;;  %vm765_vm6 = vcmp.lt.f32.partialorder %v5257_v60, %v5229_v28 }
 0x421   : > { %vm999_vm15 = vmor %vm975_vm4, %vm991_vm9  ;;  %vm774_vm4 = vcmp.eq.f32.partialorder %v5321_v54, %v5283_v19  ;;  %v1010_v3 = vsel %vm6000_vm10, 1.0, %v7678_v1  ;;  %vm775_vm10 = vcmp.eq.f32.partialorder %v5381_v57, %v5347_v16 }
 0x422   : > { %vm995_vm13 = vmand %vm987_vm2, %vm5475_vm8  ;;  %v1007_v23 = vsel %vm999_vm15, 1.0, %v7678_v1 }
 0x423   : > { %1820 = vadd.xlane.f32.xlu1 %v1819_v10  ;;  %1372 = vadd.xlane.f32.xlu0 %v1371_v22  ;;  %vm783_vm1 = vmand %vm773_vm11, %vm5475_vm8 }
 0x424   : > { %v5962_v18 = vpop.xlane.xlu1 %1309  ;;  %v5964_v50 = vpop.xlane.xlu0 %1288  ;;  %vm7776_vm7 = vmmov %vm7772_vm0 }
 0x425   : > { %v1023_v45 = vsel %vm7776_vm7, %v1009_v30, 0.0  ;;  %vm7777_vm3 = vmmov %vm7772_vm0  ;;  %vm766_vm0 = vcmp.lt.f32.partialorder %v5321_v54, %v5283_v19 }
 0x426   : > { %v1014_v49 = vsel %vm7777_vm3, %v1006_v53, 0.0  ;;  %vm1003_vm9 = vmor %vm979_vm5, %vm995_vm13  ;;  %vm767_vm5 = vcmp.lt.f32.partialorder %v5381_v57, %v5347_v16  ;;  %v4757_v53 = vmov 0  }
 0x427   : > { %808 = vadd.xlane.f32.xlu1 %v807_v29  ;;  %805 = vadd.xlane.f32.xlu0 %v804_v47  ;;  %vm791_vm2 = vmor %vm765_vm6, %vm783_vm1  ;;  %v1011_v55 = vsel %vm1003_vm9, 1.0, %v7678_v1  ;;  %vm7784_vm9 = vnez %v7721_v24 }
 0x428   : > { %v5988_v40 = vpop.xlane.xlu1 %1330  ;;  %v5990_v35 = vpop.xlane.xlu0 %1327  ;;  %vm784_vm14 = vmand %vm774_vm4, %vm5475_vm8  ;;  %v799_v10 = vsel %vm791_vm2, 1.0, %v7678_v1  ;;  %v1013_v11 = vsel %vm7784_vm9, 1.0, %v7678_v1  ;;  %4495 = vset.pattern.permute.xlu1 %v4757_v53  ;;  %4494 = vset.pattern.permute.xlu0 %v4757_v53 }
 0x429   : > { %vm7778_vm11 = vmmov %vm7777_vm3 }
 0x42a   : > { %v1026_v34 = vsel %vm7778_vm11, %v1010_v3, 0.0  ;;  %vm7779_vm7 = vmmov %vm7777_vm3  ;;  %vm7791_vm11 = vnez %v7725_v31 }
 0x42b   : > { %1021 = vadd.xlane.f32.xlu1 %v1020_v4  ;;  %811 = vadd.xlane.f32.xlu0 %v810_v59  ;;  %v1017_v46 = vsel %vm7779_vm7, %v1007_v23, 0.0  ;;  %vm792_vm15 = vmor %vm766_vm0, %vm784_vm14  ;;  %vm7787_vm0 = vnez %v7723_v48 }
 0x42c   : > { %v6012_v61 = vpop.xlane.xlu1 %1673  ;;  %v6014_v33 = vpop.xlane.xlu0 %1649  ;;  %vm785_vm13 = vmand %vm775_vm10, %vm5475_vm8  ;;  %v800_v9 = vsel %vm792_vm15, 1.0, %v7678_v1  ;;  %v802_v59 = vsel %vm7787_vm0, 1.0, %v7678_v1 }
 0x42d   : > { %vm7780_vm6 = vmmov %vm7777_vm3 }
 0x42e   : > { %v1029_v19 = vsel %vm7780_vm6, %v1011_v55, 0.0  ;;  %vm7781_vm1 = vmmov %vm7777_vm3 }
 0x42f   : > { %1024 = vadd.xlane.f32.xlu1 %v1023_v45  ;;  %1015 = vadd.xlane.f32.xlu0 %v1014_v49  ;;  %v813_v54 = vsel %vm7781_vm1, %v799_v10, 0.0  ;;  %vm793_vm3 = vmor %vm767_vm5, %vm785_vm13  ;;  %v803_v45 = vsel %vm7791_vm11, 1.0, %v7678_v1 }
 0x430   : > { %v6032_v28 = vpop.xlane.xlu1 %1715  ;;  %v6034_v60 = vpop.xlane.xlu0 %1694  ;;  %vm7782_vm4 = vmmov %vm7781_vm1  ;;  %v801_v63 = vsel %vm793_vm3, 1.0, %v7678_v1 }
 0x431   : > { %v1032_v16 = vsel %vm7782_vm4, %v1012_v56, 0.0  ;;  %vm7783_vm8 = vmmov %vm7781_vm1 }
 0x432   : > { %v816_v57 = vsel %vm7783_vm8, %v800_v9, 0.0  ;;  %vm7785_vm12 = vmmov %vm7781_vm1 }
 0x433   : > { %1027 = vadd.xlane.f32.xlu1 %v1026_v34  ;;  %1018 = vadd.xlane.f32.xlu0 %v1017_v46  ;;  %v1035_v41 = vsel %vm7785_vm12, %v1013_v11, 0.0  ;;  %vm7786_vm2 = vmmov %vm7781_vm1 }
 0x434   : > { %v6046_v22 = vpop.xlane.xlu1 %1757  ;;  %v6048_v6 = vpop.xlane.xlu0 %1736  ;;  %v819_v4 = vsel %vm7786_vm2, %v801_v63, 0.0  ;;  %vm7790_vm14 = vmmov %vm7781_vm1 }
 0x435   : > { %v822_v30 = vsel %vm7790_vm14, %v802_v59, 0.0  ;;  %vm7794_vm7 = vmmov %vm7781_vm1 }
 0x436   : > { %v825_v48 = vsel %vm7794_vm7, %v803_v45, 0.0 }
 0x437   : > { %1030 = vadd.xlane.f32.xlu1 %v1029_v19  ;;  %814 = vadd.xlane.f32.xlu0 %v813_v54 }
 0x438   : > { %v6060_v29 = vpop.xlane.xlu1 %1778  ;;  %v6062_v47 = vpop.xlane.xlu0 %1775 }
 0x43b   : > { %1033 = vadd.xlane.f32.xlu1 %v1032_v16  ;;  %817 = vadd.xlane.f32.xlu0 %v816_v57 }
 0x43c   : > { %v6070_v12 = vpop.xlane.xlu1 %1228  ;;  %v6072_v36 = vpop.xlane.xlu0 %1204 }
 0x43f   : > { %1036 = vadd.xlane.f32.xlu1 %v1035_v41  ;;  %820 = vadd.xlane.f32.xlu0 %v819_v4 }
 0x440   : > { %v6079_v5 = vpop.xlane.xlu1 %1270  ;;  %v6081_v24 = vpop.xlane.xlu0 %1249 }
 0x441   : > { %7788 = vst [vmem:[#allocation68_spill] sm:$0xff] %v6079_v5  ;;  %7789 = vst [vmem:[#allocation69_spill] sm:$0xff] %v6081_v24 }
 0x443   : > { %823 = vadd.xlane.f32.xlu0 %v822_v30 }
 0x444   : > { %v6087_v49 = vpop.xlane.xlu1 %1312  ;;  %v6089_v3 = vpop.xlane.xlu0 %1291 }
 0x445   : > { %7792 = vst [vmem:[#allocation70_spill] sm:$0xff] %v6087_v49  ;;  %7793 = vst [vmem:[#allocation71_spill] sm:$0xff] %v6089_v3 }
 0x447   : > { %826 = vadd.xlane.f32.xlu0 %v825_v48 }
 0x448   : > { %v6092_v23 = vpop.xlane.xlu1 %1351  ;;  %v6094_v34 = vpop.xlane.xlu0 %1333 }
 0x449   : > { %7795 = vst [vmem:[#allocation72_spill] sm:$0xff] %v6092_v23  ;;  %7796 = vst [vmem:[#allocation73_spill] sm:$0xff] %v6094_v34 }
 0x44c   : > { %v6096_v46 = vpop.xlane.xlu1 %1652  ;;  %v6098_v55 = vpop.xlane.xlu0 %1354 }
 0x44d   : > { %7797 = vst [vmem:[#allocation74_spill] sm:$0xff] %v6096_v46  ;;  %7798 = vst [vmem:[#allocation75_spill] sm:$0xff] %v6098_v55 }
 0x450   : > { %v6100_v10 = vpop.xlane.xlu1 %1697  ;;  %v6102_v19 = vpop.xlane.xlu0 %1676 }
 0x451   : > { %7799 = vst [vmem:[#allocation76_spill] sm:$0xff] %v6100_v10  ;;  %7800 = vst [vmem:[#allocation77_spill] sm:$0xff] %v6102_v19 }
 0x454   : > { %v6104_v31 = vpop.xlane.xlu1 %1739  ;;  %v6106_v54 = vpop.xlane.xlu0 %1718 }
 0x455   : > { %7801 = vst [vmem:[#allocation78_spill] sm:$0xff] %v6104_v31  ;;  %7802 = vst [vmem:[#allocation79_spill] sm:$0xff] %v6106_v54 }
 0x458   : > { %v6108_v56 = vpop.xlane.xlu1 %1781  ;;  %v6110_v9 = vpop.xlane.xlu0 %1760 }
 0x459   : > { %7803 = vst [vmem:[#allocation80_spill] sm:$0xff] %v6108_v56  ;;  %7804 = vst [vmem:[#allocation81_spill] sm:$0xff] %v6110_v9 }
 0x45c   : > { %v6112_v16 = vpop.xlane.xlu1 %1802  ;;  %v6114_v57 = vpop.xlane.xlu0 %1799 }
 0x45d   : > { %7805 = vst [vmem:[#allocation82_spill] sm:$0xff] %v6112_v16  ;;  %7806 = vst [vmem:[#allocation83_spill] sm:$0xff] %v6114_v57 }
 0x460   : > { %v6116_v11 = vpop.xlane.xlu1 %1273  ;;  %v6118_v63 = vpop.xlane.xlu0 %1252 }
 0x461   : > { %7807 = vst [vmem:[#allocation84_spill] sm:$0xff] %v6116_v11  ;;  %7808 = vst [vmem:[#allocation85_spill] sm:$0xff] %v6118_v63 }
 0x464   : > { %v6120_v41 = vpop.xlane.xlu1 %1315  ;;  %v6122_v4 = vpop.xlane.xlu0 %1294 }
 0x465   : > { %7809 = vst [vmem:[#allocation86_spill] sm:$0xff] %v6120_v41  ;;  %7810 = vst [vmem:[#allocation87_spill] sm:$0xff] %v6122_v4 }
 0x468   : > { %v6124_v59 = vpop.xlane.xlu1 %1357  ;;  %v6126_v30 = vpop.xlane.xlu0 %1336 }
 0x469   : > { %7811 = vst [vmem:[#allocation88_spill] sm:$0xff] %v6124_v59  ;;  %7812 = vst [vmem:[#allocation89_spill] sm:$0xff] %v6126_v30 }
 0x46c   : > { %v6128_v53 = vpop.xlane.xlu1 %1721  ;;  %v6130_v45 = vpop.xlane.xlu0 %1700 }
 0x46d   : > { %7813 = vst [vmem:[#allocation90_spill] sm:$0xff] %v6128_v53  ;;  %7814 = vst [vmem:[#allocation91_spill] sm:$0xff] %v6130_v45 }
 0x470   : > { %v6132_v48 = vpop.xlane.xlu1 %1763  ;;  %v6134_v1 = vpop.xlane.xlu0 %1742 }
 0x471   : > { %7815 = vst [vmem:[#allocation92_spill] sm:$0xff] %v6132_v48  ;;  %7816 = vst [vmem:[#allocation93_spill] sm:$0xff] %v6134_v1 }
 0x474   : > { %v6136_v55 = vpop.xlane.xlu1 %1805  ;;  %v6138_v11 = vpop.xlane.xlu0 %1784 }
 0x475   : > { %7817 = vst [vmem:[#allocation94_spill] sm:$0xff] %v6136_v55  ;;  %7818 = vst [vmem:[#allocation95_spill] sm:$0xff] %v6138_v11 }
 0x478   : > { %v6140_v63 = vpop.xlane.xlu1 %1297  ;;  %v6142_v41 = vpop.xlane.xlu0 %1276 }
 0x479   : > { %7819 = vst [vmem:[#allocation96_spill] sm:$0xff] %v6140_v63  ;;  %7820 = vst [vmem:[#allocation97_spill] sm:$0xff] %v6142_v41 }
 0x47c   : > { %v6144_v4 = vpop.xlane.xlu1 %1339  ;;  %v6146_v59 = vpop.xlane.xlu0 %1318 }
 0x47d   : > { %7821 = vst [vmem:[#allocation98_spill] sm:$0xff] %v6144_v4  ;;  %7822 = vst [vmem:[#allocation99_spill] sm:$0xff] %v6146_v59 }
 0x480   : > { %v6148_v30 = vpop.xlane.xlu1 %1724  ;;  %v6150_v53 = vpop.xlane.xlu0 %1360 }
 0x481   : > { %7823 = vst [vmem:[#allocation100_spill] sm:$0xff] %v6148_v30  ;;  %7824 = vst [vmem:[#allocation101_spill] sm:$0xff] %v6150_v53 }
 0x484   : > { %v6152_v45 = vpop.xlane.xlu1 %1766  ;;  %v6154_v48 = vpop.xlane.xlu0 %1745 }
 0x485   : > { %7825 = vst [vmem:[#allocation102_spill] sm:$0xff] %v6152_v45  ;;  %7826 = vst [vmem:[#allocation103_spill] sm:$0xff] %v6154_v48 }
 0x488   : > { %v6156_v1 = vpop.xlane.xlu1 %1808  ;;  %v6158_v55 = vpop.xlane.xlu0 %1787 }
 0x489   : > { %7827 = vst [vmem:[#allocation104_spill] sm:$0xff] %v6156_v1  ;;  %7828 = vst [vmem:[#allocation105_spill] sm:$0xff] %v6158_v55 }
 0x48c   : > { %v6160_v11 = vpop.xlane.xlu1 %1321  ;;  %v6162_v63 = vpop.xlane.xlu0 %1300 }
 0x48d   : > { %7829 = vst [vmem:[#allocation106_spill] sm:$0xff] %v6160_v11  ;;  %7830 = vst [vmem:[#allocation107_spill] sm:$0xff] %v6162_v63 }
 0x490   : > { %v6164_v41 = vpop.xlane.xlu1 %1363  ;;  %v6166_v4 = vpop.xlane.xlu0 %1342 }
 0x491   : > { %7831 = vst [vmem:[#allocation108_spill] sm:$0xff] %v6164_v41  ;;  %7832 = vst [vmem:[#allocation109_spill] sm:$0xff] %v6166_v4 }
 0x494   : > { %v6168_v59 = vpop.xlane.xlu1 %1769  ;;  %v6170_v30 = vpop.xlane.xlu0 %1748 }
 0x495   : > { %7833 = vst [vmem:[#allocation110_spill] sm:$0xff] %v6168_v59  ;;  %7834 = vst [vmem:[#allocation111_spill] sm:$0xff] %v6170_v30 }
 0x498   : > { %v6172_v53 = vpop.xlane.xlu1 %1811  ;;  %v6174_v45 = vpop.xlane.xlu0 %1790 }
 0x499   : > { %7835 = vst [vmem:[#allocation112_spill] sm:$0xff] %v6172_v53  ;;  %7836 = vst [vmem:[#allocation113_spill] sm:$0xff] %v6174_v45 }
 0x49c   : > { %v6176_v48 = vpop.xlane.xlu1 %1345  ;;  %v6178_v1 = vpop.xlane.xlu0 %1324 }
 0x49d   : > { %7837 = vst [vmem:[#allocation114_spill] sm:$0xff] %v6176_v48  ;;  %7838 = vst [vmem:[#allocation115_spill] sm:$0xff] %v6178_v1 }
 0x4a0   : > { %v6180_v55 = vpop.xlane.xlu1 %1772  ;;  %v6182_v11 = vpop.xlane.xlu0 %1366 }
 0x4a1   : > { %7839 = vst [vmem:[#allocation116_spill] sm:$0xff] %v6180_v55  ;;  %7840 = vst [vmem:[#allocation117_spill] sm:$0xff] %v6182_v11 }
 0x4a4   : > { %v6184_v63 = vpop.xlane.xlu1 %1814  ;;  %v6186_v41 = vpop.xlane.xlu0 %1793 }
 0x4a5   : > { %7841 = vst [vmem:[#allocation118_spill] sm:$0xff] %v6184_v63  ;;  %7842 = vst [vmem:[#allocation119_spill] sm:$0xff] %v6186_v41 }
 0x4a8   : > { %v6188_v4 = vpop.xlane.xlu1 %1369  ;;  %v6190_v59 = vpop.xlane.xlu0 %1348 }
 0x4a9   : > { %7843 = vst [vmem:[#allocation120_spill] sm:$0xff] %v6188_v4  ;;  %7844 = vst [vmem:[#allocation121_spill] sm:$0xff] %v6190_v59 }
 0x4ac   : > { %v6192_v30 = vpop.xlane.xlu1 %1817  ;;  %v6194_v53 = vpop.xlane.xlu0 %1796 }
 0x4ad   : > { %7845 = vst [vmem:[#allocation122_spill] sm:$0xff] %v6192_v30  ;;  %7846 = vst [vmem:[#allocation123_spill] sm:$0xff] %v6194_v53  ;;  %v7849_v53 = vmov 0.0  }
 0x4b0   : > { %v6196_v45 = vpop.xlane.xlu1 %1820  ;;  %v6198_v48 = vpop.xlane.xlu0 %1372 }
 0x4b1   : > { %7847 = vst [vmem:[#allocation124_spill] sm:$0xff] %v6196_v45  ;;  %7848 = vst [vmem:[#allocation125_spill] sm:$0xff] %v6198_v48 }
 0x4b4   : > { %v809_v1 = vpop.xlane.xlu1 %808  ;;  %v806_v55 = vpop.xlane.xlu0 %805 }
 0x4b5   : > { %v6200_v16 = vsub.f32 8.0, %v809_v1  ;;  %v6202_v11 = vsub.f32 8.0, %v806_v55 }
 0x4b7   : > { %vm1375_vm10 = vcmp.lt.f32.partialorder %v5581_v13, %v6200_v16  ;;  %vm1374_vm15 = vcmp.lt.f32.partialorder %v5583_v20, %v6202_v11  ;;  %vm1383_vm5 = vcmp.lt.f32.partialorder %v5593_v27, %v6200_v16  ;;  %vm1382_vm1 = vcmp.lt.f32.partialorder %v5595_v52, %v6202_v11 }
 0x4b8   : > { %v812_v63 = vpop.xlane.xlu0 %811  ;;  %v1439_v45 = vsel %vm1375_vm10, 1.0, %v7849_v53  ;;  %v1438_v1 = vsel %vm1374_vm15, 1.0, %v7849_v53  ;;  %v1447_v27 = vsel %vm1383_vm5, 1.0, %v7849_v53  ;;  %v1446_v41 = vsel %vm1382_vm1, 1.0, %v7849_v53 }
 0x4b9   : > { %v1962_v55 = vmul.f32 %v5058_v26, %v1439_v45  ;;  %v1969_v31 = vmul.f32 %v5058_v26, %v1446_v41  ;;  %v2773_v9 = vmul.f32 %v5064_v38, %v1439_v45 }
 0x4bc   : > { %v1016_v30 = vpop.xlane.xlu0 %1015 }
 0x4bd   : > { %v6208_v4 = vsub.f32 8.0, %v1016_v30 }
 0x4bf   : > { %vm1823_vm13 = vcmp.lt.f32.partialorder %v5605_v25, %v6208_v4  ;;  %vm1822_vm6 = vcmp.lt.f32.partialorder %v5607_v32, %v6208_v4  ;;  %v1961_v25 = vmul.f32 %v5058_v26, %v1438_v1  ;;  %vm1824_vm9 = vcmp.lt.f32.partialorder %v5655_v43, %v6208_v4 }
 0x4c0   : > { %v1019_v13 = vpop.xlane.xlu0 %1018  ;;  %v1887_v20 = vsel %vm1823_vm13, 1.0, %v7849_v53  ;;  %v1886_v30 = vsel %vm1822_vm6, 1.0, %v7849_v53  ;;  %v2780_v43 = vmul.f32 %v5064_v38, %v1446_v41 }
 0x4c1   : > { %v6224_v48 = vsub.f32 8.0, %v1019_v13  ;;  %v2032_v59 = vmul.f32 %v5062_v37, %v1887_v20  ;;  %v2031_v32 = vmul.f32 %v5062_v37, %v1886_v30  ;;  %v1970_v13 = vmul.f32 %v5058_v26, %v1447_v27 }
 0x4c2   : > { %v2842_v3 = vmul.f32 %v5066_v39, %v1886_v30 }
 0x4c3   : > { %v2096_v52 = vadd.f32 %v2032_v59, %v1962_v55  ;;  %v2095_v34 = vadd.f32 %v2031_v32, %v1961_v25  ;;  %vm1831_vm3 = vcmp.lt.f32.partialorder %v5617_v17, %v6224_v48  ;;  %vm1830_vm4 = vcmp.lt.f32.partialorder %v5619_v8, %v6224_v48  ;;  %v1022_v55 = vpop.xlane.xlu1 %1021 }
 0x4c4   : > { %v1895_v23 = vsel %vm1831_vm3, 1.0, %v7849_v53  ;;  %v1894_v56 = vsel %vm1830_vm4, 1.0, %v7849_v53  ;;  %v6240_v25 = vsub.f32 8.0, %v812_v63  ;;  %v2843_v8 = vmul.f32 %v5066_v39, %v1887_v20 }
 0x4c5   : > { %2227 = vperm.xlu1 %4495, %v2096_v52   ;;  %2224 = vperm.xlu0 %4494, %v2095_v34   ;;  %v2040_v57 = vmul.f32 %v5062_v37, %v1895_v23  ;;  %v2039_v59 = vmul.f32 %v5062_v37, %v1894_v56  ;;  %v6245_v49 = vsub.f32 8.0, %v1022_v55  ;;  %v2772_v34 = vmul.f32 %v5064_v38, %v1438_v1 }
 0x4c6   : > { %vm1832_vm8 = vcmp.lt.f32.partialorder %v5653_v44, %v6224_v48  ;;  %vm1384_vm12 = vcmp.lt.f32.partialorder %v5629_v58, %v6240_v25  ;;  %vm1376_vm2 = vcmp.lt.f32.partialorder %v5631_v14, %v6240_v25  ;;  %v2851_v63 = vmul.f32 %v5066_v39, %v1895_v23  ;;  %v7850_v58 = vld [vmem:[#allocation34_spill] sm:$0xff]  ;;  %v7851_v23 = vld [vmem:[#allocation32_spill] sm:$0xff] }
 0x4c7   : > { %v2104_v17 = vadd.f32 %v2040_v57, %v1970_v13  ;;  %v2103_v32 = vadd.f32 %v2039_v59, %v1969_v31  ;;  %v2907_v31 = vadd.f32 %v2843_v8, %v2773_v9  ;;  %v2906_v57 = vadd.f32 %v2842_v3, %v2772_v34  ;;  %v815_v13 = vpop.xlane.xlu0 %814 }
 0x4c8   : > { %v2850_v45 = vmul.f32 %v5066_v39, %v1894_v56  ;;  %v2781_v1 = vmul.f32 %v5064_v38, %v1447_v27  ;;  %v1896_v20 = vsel %vm1832_vm8, 1.0, %v7849_v53  ;;  %v1888_v44 = vsel %vm1824_vm9, 1.0, %v7849_v53  ;;  %v7852_v56 = vld [vmem:[#allocation33_spill] sm:$0xff] }
 0x4c9   : > { %2251 = vperm.xlu0 %4494, %v2104_v17   ;;  %2248 = vperm.xlu1 %4495, %v2103_v32   ;;  %vm1839_vm0 = vcmp.lt.f32.partialorder %v5665_v2, %v6245_v49  ;;  %vm1838_vm14 = vcmp.lt.f32.partialorder %v7850_v58, %v6245_v49  ;;  %v1448_v14 = vsel %vm1384_vm12, 1.0, %v7849_v53  ;;  %v1440_v3 = vsel %vm1376_vm2, 1.0, %v7849_v53 }
 0x4ca   : > { %vm1391_vm11 = vcmp.lt.f32.partialorder %v7851_v23, %v6200_v16  ;;  %vm1390_vm7 = vcmp.lt.f32.partialorder %v7852_v56, %v6202_v11  ;;  %v2915_v9 = vadd.f32 %v2851_v63, %v2781_v1  ;;  %v2914_v30 = vadd.f32 %v2850_v45, %v2780_v43  ;;  %v1025_v43 = vpop.xlane.xlu1 %1024 }
 0x4cb   : > { %v2041_v41 = vmul.f32 %v5062_v37, %v1896_v20  ;;  %v2033_v27 = vmul.f32 %v5062_v37, %v1888_v44  ;;  %v1903_v2 = vsel %vm1839_vm0, 1.0, %v7849_v53  ;;  %v1902_v52 = vsel %vm1838_vm14, 1.0, %v7849_v53 }
 0x4cc   : > { %v1971_v59 = vmul.f32 %v5058_v26, %v1448_v14  ;;  %v1963_v55 = vmul.f32 %v5058_v26, %v1440_v3  ;;  %v1455_v17 = vsel %vm1391_vm11, 1.0, %v7849_v53  ;;  %v1454_v32 = vsel %vm1390_vm7, 1.0, %v7849_v53 }
 0x4cd   : > { %3038 = vperm.xlu0 %4494, %v2907_v31   ;;  %3035 = vperm.xlu1 %4495, %v2906_v57   ;;  %v2048_v31 = vmul.f32 %v5062_v37, %v1903_v2  ;;  %v2047_v57 = vmul.f32 %v5062_v37, %v1902_v52  ;;  %v6282_v63 = vsub.f32 8.0, %v815_v13  ;;  %v1978_v45 = vmul.f32 %v5058_v26, %v1455_v17 }
 0x4ce   : > { %v2105_v8 = vadd.f32 %v2041_v41, %v1971_v59  ;;  %v2097_v34 = vadd.f32 %v2033_v27, %v1963_v55  ;;  %v1977_v1 = vmul.f32 %v5058_v26, %v1454_v32  ;;  %v2852_v58 = vmul.f32 %v5066_v39, %v1896_v20  ;;  %v7853_v41 = vld [vmem:[#allocation35_spill] sm:$0xff]  ;;  %v7854_v27 = vld [vmem:[#allocation36_spill] sm:$0xff]  ;;  %v7855_v20 = vld [vmem:[#allocation42_spill] sm:$0xff] }
 0x4cf   : > { %v2112_v23 = vadd.f32 %v2048_v31, %v1978_v45  ;;  %vm1385_vm10 = vcmp.lt.f32.partialorder %v7853_v41, %v6282_v63  ;;  %vm1377_vm15 = vcmp.lt.f32.partialorder %v7854_v27, %v6282_v63  ;;  %v6293_v13 = vsub.f32 8.0, %v1025_v43  ;;  %v7857_v43 = vld [vmem:[#allocation44_spill] sm:$0xff] }
 0x4d0   : > { %v2111_v56 = vadd.f32 %v2047_v57, %v1977_v1  ;;  %v2774_v59 = vmul.f32 %v5064_v38, %v1440_v3  ;;  %vm1833_vm5 = vcmp.lt.f32.partialorder %v7855_v20, %v6224_v48  ;;  %v1449_v31 = vsel %vm1385_vm10, 1.0, %v7849_v53 }
 0x4d1   : > { %3062 = vperm.xlu0 %4494, %v2915_v9   ;;  %3059 = vperm.xlu1 %4495, %v2914_v30   ;;  %v2844_v9 = vmul.f32 %v5066_v39, %v1888_v44  ;;  %v2782_v30 = vmul.f32 %v5064_v38, %v1448_v14  ;;  %v2859_v44 = vmul.f32 %v5066_v39, %v1903_v2  ;;  %v7856_v14 = vld [vmem:[#allocation39_spill] sm:$0xff]  ;;  %v1441_v57 = vsel %vm1377_vm15, 1.0, %v7849_v53 }
 0x4d2   : > { %vm1825_vm13 = vcmp.lt.f32.partialorder %v7856_v14, %v6208_v4  ;;  %v2789_v45 = vmul.f32 %v5064_v38, %v1455_v17  ;;  %v2788_v3 = vmul.f32 %v5064_v38, %v1454_v32  ;;  %v1897_v1 = vsel %vm1833_vm5, 1.0, %v7849_v53 }
 0x4d3   : > { %v2916_v55 = vadd.f32 %v2852_v58, %v2782_v30  ;;  %v1889_v2 = vsel %vm1825_vm13, 1.0, %v7849_v53  ;;  %vm1846_vm6 = vcmp.lt.f32.partialorder %v7857_v43, %v6293_v13  ;;  %v7858_v58 = vld [vmem:[#allocation38_spill] sm:$0xff]  ;;  %v1964_v17 = vmul.f32 %v5058_v26, %v1441_v57  ;;  %v7860_v30 = vld [vmem:[#allocation37_spill] sm:$0xff]  ;;  %v7862_v43 = vld [vmem:[#allocation40_spill] sm:$0xff] }
 0x4d4   : > { %vm1392_vm1 = vcmp.lt.f32.partialorder %v7858_v58, %v6240_v25  ;;  %v2923_v32 = vadd.f32 %v2859_v44, %v2789_v45  ;;  %vm1398_vm4 = vcmp.lt.f32.partialorder %v7860_v30, %v6202_v11  ;;  %v2034_v41 = vmul.f32 %v5062_v37, %v1889_v2 }
 0x4d5   : > { %2254 = vperm.xlu0 %4494, %v2105_v8   ;;  %2230 = vperm.xlu1 %4495, %v2097_v34   ;;  %v2908_v8 = vadd.f32 %v2844_v9, %v2774_v59  ;;  %v2858_v34 = vmul.f32 %v5066_v39, %v1902_v52  ;;  %v7859_v52 = vld [vmem:[#allocation41_spill] sm:$0xff]  ;;  %v2042_v9 = vmul.f32 %v5062_v37, %v1897_v1  ;;  %v1910_v27 = vsel %vm1846_vm6, 1.0, %v7849_v53 }
 0x4d6   : > { %vm1840_vm3 = vcmp.lt.f32.partialorder %v7859_v52, %v6245_v49  ;;  %v1456_v59 = vsel %vm1392_vm1, 1.0, %v7849_v53  ;;  %v2098_v14 = vadd.f32 %v2034_v41, %v1964_v17  ;;  %vm1399_vm9 = vcmp.lt.f32.partialorder %v7862_v43, %v6200_v16  ;;  %v818_v52 = vpop.xlane.xlu0 %817 }
 0x4d7   : > { %v1904_v20 = vsel %vm1840_vm3, 1.0, %v7849_v53  ;;  %v1979_v45 = vmul.f32 %v5058_v26, %v1456_v59  ;;  %v1463_v17 = vsel %vm1399_vm9, 1.0, %v7849_v53  ;;  %v6336_v41 = vsub.f32 8.0, %v818_v52 }
 0x4d8   : > { %v1986_v43 = vmul.f32 %v5058_v26, %v1463_v17  ;;  %v2790_v10 = vmul.f32 %v5064_v38, %v1456_v59  ;;  %v2783_v54 = vmul.f32 %v5064_v38, %v1449_v31  ;;  %v7865_v59 = vld [vmem:[#allocation51_spill] sm:$0xff] }
 0x4d9   : > { %2275 = vperm.xlu0 %4494, %v2112_v23   ;;  %2272 = vperm.xlu1 %4495, %v2111_v56   ;;  %v1972_v23 = vmul.f32 %v5058_v26, %v1449_v31  ;;  %v2922_v56 = vadd.f32 %v2858_v34, %v2788_v3  ;;  %v2055_v34 = vmul.f32 %v5062_v37, %v1910_v27 }
 0x4da   : > { %v2049_v3 = vmul.f32 %v5062_v37, %v1904_v20  ;;  %vm1834_vm0 = vcmp.lt.f32.partialorder %v7865_v59, %v6224_v48 }
 0x4db   : > { %v2106_v44 = vadd.f32 %v2042_v9, %v1972_v23  ;;  %v2775_v23 = vmul.f32 %v5064_v38, %v1441_v57  ;;  %v2860_v57 = vmul.f32 %v5066_v39, %v1904_v20 }
 0x4dc   : > { %v2113_v9 = vadd.f32 %v2049_v3, %v1979_v45  ;;  %v2853_v45 = vmul.f32 %v5066_v39, %v1897_v1  ;;  %v1028_v3 = vpop.xlane.xlu1 %1027  ;;  %v2797_v1 = vmul.f32 %v5064_v38, %v1463_v17 }
 0x4dd   : > { %3065 = vperm.xlu0 %4494, %v2916_v55   ;;  %3041 = vperm.xlu1 %4495, %v2908_v8   ;;  %v7861_v55 = vld [vmem:[#allocation43_spill] sm:$0xff]  ;;  %v1462_v8 = vsel %vm1398_vm4, 1.0, %v7849_v53  ;;  %v2924_v20 = vadd.f32 %v2860_v57, %v2790_v10  ;;  %v1898_v10 = vsel %vm1834_vm0, 1.0, %v7849_v53  ;;  %vm1849_vm0 = vcmp.lt.f32.partialorder %v5871_v51, %v6293_v13 }
 0x4de   : > { %vm1847_vm8 = vcmp.lt.f32.partialorder %v7861_v55, %v6293_v13  ;;  %v2845_v55 = vmul.f32 %v5066_v39, %v1889_v2  ;;  %v7864_v2 = vld [vmem:[#allocation46_spill] sm:$0xff]  ;;  %v2917_v31 = vadd.f32 %v2853_v45, %v2783_v54  ;;  %v7868_v54 = vld [vmem:[#allocation48_spill] sm:$0xff]  ;;  %v2043_v45 = vmul.f32 %v5062_v37, %v1898_v10  ;;  %v7882_v51 = vld [vmem:[#allocation67_spill] sm:$0xff] }
 0x4df   : > { %v1911_v58 = vsel %vm1847_vm8, 1.0, %v7849_v53  ;;  %vm1378_vm2 = vcmp.lt.f32.partialorder %v7864_v2, %v6336_v41  ;;  %vm1393_vm7 = vcmp.lt.f32.partialorder %v7868_v54, %v6282_v63  ;;  %v7874_v54 = vld [vmem:[#allocation50_spill] sm:$0xff] }
 0x4e0   : > { %v2056_v30 = vmul.f32 %v5062_v37, %v1911_v58  ;;  %v2867_v52 = vmul.f32 %v5066_v39, %v1911_v58  ;;  %v7867_v58 = vld [vmem:[#allocation53_spill] sm:$0xff]  ;;  %v1457_v2 = vsel %vm1393_vm7, 1.0, %v7849_v53  ;;  %vm1406_vm1 = vcmp.lt.f32.partialorder %v7874_v54, %v6202_v11 }
 0x4e1   : > { %3086 = vperm.xlu0 %4494, %v2923_v32   ;;  %3083 = vperm.xlu1 %4495, %v2922_v56   ;;  %v1985_v32 = vmul.f32 %v5058_v26, %v1462_v8  ;;  %vm1848_vm11 = vcmp.lt.f32.partialorder %v7867_v58, %v6293_v13  ;;  %v7873_v58 = vld [vmem:[#allocation49_spill] sm:$0xff] }
 0x4e2   : > { %v1912_v57 = vsel %vm1848_vm11, 1.0, %v7849_v53  ;;  %vm1407_vm6 = vcmp.lt.f32.partialorder %v7873_v58, %v6200_v16  ;;  %v821_v58 = vpop.xlane.xlu0 %820 }
 0x4e3   : > { %v2119_v56 = vadd.f32 %v2055_v34, %v1985_v32  ;;  %v7863_v34 = vld [vmem:[#allocation45_spill] sm:$0xff]  ;;  %v2866_v32 = vmul.f32 %v5066_v39, %v1910_v27  ;;  %v6360_v27 = vsub.f32 8.0, %v1028_v3  ;;  %v6400_v19 = vsub.f32 8.0, %v821_v58 }
 0x4e4   : > { %vm1386_vm12 = vcmp.lt.f32.partialorder %v7863_v34, %v6336_v41  ;;  %v7870_v34 = vld [vmem:[#allocation54_spill] sm:$0xff] }
 0x4e5   : > { %2257 = vperm.xlu0 %4494, %v2106_v44   ;;  %2233 = vperm.xlu1 %4495, %v2098_v14   ;;  %v2909_v44 = vadd.f32 %v2845_v55, %v2775_v23  ;;  %v2120_v14 = vadd.f32 %v2056_v30, %v1986_v43  ;;  %v1450_v23 = vsel %vm1386_vm12, 1.0, %v7849_v53  ;;  %v1442_v30 = vsel %vm1378_vm2, 1.0, %v7849_v53 }
 0x4e6   : > { %v2931_v55 = vadd.f32 %v2867_v52, %v2797_v1  ;;  %v1973_v17 = vmul.f32 %v5058_v26, %v1450_v23  ;;  %vm1841_vm15 = vcmp.lt.f32.partialorder %v7870_v34, %v6245_v49  ;;  %v7871_v52 = vld [vmem:[#allocation55_spill] sm:$0xff]  ;;  %v1470_v34 = vsel %vm1406_vm1, 1.0, %v7849_v53 }
 0x4e7   : > { %vm1855_vm5 = vcmp.lt.f32.partialorder %v7871_v52, %v6360_v27  ;;  %v2784_v5 = vmul.f32 %v5064_v38, %v1450_v23  ;;  %v2776_v46 = vmul.f32 %v5064_v38, %v1442_v30  ;;  %v7875_v23 = vld [vmem:[#allocation57_spill] sm:$0xff]  ;;  %vm1856_vm7 = vcmp.lt.f32.partialorder %v7882_v51, %v6360_v27 }
 0x4e8   : > { %v2107_v59 = vadd.f32 %v2043_v45, %v1973_v17  ;;  %vm1387_vm3 = vcmp.lt.f32.partialorder %v7875_v23, %v6400_v19 }
 0x4e9   : > { %2296 = vperm.xlu0 %4494, %v2119_v56   ;;  %2278 = vperm.xlu1 %4495, %v2113_v9   ;;  %v7866_v56 = vld [vmem:[#allocation52_spill] sm:$0xff]  ;;  %v2796_v9 = vmul.f32 %v5064_v38, %v1462_v8 }
 0x4ea   : > { %vm1826_vm14 = vcmp.lt.f32.partialorder %v7866_v56, %v6208_v4  ;;  %v1905_v56 = vsel %vm1841_vm15, 1.0, %v7849_v53 }
 0x4eb   : > { %v2930_v43 = vadd.f32 %v2866_v32, %v2796_v9  ;;  %v1890_v8 = vsel %vm1826_vm14, 1.0, %v7849_v53  ;;  %v7872_v32 = vld [vmem:[#allocation56_spill] sm:$0xff]  ;;  %v1980_v9 = vmul.f32 %v5058_v26, %v1457_v2 }
 0x4ec   : > { %v2035_v3 = vmul.f32 %v5062_v37, %v1890_v8  ;;  %vm1854_vm13 = vcmp.lt.f32.partialorder %v7872_v32, %v6360_v27 }
 0x4ed   : > { %3044 = vperm.xlu0 %4494, %v2909_v44   ;;  %2299 = vperm.xlu1 %4495, %v2120_v14   ;;  %v1965_v44 = vmul.f32 %v5058_v26, %v1442_v30  ;;  %v7869_v14 = vld [vmem:[#allocation47_spill] sm:$0xff]  ;;  %v2861_v30 = vmul.f32 %v5066_v39, %v1905_v56 }
 0x4ee   : > { %vm1400_vm10 = vcmp.lt.f32.partialorder %v7869_v14, %v6240_v25  ;;  %v2050_v14 = vmul.f32 %v5062_v37, %v1905_v56 }
 0x4ef   : > { %v2099_v1 = vadd.f32 %v2035_v3, %v1965_v44  ;;  %v1471_v44 = vsel %vm1407_vm6, 1.0, %v7849_v53 }
 0x4f0   : > { %v2114_v3 = vadd.f32 %v2050_v14, %v1980_v9  ;;  %v2846_v9 = vmul.f32 %v5066_v39, %v1890_v8  ;;  %v2805_v56 = vmul.f32 %v5064_v38, %v1471_v44 }
 0x4f1   : > { %3089 = vperm.xlu0 %4494, %v2924_v20   ;;  %3068 = vperm.xlu1 %4495, %v2917_v31   ;;  %v1464_v20 = vsel %vm1400_vm10, 1.0, %v7849_v53  ;;  %v2057_v31 = vmul.f32 %v5062_v37, %v1912_v57 }
 0x4f2   : > { %v1987_v17 = vmul.f32 %v5058_v26, %v1464_v20 }
 0x4f4   : > { %v2121_v45 = vadd.f32 %v2057_v31, %v1987_v17  ;;  %v2854_v31 = vmul.f32 %v5066_v39, %v1898_v10  ;;  %v2868_v17 = vmul.f32 %v5066_v39, %v1912_v57  ;;  %v1031_v10 = vpop.xlane.xlu1 %1030 }
 0x4f5   : > { %3110 = vperm.xlu0 %4494, %v2931_v55   ;;  %3107 = vperm.xlu1 %4495, %v2930_v43   ;;  %v1919_v55 = vsel %vm1855_vm5, 1.0, %v7849_v53  ;;  %v1918_v43 = vsel %vm1854_vm13, 1.0, %v7849_v53 }
 0x4f6   : > { %v2064_v52 = vmul.f32 %v5062_v37, %v1919_v55  ;;  %v2063_v32 = vmul.f32 %v5062_v37, %v1918_v43  ;;  %v2918_v14 = vadd.f32 %v2854_v31, %v2784_v5  ;;  %v2875_v57 = vmul.f32 %v5066_v39, %v1919_v55  ;;  %v7877_v5 = vld [vmem:[#allocation66_spill] sm:$0xff] }
 0x4f7   : > { %vm1835_vm8 = vcmp.lt.f32.partialorder %v7877_v5, %v6224_v48  ;;  %v6425_v55 = vsub.f32 8.0, %v1031_v10 }
 0x4f8   : > { %v2939_v31 = vadd.f32 %v2875_v57, %v2805_v56  ;;  %v1920_v56 = vsel %vm1856_vm7, 1.0, %v7849_v53  ;;  %vm1857_vm7 = vcmp.lt.f32.partialorder %v6048_v6, %v6360_v27 }
 0x4f9   : > { %2260 = vperm.xlu0 %4494, %v2107_v59   ;;  %2236 = vperm.xlu1 %4495, %v2099_v1   ;;  %v1994_v59 = vmul.f32 %v5058_v26, %v1471_v44  ;;  %v1993_v1 = vmul.f32 %v5058_v26, %v1470_v34  ;;  %vm1862_vm11 = vcmp.lt.f32.partialorder %v5883_v42, %v6425_v55  ;;  %v1921_v6 = vsel %vm1857_vm7, 1.0, %v7849_v53 }
 0x4fa   : > { %v1926_v42 = vsel %vm1862_vm11, 1.0, %v7849_v53  ;;  %vm1863_vm5 = vcmp.lt.f32.partialorder %v5881_v0, %v6425_v55  ;;  %vm1416_vm11 = vcmp.lt.f32.partialorder %v5962_v18, %v6240_v25 }
 0x4fb   : > { %v2128_v54 = vadd.f32 %v2064_v52, %v1994_v59  ;;  %v2127_v24 = vadd.f32 %v2063_v32, %v1993_v1  ;;  %v2798_v52 = vmul.f32 %v5064_v38, %v1464_v20  ;;  %v6417_v20 = vsel %vm1387_vm3, 1.0, %v7849_v53  ;;  %v7878_v32 = vld [vmem:[#allocation63_spill] sm:$0xff] }
 0x4fc   : > { %vm1827_vm9 = vcmp.lt.f32.partialorder %v7878_v32, %v6208_v4  ;;  %v7879_v59 = vld [vmem:[#allocation59_spill] sm:$0xff]  ;;  %v2804_v1 = vmul.f32 %v5064_v38, %v1470_v34  ;;  %v1974_v44 = vmul.f32 %v5058_v26, %v6417_v20  ;;  %v7881_v34 = vld [vmem:[#allocation65_spill] sm:$0xff]  ;;  %vm1836_vm3 = vcmp.lt.f32.partialorder %v6012_v61, %v6224_v48 }
 0x4fd   : > { %2302 = vperm.xlu0 %4494, %v2121_v45   ;;  %2281 = vperm.xlu1 %4495, %v2114_v3   ;;  %v2910_v45 = vadd.f32 %v2846_v9, %v2776_v46  ;;  %v2791_v3 = vmul.f32 %v5064_v38, %v1457_v2  ;;  %v2932_v8 = vadd.f32 %v2868_v17, %v2798_v52  ;;  %v1891_v9 = vsel %vm1827_vm9, 1.0, %v7849_v53 }
 0x4fe   : > { %v2874_v2 = vmul.f32 %v5066_v39, %v1918_v43  ;;  %vm1401_vm12 = vcmp.lt.f32.partialorder %v7879_v59, %v6282_v63  ;;  %v1899_v43 = vsel %vm1835_vm8, 1.0, %v7849_v53  ;;  %vm1842_vm14 = vcmp.lt.f32.partialorder %v7881_v34, %v6245_v49  ;;  %v7885_v34 = vld [vmem:[#allocation64_spill] sm:$0xff] }
 0x4ff   : > { %v2925_v46 = vadd.f32 %v2861_v30, %v2791_v3  ;;  %v2044_v3 = vmul.f32 %v5062_v37, %v1899_v43  ;;  %v2036_v23 = vmul.f32 %v5062_v37, %v1891_v9  ;;  %v1913_v30 = vsel %vm1849_vm0, 1.0, %v7849_v53 }
 0x500   : > { %v2938_v17 = vadd.f32 %v2874_v2, %v2804_v1  ;;  %v7884_v2 = vld [vmem:[#allocation62_spill] sm:$0xff]  ;;  %v2058_v32 = vmul.f32 %v5062_v37, %v1913_v30  ;;  %vm1415_vm13 = vcmp.lt.f32.partialorder %v7885_v34, %v6200_v16  ;;  %v2785_v34 = vmul.f32 %v5064_v38, %v6417_v20 }
 0x501   : > { %2323 = vperm.xlu0 %4494, %v2128_v54   ;;  %2320 = vperm.xlu1 %4495, %v2127_v24   ;;  %v7876_v24 = vld [vmem:[#allocation58_spill] sm:$0xff]  ;;  %v7880_v54 = vld [vmem:[#allocation60_spill] sm:$0xff]  ;;  %vm1408_vm15 = vcmp.lt.f32.partialorder %v7884_v2, %v6240_v25  ;;  %v1479_v51 = vsel %vm1415_vm13, 1.0, %v7849_v53  ;;  %v2847_v2 = vmul.f32 %v5066_v39, %v1891_v9  ;;  %v2869_v20 = vmul.f32 %v5066_v39, %v1913_v30 }
 0x502   : > { %vm1379_vm4 = vcmp.lt.f32.partialorder %v7876_v24, %v6400_v19  ;;  %vm1394_vm2 = vcmp.lt.f32.partialorder %v7880_v54, %v6336_v41  ;;  %v2108_v24 = vadd.f32 %v2044_v3, %v1974_v44  ;;  %v1927_v3 = vsel %vm1863_vm5, 1.0, %v7849_v53 }
 0x503   : > { %v1443_v58 = vsel %vm1379_vm4, 1.0, %v7849_v53  ;;  %v1458_v52 = vsel %vm1394_vm2, 1.0, %v7849_v53  ;;  %vm1828_vm4 = vcmp.lt.f32.partialorder %v6014_v33, %v6208_v4  ;;  %vm1402_vm8 = vcmp.lt.f32.partialorder %v5934_v7, %v6336_v41 }
 0x504   : > { %v1981_v5 = vmul.f32 %v5058_v26, %v1458_v52  ;;  %vm1395_vm9 = vcmp.lt.f32.partialorder %v5936_v21, %v6400_v19  ;;  %vm1843_vm2 = vcmp.lt.f32.partialorder %v6034_v60, %v6245_v49  ;;  %vm1864_vm0 = vcmp.lt.f32.partialorder %v6046_v22, %v6425_v55 }
 0x505   : > { %3071 = vperm.xlu0 %4494, %v2918_v14   ;;  %3047 = vperm.xlu1 %4495, %v2910_v45   ;;  %v1966_v14 = vmul.f32 %v5058_v26, %v1443_v58  ;;  %v1465_v45 = vsel %vm1401_vm12, 1.0, %v7849_v53  ;;  %vm1850_vm12 = vcmp.lt.f32.partialorder %v6032_v28, %v6293_v13  ;;  %v1928_v22 = vsel %vm1864_vm0, 1.0, %v7849_v53 }
 0x506   : > { %v1988_v10 = vmul.f32 %v5058_v26, %v1465_v45  ;;  %vm1423_vm5 = vcmp.lt.f32.partialorder %v5988_v40, %v6200_v16  ;;  %vm1422_vm13 = vcmp.lt.f32.partialorder %v5990_v35, %v6202_v11 }
 0x507   : > { %v2100_v57 = vadd.f32 %v2036_v23, %v1966_v14  ;;  %v2065_v14 = vmul.f32 %v5062_v37, %v1920_v56  ;;  %v1487_v40 = vsel %vm1423_vm5, 1.0, %v7849_v53 }
 0x508   : > { %v2122_v1 = vadd.f32 %v2058_v32, %v1988_v10  ;;  %v2002_v32 = vmul.f32 %v5058_v26, %v1479_v51 }
 0x509   : > { %3113 = vperm.xlu0 %4494, %v2932_v8   ;;  %3092 = vperm.xlu1 %4495, %v2925_v46   ;;  %v1906_v8 = vsel %vm1842_vm14, 1.0, %v7849_v53  ;;  %v7883_v46 = vld [vmem:[#allocation61_spill] sm:$0xff]  ;;  %vm1409_vm14 = vcmp.lt.f32.partialorder %v5964_v50, %v6282_v63 }
 0x50a   : > { %vm1414_vm10 = vcmp.lt.f32.partialorder %v7883_v46, %v6202_v11  ;;  %v2051_v59 = vmul.f32 %v5062_v37, %v1906_v8  ;;  %v824_v46 = vpop.xlane.xlu0 %823  ;;  %v1473_v50 = vsel %vm1409_vm14, 1.0, %v7849_v53 }
 0x50b   : > { %v1478_v54 = vsel %vm1414_vm10, 1.0, %v7849_v53 }
 0x50c   : > { %v2115_v44 = vadd.f32 %v2051_v59, %v1981_v5  ;;  %v2001_v23 = vmul.f32 %v5058_v26, %v1478_v54  ;;  %v2072_v5 = vmul.f32 %v5062_v37, %v1927_v3  ;;  %v2812_v61 = vmul.f32 %v5064_v38, %v1478_v54 }
 0x50d   : > { %3134 = vperm.xlu0 %4494, %v2939_v31   ;;  %3131 = vperm.xlu1 %4495, %v2938_v17   ;;  %v1472_v31 = vsel %vm1408_vm15, 1.0, %v7849_v53  ;;  %v2071_v17 = vmul.f32 %v5062_v37, %v1926_v42  ;;  %v1466_v54 = vsel %vm1402_vm8, 1.0, %v7849_v53 }
 0x50e   : > { %v1995_v0 = vmul.f32 %v5058_v26, %v1472_v31 }
 0x510   : > { %v2129_v10 = vadd.f32 %v2065_v14, %v1995_v0  ;;  %v2855_v14 = vmul.f32 %v5066_v39, %v1899_v43  ;;  %v2883_v43 = vmul.f32 %v5066_v39, %v1927_v3  ;;  %v1892_v3 = vsel %vm1828_vm4, 1.0, %v7849_v53 }
 0x511   : > { %2263 = vperm.xlu0 %4494, %v2108_v24   ;;  %2239 = vperm.xlu1 %4495, %v2100_v57   ;;  %v2135_v24 = vadd.f32 %v2071_v17, %v2001_v23  ;;  %v2777_v57 = vmul.f32 %v5064_v38, %v1443_v58  ;;  %v6478_v17 = vsub.f32 8.0, %v824_v46  ;;  %v2862_v58 = vmul.f32 %v5066_v39, %v1906_v8 }
 0x512   : > { %v2876_v23 = vmul.f32 %v5066_v39, %v1920_v56  ;;  %v2919_v0 = vadd.f32 %v2855_v14, %v2785_v34  ;;  %v2037_v28 = vmul.f32 %v5062_v37, %v1892_v3  ;;  %v1914_v46 = vsel %vm1850_vm12, 1.0, %v7849_v53 }
 0x513   : > { %v2911_v59 = vadd.f32 %v2847_v2, %v2777_v57  ;;  %vm1388_vm6 = vcmp.lt.f32.partialorder %v5903_v15, %v6478_v17  ;;  %vm1380_vm1 = vcmp.lt.f32.partialorder %v5905_v62, %v6478_v17  ;;  %v2813_v15 = vmul.f32 %v5064_v38, %v1479_v51  ;;  %v1034_v62 = vpop.xlane.xlu1 %1033 }
 0x514   : > { %v6495_v56 = vsel %vm1388_vm6, 1.0, %v7849_v53  ;;  %v6501_v30 = vsel %vm1380_vm1, 1.0, %v7849_v53  ;;  %v6521_v57 = vsub.f32 8.0, %v1034_v62  ;;  %v1989_v2 = vmul.f32 %v5058_v26, %v1466_v54 }
 0x515   : > { %2305 = vperm.xlu0 %4494, %v2122_v1   ;;  %2284 = vperm.xlu1 %4495, %v2115_v44   ;;  %v2136_v1 = vadd.f32 %v2072_v5, %v2002_v32  ;;  %v2792_v44 = vmul.f32 %v5064_v38, %v1458_v52  ;;  %v2947_v33 = vadd.f32 %v2883_v43, %v2813_v15  ;;  %v1459_v5 = vsel %vm1395_vm9, 1.0, %v7849_v53 }
 0x516   : > { %v1967_v51 = vmul.f32 %v5058_v26, %v6501_v30  ;;  %v1907_v32 = vsel %vm1843_vm2, 1.0, %v7849_v53  ;;  %vm1871_vm10 = vcmp.lt.f32.partialorder %v6060_v29, %v6521_v57  ;;  %vm1870_vm15 = vcmp.lt.f32.partialorder %v6062_v47, %v6521_v57 }
 0x517   : > { %v2926_v9 = vadd.f32 %v2862_v58, %v2792_v44  ;;  %v2059_v44 = vmul.f32 %v5062_v37, %v1914_v46  ;;  %v2052_v34 = vmul.f32 %v5062_v37, %v1907_v32  ;;  %v1480_v58 = vsel %vm1416_vm11, 1.0, %v7849_v53 }
 0x518   : > { %v1935_v29 = vsel %vm1871_vm10, 1.0, %v7849_v53  ;;  %v1934_v47 = vsel %vm1870_vm15, 1.0, %v7849_v53 }
 0x519   : > { %2344 = vperm.xlu0 %4494, %v2135_v24   ;;  %2326 = vperm.xlu1 %4495, %v2129_v10   ;;  %v2799_v24 = vmul.f32 %v5064_v38, %v1465_v45  ;;  %v2806_v10 = vmul.f32 %v5064_v38, %v1472_v31  ;;  %v2882_v45 = vmul.f32 %v5066_v39, %v1926_v42  ;;  %v6507_v42 = vsel %vm1836_vm3, 1.0, %v7849_v53 }
 0x51a   : > { %v1975_v31 = vmul.f32 %v5058_v26, %v6495_v56  ;;  %v2045_v21 = vmul.f32 %v5062_v37, %v6507_v42  ;;  %v2123_v18 = vadd.f32 %v2059_v44, %v1989_v2  ;;  %v2080_v43 = vmul.f32 %v5062_v37, %v1935_v29 }
 0x51b   : > { %v2940_v52 = vadd.f32 %v2876_v23, %v2806_v10  ;;  %v2933_v8 = vadd.f32 %v2869_v20, %v2799_v24  ;;  %v2946_v7 = vadd.f32 %v2882_v45, %v2812_v61  ;;  %v2073_v23 = vmul.f32 %v5062_v37, %v1928_v22 }
 0x51c   : > { %v2109_v60 = vadd.f32 %v2045_v21, %v1975_v31  ;;  %v2066_v24 = vmul.f32 %v5062_v37, %v1921_v6  ;;  %v1486_v10 = vsel %vm1422_vm13, 1.0, %v7849_v53  ;;  %v2079_v35 = vmul.f32 %v5062_v37, %v1934_v47  ;;  %v827_v31 = vpop.xlane.xlu0 %826 }
 0x51d   : > { %3050 = vperm.xlu0 %4494, %v2911_v59   ;;  %2347 = vperm.xlu1 %4495, %v2136_v1   ;;  %v2101_v59 = vadd.f32 %v2037_v28, %v1967_v51  ;;  %v1982_v1 = vmul.f32 %v5058_v26, %v1459_v5  ;;  %v2009_v45 = vmul.f32 %v5058_v26, %v1486_v10 }
 0x51e   : > { %v2786_v61 = vmul.f32 %v5064_v38, %v6495_v56  ;;  %v2848_v51 = vmul.f32 %v5066_v39, %v1892_v3  ;;  %v2793_v2 = vmul.f32 %v5064_v38, %v1459_v5  ;;  %v2870_v56 = vmul.f32 %v5066_v39, %v1914_v46  ;;  %v7886_v5 = vld [vmem:[#allocation77_spill] sm:$0xff] }
 0x51f   : > { %v2116_v14 = vadd.f32 %v2052_v34, %v1982_v1  ;;  %v2143_v62 = vadd.f32 %v2079_v35, %v2009_v45  ;;  %v2884_v1 = vmul.f32 %v5066_v39, %v1928_v22  ;;  %v2807_v3 = vmul.f32 %v5064_v38, %v1473_v50  ;;  %v1037_v34 = vpop.xlane.xlu1 %1036  ;;  %v7887_v22 = vld [vmem:[#allocation74_spill] sm:$0xff]  ;;  %v7891_v35 = vld [vmem:[#allocation76_spill] sm:$0xff] }
 0x520   : > { %vm1837_vm3 = vcmp.lt.f32.partialorder %v7886_v5, %v6224_v48  ;;  %vm1829_vm4 = vcmp.lt.f32.partialorder %v7887_v22, %v6208_v4  ;;  %v2821_v48 = vmul.f32 %v5064_v38, %v1487_v40  ;;  %v7888_v4 = vld [vmem:[#allocation68_spill] sm:$0xff]  ;;  %vm1844_vm2 = vcmp.lt.f32.partialorder %v7891_v35, %v6245_v49  ;;  %v7896_v5 = vld [vmem:[#allocation83_spill] sm:$0xff] }
 0x521   : > { %3095 = vperm.xlu0 %4494, %v2926_v9   ;;  %3074 = vperm.xlu1 %4495, %v2919_v0   ;;  %v1996_v9 = vmul.f32 %v5058_v26, %v1473_v50  ;;  %v2003_v0 = vmul.f32 %v5058_v26, %v1480_v58  ;;  %vm1403_vm8 = vcmp.lt.f32.partialorder %v7888_v4, %v6400_v19 }
 0x523   : > { %v2137_v20 = vadd.f32 %v2073_v23, %v2003_v0  ;;  %v6604_v23 = vsel %vm1837_vm3, 1.0, %v7849_v53 }
 0x525   : > { %3137 = vperm.xlu0 %4494, %v2940_v52   ;;  %3116 = vperm.xlu1 %4495, %v2933_v8   ;;  %v2130_v52 = vadd.f32 %v2066_v24, %v1996_v9  ;;  %v2010_v8 = vmul.f32 %v5058_v26, %v1487_v40  ;;  %v2820_v9 = vmul.f32 %v5064_v38, %v1486_v10 }
 0x526   : > { %v2046_v10 = vmul.f32 %v5062_v37, %v6604_v23 }
 0x527   : > { %v2144_v15 = vadd.f32 %v2080_v43, %v2010_v8  ;;  %v6623_v43 = vsel %vm1403_vm8, 1.0, %v7849_v53 }
 0x529   : > { %3158 = vperm.xlu0 %4494, %v2947_v33   ;;  %3155 = vperm.xlu1 %4495, %v2946_v7   ;;  %v2778_v33 = vmul.f32 %v5064_v38, %v6501_v30  ;;  %v2856_v7 = vmul.f32 %v5066_v39, %v6507_v42  ;;  %v2863_v30 = vmul.f32 %v5066_v39, %v1907_v32 }
 0x52a   : > { %v2891_v32 = vmul.f32 %v5066_v39, %v1935_v29  ;;  %v6610_v29 = vsel %vm1829_vm4, 1.0, %v7849_v53 }
 0x52b   : > { %v2920_v21 = vadd.f32 %v2856_v7, %v2786_v61  ;;  %v2912_v28 = vadd.f32 %v2848_v51, %v2778_v33  ;;  %v2927_v42 = vadd.f32 %v2863_v30, %v2793_v2  ;;  %v7892_v61 = vld [vmem:[#allocation70_spill] sm:$0xff]  ;;  %v7893_v33 = vld [vmem:[#allocation81_spill] sm:$0xff]  ;;  %v7894_v51 = vld [vmem:[#allocation71_spill] sm:$0xff]  ;;  %v6650_v2 = vsel %vm1844_vm2, 1.0, %v7849_v53 }
 0x52c   : > { %v2955_v0 = vadd.f32 %v2891_v32, %v2821_v48  ;;  %vm1417_vm0 = vcmp.lt.f32.partialorder %v7892_v61, %v6282_v63  ;;  %vm1865_vm14 = vcmp.lt.f32.partialorder %v7893_v33, %v6425_v55  ;;  %vm1410_vm11 = vcmp.lt.f32.partialorder %v7894_v51, %v6336_v41 }
 0x52d   : > { %2266 = vperm.xlu0 %4494, %v2109_v60   ;;  %2242 = vperm.xlu1 %4495, %v2101_v59   ;;  %v2800_v60 = vmul.f32 %v5064_v38, %v1466_v54  ;;  %v6574_v59 = vsub.f32 8.0, %v827_v31  ;;  %v2877_v54 = vmul.f32 %v5066_v39, %v1921_v6  ;;  %v6640_v31 = vsub.f32 8.0, %v1037_v34 }
 0x52e   : > { %v6655_v30 = vsel %vm1417_vm0, 1.0, %v7849_v53 }
 0x52f   : > { %v2934_v44 = vadd.f32 %v2870_v56, %v2800_v60  ;;  %vm1389_vm6 = vcmp.lt.f32.partialorder %v6070_v12, %v6574_v59  ;;  %vm1381_vm1 = vcmp.lt.f32.partialorder %v6072_v36, %v6574_v59  ;;  %v2941_v50 = vadd.f32 %v2877_v54, %v2807_v3 }
 0x530   : > { %v6593_v12 = vsel %vm1389_vm6, 1.0, %v7849_v53  ;;  %v6596_v36 = vsel %vm1381_vm1, 1.0, %v7849_v53  ;;  %v1990_v60 = vmul.f32 %v5058_v26, %v6623_v43  ;;  %v2053_v54 = vmul.f32 %v5062_v37, %v6650_v2 }
 0x531   : > { %2308 = vperm.xlu0 %4494, %v2123_v18   ;;  %2287 = vperm.xlu1 %4495, %v2116_v14   ;;  %v2814_v18 = vmul.f32 %v5064_v38, %v1480_v58  ;;  %v2890_v58 = vmul.f32 %v5066_v39, %v1934_v47  ;;  %v7889_v47 = vld [vmem:[#allocation69_spill] sm:$0xff]  ;;  %v1976_v24 = vmul.f32 %v5058_v26, %v6593_v12 }
 0x532   : > { %vm1396_vm9 = vcmp.lt.f32.partialorder %v7889_v47, %v6478_v17  ;;  %v1968_v40 = vmul.f32 %v5058_v26, %v6596_v36  ;;  %vm1878_vm10 = vcmp.lt.f32.partialorder %v7896_v5, %v6640_v31  ;;  %v2004_v22 = vmul.f32 %v5058_v26, %v6655_v30  ;;  %v7899_v47 = vld [vmem:[#allocation73_spill] sm:$0xff] }
 0x533   : > { %v2948_v46 = vadd.f32 %v2884_v1, %v2814_v18  ;;  %v6658_v1 = vsel %vm1865_vm14, 1.0, %v7849_v53  ;;  %v1474_v18 = vsel %vm1410_vm11, 1.0, %v7849_v53  ;;  %vm1424_vm13 = vcmp.lt.f32.partialorder %v7899_v47, %v6240_v25 }
 0x534   : > { %v1997_v4 = vmul.f32 %v5058_v26, %v1474_v18 }
 0x535   : > { %2350 = vperm.xlu0 %4494, %v2137_v20   ;;  %2329 = vperm.xlu1 %4495, %v2130_v52   ;;  %v7890_v20 = vld [vmem:[#allocation79_spill] sm:$0xff]  ;;  %v2954_v52 = vadd.f32 %v2890_v58, %v2820_v9  ;;  %v7898_v9 = vld [vmem:[#allocation72_spill] sm:$0xff] }
 0x536   : > { %vm1851_vm12 = vcmp.lt.f32.partialorder %v7890_v20, %v6293_v13  ;;  %vm1430_vm5 = vcmp.lt.f32.partialorder %v7898_v9, %v6202_v11 }
 0x537   : > { %v6643_v7 = vsel %vm1851_vm12, 1.0, %v7849_v53  ;;  %v6697_v35 = vsel %vm1430_vm5, 1.0, %v7849_v53 }
 0x538   : > { %v2060_v34 = vmul.f32 %v5062_v37, %v6643_v7 }
 0x539   : > { %2371 = vperm.xlu0 %4494, %v2144_v15   ;;  %2368 = vperm.xlu1 %4495, %v2143_v62   ;;  %v2038_v15 = vmul.f32 %v5062_v37, %v6610_v29  ;;  %v6634_v62 = vsel %vm1396_vm9, 1.0, %v7849_v53 }
 0x53a   : > { %v1983_v56 = vmul.f32 %v5058_v26, %v6634_v62  ;;  %v2124_v32 = vadd.f32 %v2060_v34, %v1990_v60 }
 0x53c   : > { %v2117_v48 = vadd.f32 %v2053_v54, %v1983_v56 }
 0x53d   : > { %3077 = vperm.xlu0 %4494, %v2920_v21   ;;  %3053 = vperm.xlu1 %4495, %v2912_v28   ;;  %v2110_v21 = vadd.f32 %v2046_v10, %v1976_v24  ;;  %v2102_v28 = vadd.f32 %v2038_v15, %v1968_v40  ;;  %v6690_v40 = vsel %vm1878_vm10, 1.0, %v7849_v53  ;;  %v7900_v10 = vld [vmem:[#allocation82_spill] sm:$0xff]  ;;  %v1488_v15 = vsel %vm1424_vm13, 1.0, %v7849_v53 }
 0x53e   : > { %vm1879_vm6 = vcmp.lt.f32.partialorder %v7900_v10, %v6640_v31  ;;  %v2087_v33 = vmul.f32 %v5062_v37, %v6690_v40  ;;  %v2011_v34 = vmul.f32 %v5058_v26, %v1488_v15 }
 0x53f   : > { %v1943_v56 = vsel %vm1879_vm6, 1.0, %v7849_v53 }
 0x541   : > { %3119 = vperm.xlu0 %4494, %v2934_v44   ;;  %3098 = vperm.xlu1 %4495, %v2927_v42   ;;  %v7895_v44 = vld [vmem:[#allocation78_spill] sm:$0xff] }
 0x542   : > { %vm1858_vm7 = vcmp.lt.f32.partialorder %v7895_v44, %v6360_v27  ;;  %v2017_v44 = vmul.f32 %v5058_v26, %v6697_v35 }
 0x543   : > { %v1922_v58 = vsel %vm1858_vm7, 1.0, %v7849_v53 }
 0x544   : > { %v6598_v14 = vpop.permute.xlu1 %2227  ;;  %v6600_v6 = vpop.permute.xlu0 %2224  ;;  %v2151_v5 = vadd.f32 %v2087_v33, %v2017_v44  ;;  %v2808_v33 = vmul.f32 %v5064_v38, %v1474_v18 }
 0x545   : > { %3161 = vperm.xlu0 %4494, %v2948_v46   ;;  %3140 = vperm.xlu1 %4495, %v2941_v50   ;;  %v7897_v46 = vld [vmem:[#allocation80_spill] sm:$0xff]  ;;  %v2074_v50 = vmul.f32 %v5062_v37, %v6658_v1 }
 0x546   : > { %vm1872_vm15 = vcmp.lt.f32.partialorder %v7897_v46, %v6521_v57 }
 0x547   : > { %v1936_v20 = vsel %vm1872_vm15, 1.0, %v7849_v53  ;;  %v2138_v11 = vadd.f32 %v2074_v50, %v2004_v22 }
 0x548   : > { %v6627_v8 = vpop.permute.xlu1 %2248  ;;  %v6629_v45 = vpop.permute.xlu0 %2251  ;;  %v2081_v51 = vmul.f32 %v5062_v37, %v1936_v20  ;;  %v2892_v18 = vmul.f32 %v5066_v39, %v1936_v20  ;;  %v2899_v20 = vmul.f32 %v5066_v39, %v1943_v56 }
 0x549   : > { %3182 = vperm.xlu0 %4494, %v2955_v0   ;;  %3179 = vperm.xlu1 %4495, %v2954_v52   ;;  %v2067_v52 = vmul.f32 %v5062_v37, %v1922_v58 }
 0x54a   : > { %v2145_v46 = vadd.f32 %v2081_v51, %v2011_v34  ;;  %v2878_v34 = vmul.f32 %v5066_v39, %v1922_v58  ;;  %v7902_v58 = vld [vmem:[#allocation84_spill] sm:$0xff] }
 0x54b   : > { %v2131_v61 = vadd.f32 %v2067_v52, %v1997_v4  ;;  %v2794_v52 = vmul.f32 %v5064_v38, %v6634_v62  ;;  %v2801_v62 = vmul.f32 %v5064_v38, %v6623_v43  ;;  %v2885_v43 = vmul.f32 %v5066_v39, %v6658_v1  ;;  %v7904_v1 = vld [vmem:[#allocation90_spill] sm:$0xff] }
 0x54c   : > { %v6662_v42 = vpop.permute.xlu1 %3035  ;;  %v6664_v3 = vpop.permute.xlu0 %3038  ;;  %vm1404_vm3 = vcmp.lt.f32.partialorder %v7902_v58, %v6478_v17  ;;  %vm1852_vm8 = vcmp.lt.f32.partialorder %v7904_v1, %v6293_v13 }
 0x54d   : > { %2269 = vperm.xlu0 %4494, %v2110_v21   ;;  %2245 = vperm.xlu1 %4495, %v2102_v28   ;;  %v7901_v21 = vld [vmem:[#allocation75_spill] sm:$0xff] }
 0x54e   : > { %vm1431_vm1 = vcmp.lt.f32.partialorder %v7901_v21, %v6200_v16  ;;  %v2779_v16 = vmul.f32 %v5064_v38, %v6596_v36  ;;  %v2787_v36 = vmul.f32 %v5064_v38, %v6593_v12 }
 0x54f   : > { %v1495_v54 = vsel %vm1431_vm1, 1.0, %v7849_v53 }
 0x550   : > { %v6685_v0 = vpop.permute.xlu1 %3059  ;;  %v6687_v24 = vpop.permute.xlu0 %3062  ;;  %v2018_v4 = vmul.f32 %v5058_v26, %v1495_v54 }
 0x551   : > { %2311 = vperm.xlu0 %4494, %v2124_v32   ;;  %2290 = vperm.xlu1 %4495, %v2117_v48   ;;  %v2088_v32 = vmul.f32 %v5062_v37, %v1943_v56  ;;  %v2849_v48 = vmul.f32 %v5066_v39, %v6610_v29  ;;  %v2857_v29 = vmul.f32 %v5066_v39, %v6604_v23 }
 0x552   : > { %v2828_v56 = vmul.f32 %v5064_v38, %v6697_v35 }
 0x553   : > { %v2913_v9 = vadd.f32 %v2849_v48, %v2779_v16  ;;  %v2152_v47 = vadd.f32 %v2088_v32, %v2018_v4  ;;  %v2921_v21 = vadd.f32 %v2857_v29, %v2787_v36  ;;  %v7903_v48 = vld [vmem:[#allocation85_spill] sm:$0xff]  ;;  %v7907_v29 = vld [vmem:[#allocation86_spill] sm:$0xff] }
 0x554   : > { %v6705_v28 = vpop.permute.xlu1 %2230  ;;  %v6707_v60 = vpop.permute.xlu0 %2254  ;;  %vm1397_vm4 = vcmp.lt.f32.partialorder %v7903_v48, %v6574_v59  ;;  %vm1418_vm12 = vcmp.lt.f32.partialorder %v7907_v29, %v6336_v41  ;;  %v7913_v48 = vld [vmem:[#allocation95_spill] sm:$0xff] }
 0x555   : > { %2353 = vperm.xlu0 %4494, %v2138_v11   ;;  %2332 = vperm.xlu1 %4495, %v2131_v61   ;;  %v2864_v61 = vmul.f32 %v5066_v39, %v6650_v2  ;;  %v2871_v2 = vmul.f32 %v5066_v39, %v6643_v7  ;;  %v2822_v7 = vmul.f32 %v5064_v38, %v1488_v15 }
 0x556   : > { %vm1873_vm7 = vcmp.lt.f32.partialorder %v7913_v48, %v6521_v57 }
 0x557   : > { %v2928_v51 = vadd.f32 %v2864_v61, %v2794_v52  ;;  %v2935_v23 = vadd.f32 %v2871_v2, %v2801_v62  ;;  %v2956_v4 = vadd.f32 %v2892_v18, %v2822_v7  ;;  %v7905_v52 = vld [vmem:[#allocation91_spill] sm:$0xff]  ;;  %v2829_v61 = vmul.f32 %v5064_v38, %v1495_v54  ;;  %v7909_v2 = vld [vmem:[#allocation92_spill] sm:$0xff]  ;;  %v7912_v7 = vld [vmem:[#allocation94_spill] sm:$0xff] }
 0x558   : > { %v6717_v22 = vpop.permute.xlu1 %2272  ;;  %v6719_v50 = vpop.permute.xlu0 %2275  ;;  %vm1845_vm9 = vcmp.lt.f32.partialorder %v7905_v52, %v6245_v49  ;;  %v7908_v49 = vld [vmem:[#allocation87_spill] sm:$0xff]  ;;  %vm1866_vm0 = vcmp.lt.f32.partialorder %v7909_v2, %v6425_v55  ;;  %vm1880_vm11 = vcmp.lt.f32.partialorder %v7912_v7, %v6640_v31 }
 0x559   : > { %2392 = vperm.xlu0 %4494, %v2151_v5   ;;  %2374 = vperm.xlu1 %4495, %v2145_v46   ;;  %v2942_v5 = vadd.f32 %v2878_v34, %v2808_v33  ;;  %v2815_v46 = vmul.f32 %v5064_v38, %v6655_v30  ;;  %v2898_v30 = vmul.f32 %v5066_v39, %v6690_v40  ;;  %v1461_v40 = vsel %vm1397_vm4, 1.0, %v7849_v53 }
 0x55a   : > { %v1916_v33 = vsel %vm1852_vm8, 1.0, %v7849_v53  ;;  %vm1411_vm2 = vcmp.lt.f32.partialorder %v7908_v49, %v6400_v19  ;;  %v1909_v54 = vsel %vm1845_vm9, 1.0, %v7849_v53  ;;  %v1984_v35 = vmul.f32 %v5058_v26, %v1461_v40 }
 0x55b   : > { %v1482_v34 = vsel %vm1418_vm12, 1.0, %v7849_v53  ;;  %v2054_v58 = vmul.f32 %v5062_v37, %v1909_v54 }
 0x55c   : > { %v6728_v10 = vpop.permute.xlu1 %3041  ;;  %v6730_v11 = vpop.permute.xlu0 %3065  ;;  %v2005_v1 = vmul.f32 %v5058_v26, %v1482_v34 }
 0x55d   : > { %3056 = vperm.xlu0 %4494, %v2913_v9   ;;  %2395 = vperm.xlu1 %4495, %v2152_v47   ;;  %v2949_v9 = vadd.f32 %v2885_v43, %v2815_v46  ;;  %v1468_v47 = vsel %vm1404_vm3, 1.0, %v7849_v53  ;;  %v2061_v46 = vmul.f32 %v5062_v37, %v1916_v33  ;;  %v1475_v43 = vsel %vm1411_vm2, 1.0, %v7849_v53 }
 0x55e   : > { %v1991_v62 = vmul.f32 %v5058_v26, %v1468_v47  ;;  %v1998_v52 = vmul.f32 %v5058_v26, %v1475_v43 }
 0x560   : > { %v6739_v12 = vpop.permute.xlu1 %3083  ;;  %v6741_v44 = vpop.permute.xlu0 %3086 }
 0x561   : > { %3101 = vperm.xlu0 %4494, %v2928_v51   ;;  %3080 = vperm.xlu1 %4495, %v2921_v21   ;;  %v2963_v51 = vadd.f32 %v2899_v20, %v2829_v61  ;;  %v2962_v21 = vadd.f32 %v2898_v30, %v2828_v56  ;;  %v2125_v20 = vadd.f32 %v2061_v46, %v1991_v62  ;;  %v1930_v30 = vsel %vm1866_vm0, 1.0, %v7849_v53  ;;  %v7914_v61 = vld [vmem:[#allocation88_spill] sm:$0xff]  ;;  %v7915_v56 = vld [vmem:[#allocation89_spill] sm:$0xff] }
 0x562   : > { %vm1432_vm10 = vcmp.lt.f32.partialorder %v7914_v61, %v6240_v25  ;;  %vm1425_vm15 = vcmp.lt.f32.partialorder %v7915_v56, %v6282_v63  ;;  %v2075_v62 = vmul.f32 %v5062_v37, %v1930_v30 }
 0x563   : > { %v1496_v2 = vsel %vm1432_vm10, 1.0, %v7849_v53  ;;  %v1489_v25 = vsel %vm1425_vm15, 1.0, %v7849_v53 }
 0x564   : > { %v6751_v16 = vpop.permute.xlu1 %2233  ;;  %v6753_v32 = vpop.permute.xlu0 %2257 }
 0x565   : > { %3143 = vperm.xlu0 %4494, %v2942_v5   ;;  %3122 = vperm.xlu1 %4495, %v2935_v23   ;;  %v7910_v5 = vld [vmem:[#allocation93_spill] sm:$0xff] }
 0x566   : > { %vm1859_vm14 = vcmp.lt.f32.partialorder %v7910_v5, %v6360_v27  ;;  %v2139_v5 = vadd.f32 %v2075_v62, %v2005_v1  ;;  %v2795_v1 = vmul.f32 %v5064_v38, %v1461_v40  ;;  %v2886_v40 = vmul.f32 %v5066_v39, %v1930_v30 }
 0x568   : > { %v6768_v36 = vpop.permute.xlu1 %2278  ;;  %v6770_v15 = vpop.permute.xlu0 %2296 }
 0x569   : > { %7906 = vst [vmem:[#allocation34_spill] sm:$0xff] %v6770_v15  ;;  %3185 = vperm.xlu0 %4494, %v2956_v4   ;;  %3164 = vperm.xlu1 %4495, %v2949_v9   ;;  %v1923_v4 = vsel %vm1859_vm14, 1.0, %v7849_v53  ;;  %v2118_v9 = vadd.f32 %v2054_v58, %v1984_v35 }
 0x56a   : > { %v2068_v35 = vmul.f32 %v5062_v37, %v1923_v4 }
 0x56c   : > { %v6789_v23 = vpop.permute.xlu1 %2299  ;;  %v6791_v18 = vpop.permute.xlu0 %3044  ;;  %v2132_v46 = vadd.f32 %v2068_v35, %v1998_v52  ;;  %v2872_v35 = vmul.f32 %v5066_v39, %v1916_v33  ;;  %v7921_v33 = vld [vmem:[#allocation96_spill] sm:$0xff] }
 0x56d   : > { %7911 = vst [vmem:[#allocation32_spill] sm:$0xff] %v6789_v23  ;;  %3206 = vperm.xlu0 %4494, %v2963_v51   ;;  %3203 = vperm.xlu1 %4495, %v2962_v21   ;;  %v1944_v51 = vsel %vm1880_vm11, 1.0, %v7849_v53  ;;  %v1937_v21 = vsel %vm1873_vm7, 1.0, %v7849_v53  ;;  %v2802_v23 = vmul.f32 %v5064_v38, %v1468_v47  ;;  %vm1412_vm13 = vcmp.lt.f32.partialorder %v7921_v33, %v6478_v17 }
 0x56e   : > { %v2089_v58 = vmul.f32 %v5062_v37, %v1944_v51  ;;  %v2082_v7 = vmul.f32 %v5062_v37, %v1937_v21 }
 0x570   : > { %v6808_v29 = vpop.permute.xlu1 %3068  ;;  %v6810_v49 = vpop.permute.xlu0 %3089 }
 0x571   : > { %7916 = vst [vmem:[#allocation33_spill] sm:$0xff] %v6810_v49  ;;  %2314 = vperm.xlu0 %4494, %v2125_v20   ;;  %2293 = vperm.xlu1 %4495, %v2118_v9   ;;  %v2019_v20 = vmul.f32 %v5058_v26, %v1496_v2  ;;  %v2012_v9 = vmul.f32 %v5058_v26, %v1489_v25 }
 0x573   : > { %v2153_v56 = vadd.f32 %v2089_v58, %v2019_v20  ;;  %v2146_v15 = vadd.f32 %v2082_v7, %v2012_v9  ;;  %v2809_v58 = vmul.f32 %v5064_v38, %v1475_v43  ;;  %v7920_v20 = vld [vmem:[#allocation97_spill] sm:$0xff]  ;;  %v2893_v9 = vmul.f32 %v5066_v39, %v1937_v21 }
 0x574   : > { %v6820_v48 = vpop.permute.xlu1 %3107  ;;  %v6822_v61 = vpop.permute.xlu0 %3110  ;;  %vm1405_vm5 = vcmp.lt.f32.partialorder %v7920_v20, %v6574_v59 }
 0x575   : > { %7917 = vst [vmem:[#allocation35_spill] sm:$0xff] %v6820_v48  ;;  %7918 = vst [vmem:[#allocation36_spill] sm:$0xff] %v6822_v61  ;;  %2356 = vperm.xlu0 %4494, %v2139_v5   ;;  %2335 = vperm.xlu1 %4495, %v2132_v46   ;;  %v2865_v5 = vmul.f32 %v5066_v39, %v1909_v54  ;;  %v2816_v46 = vmul.f32 %v5064_v38, %v1482_v34  ;;  %v1469_v30 = vsel %vm1405_vm5, 1.0, %v7849_v53 }
 0x576   : > { %v2936_v61 = vadd.f32 %v2872_v35, %v2802_v23  ;;  %v2900_v34 = vmul.f32 %v5066_v39, %v1944_v51  ;;  %v7922_v23 = vld [vmem:[#allocation100_spill] sm:$0xff]  ;;  %v7926_v51 = vld [vmem:[#allocation99_spill] sm:$0xff]  ;;  %v7927_v35 = vld [vmem:[#allocation98_spill] sm:$0xff] }
 0x577   : > { %v2929_v48 = vadd.f32 %v2865_v5, %v2795_v1  ;;  %v2950_v54 = vadd.f32 %v2886_v40, %v2816_v46  ;;  %vm1853_vm6 = vcmp.lt.f32.partialorder %v7922_v23, %v6293_v13  ;;  %v1476_v1 = vsel %vm1412_vm13, 1.0, %v7849_v53  ;;  %v7928_v5 = vld [vmem:[#allocation105_spill] sm:$0xff] }
 0x578   : > { %v6828_v52 = vpop.permute.xlu1 %2236  ;;  %v6830_v62 = vpop.permute.xlu0 %2260  ;;  %vm1419_vm3 = vcmp.lt.f32.partialorder %v7926_v51, %v6400_v19  ;;  %v2823_v13 = vmul.f32 %v5064_v38, %v1489_v25  ;;  %v1917_v21 = vsel %vm1853_vm6, 1.0, %v7849_v53  ;;  %vm1426_vm4 = vcmp.lt.f32.partialorder %v7927_v35, %v6336_v41  ;;  %v7929_v25 = vld [vmem:[#allocation102_spill] sm:$0xff] }
 0x579   : > { %2398 = vperm.xlu0 %4494, %v2153_v56   ;;  %2377 = vperm.xlu1 %4495, %v2146_v15   ;;  %v2879_v15 = vmul.f32 %v5066_v39, %v1923_v4  ;;  %v7923_v56 = vld [vmem:[#allocation103_spill] sm:$0xff]  ;;  %vm1874_vm8 = vcmp.lt.f32.partialorder %v7928_v5, %v6521_v57  ;;  %v1999_v20 = vmul.f32 %v5058_v26, %v1476_v1 }
 0x57a   : > { %vm1860_vm1 = vcmp.lt.f32.partialorder %v7923_v56, %v6360_v27  ;;  %v2957_v40 = vadd.f32 %v2893_v9, %v2823_v13  ;;  %vm1867_vm9 = vcmp.lt.f32.partialorder %v7929_v25, %v6425_v55  ;;  %v2062_v23 = vmul.f32 %v5062_v37, %v1917_v21  ;;  %v7930_v56 = vld [vmem:[#allocation104_spill] sm:$0xff] }
 0x57b   : > { %v2943_v43 = vadd.f32 %v2879_v15, %v2809_v58  ;;  %v1924_v58 = vsel %vm1860_vm1, 1.0, %v7849_v53  ;;  %v1483_v15 = vsel %vm1419_vm3, 1.0, %v7849_v53  ;;  %vm1881_vm12 = vcmp.lt.f32.partialorder %v7930_v56, %v6640_v31 }
 0x57c   : > { %v6836_v7 = vpop.permute.xlu1 %2281  ;;  %v6838_v47 = vpop.permute.xlu0 %2302  ;;  %v2069_v9 = vmul.f32 %v5062_v37, %v1924_v58  ;;  %v1931_v51 = vsel %vm1867_vm9, 1.0, %v7849_v53  ;;  %v2006_v13 = vmul.f32 %v5058_v26, %v1483_v15 }
 0x57d   : > { %7919 = vst [vmem:[#allocation42_spill] sm:$0xff] %v6838_v47  ;;  %3125 = vperm.xlu0 %4494, %v2936_v61   ;;  %3104 = vperm.xlu1 %4495, %v2929_v48   ;;  %v2830_v61 = vmul.f32 %v5064_v38, %v1496_v2  ;;  %v1992_v2 = vmul.f32 %v5058_v26, %v1469_v30 }
 0x57e   : > { %v2133_v35 = vadd.f32 %v2069_v9, %v1999_v20  ;;  %v2803_v47 = vmul.f32 %v5064_v38, %v1469_v30  ;;  %v2880_v30 = vmul.f32 %v5066_v39, %v1924_v58  ;;  %v7938_v58 = vld [vmem:[#allocation111_spill] sm:$0xff] }
 0x57f   : > { %v2964_v46 = vadd.f32 %v2900_v34, %v2830_v61  ;;  %v1490_v34 = vsel %vm1426_vm4, 1.0, %v7849_v53  ;;  %v2126_v61 = vadd.f32 %v2062_v23, %v1992_v2  ;;  %v2076_v2 = vmul.f32 %v5062_v37, %v1931_v51 }
 0x580   : > { %v6853_v48 = vpop.permute.xlu1 %2320  ;;  %v6855_v4 = vpop.permute.xlu0 %2323  ;;  %v2013_v5 = vmul.f32 %v5058_v26, %v1490_v34  ;;  %vm1861_vm11 = vcmp.lt.f32.partialorder %v7938_v58, %v6360_v27  ;;  %v7942_v27 = vld [vmem:[#allocation112_spill] sm:$0xff] }
 0x581   : > { %7924 = vst [vmem:[#allocation39_spill] sm:$0xff] %v6853_v48  ;;  %7925 = vst [vmem:[#allocation44_spill] sm:$0xff] %v6855_v4  ;;  %3167 = vperm.xlu0 %4494, %v2950_v54   ;;  %3146 = vperm.xlu1 %4495, %v2943_v43   ;;  %v1938_v43 = vsel %vm1874_vm8, 1.0, %v7849_v53  ;;  %v7931_v4 = vld [vmem:[#allocation101_spill] sm:$0xff]  ;;  %v1945_v48 = vsel %vm1881_vm12, 1.0, %v7849_v53  ;;  %v2140_v20 = vadd.f32 %v2076_v2, %v2006_v13 }
 0x582   : > { %v2083_v25 = vmul.f32 %v5062_v37, %v1938_v43  ;;  %vm1433_vm2 = vcmp.lt.f32.partialorder %v7931_v4, %v6282_v63  ;;  %v2090_v56 = vmul.f32 %v5062_v37, %v1945_v48  ;;  %v2817_v13 = vmul.f32 %v5064_v38, %v1483_v15 }
 0x583   : > { %v1497_v23 = vsel %vm1433_vm2, 1.0, %v7849_v53  ;;  %v2887_v2 = vmul.f32 %v5066_v39, %v1931_v51  ;;  %v2901_v15 = vmul.f32 %v5066_v39, %v1945_v48  ;;  %v7941_v48 = vld [vmem:[#allocation109_spill] sm:$0xff]  ;;  %vm1882_vm15 = vcmp.lt.f32.partialorder %v7942_v27, %v6640_v31 }
 0x584   : > { %v6873_v33 = vpop.permute.xlu1 %3047  ;;  %v6875_v54 = vpop.permute.xlu0 %3071  ;;  %v2147_v9 = vadd.f32 %v2083_v25, %v2013_v5  ;;  %v2020_v4 = vmul.f32 %v5058_v26, %v1497_v23  ;;  %vm1427_vm10 = vcmp.lt.f32.partialorder %v7941_v48, %v6400_v19 }
 0x585   : > { %3209 = vperm.xlu0 %4494, %v2964_v46   ;;  %3188 = vperm.xlu1 %4495, %v2957_v40  }
 0x588   : > { %v6889_v46 = vpop.permute.xlu1 %3092  ;;  %v6891_v40 = vpop.permute.xlu0 %3113 }
 0x589   : > { %7932 = vst [vmem:[#allocation38_spill] sm:$0xff] %v6889_v46  ;;  %7933 = vst [vmem:[#allocation41_spill] sm:$0xff] %v6891_v40  ;;  %2317 = vperm.xlu1 %4495, %v2126_v61   ;;  %2338 = vperm.xlu0 %4494, %v2133_v35   ;;  %v2873_v61 = vmul.f32 %v5066_v39, %v1917_v21  ;;  %v2154_v35 = vadd.f32 %v2090_v56, %v2020_v4  ;;  %v7937_v21 = vld [vmem:[#allocation106_spill] sm:$0xff] }
 0x58a   : > { %v2810_v46 = vmul.f32 %v5064_v38, %v1476_v1  ;;  %vm1420_vm14 = vcmp.lt.f32.partialorder %v7937_v21, %v6478_v17  ;;  %v2894_v1 = vmul.f32 %v5066_v39, %v1938_v43  ;;  %v2951_v56 = vadd.f32 %v2887_v2, %v2817_v13  ;;  %v7944_v21 = vld [vmem:[#allocation108_spill] sm:$0xff] }
 0x58b   : > { %v2937_v40 = vadd.f32 %v2873_v61, %v2803_v47  ;;  %v2824_v47 = vmul.f32 %v5064_v38, %v1490_v34  ;;  %v2831_v61 = vmul.f32 %v5064_v38, %v1497_v23  ;;  %v1484_v43 = vsel %vm1420_vm14, 1.0, %v7849_v53 }
 0x58c   : > { %v6898_v49 = vpop.permute.xlu1 %3131  ;;  %v6900_v63 = vpop.permute.xlu0 %3134  ;;  %v1925_v13 = vsel %vm1861_vm11, 1.0, %v7849_v53  ;;  %v2007_v2 = vmul.f32 %v5058_v26, %v1484_v43  ;;  %vm1434_vm13 = vcmp.lt.f32.partialorder %v7944_v21, %v6336_v41 }
 0x58d   : > { %7934 = vst [vmem:[#allocation37_spill] sm:$0xff] %v6898_v49  ;;  %7935 = vst [vmem:[#allocation43_spill] sm:$0xff] %v6900_v63  ;;  %2359 = vperm.xlu1 %4495, %v2140_v20   ;;  %2380 = vperm.xlu0 %4494, %v2147_v9   ;;  %v7936_v20 = vld [vmem:[#allocation107_spill] sm:$0xff]  ;;  %v2944_v9 = vadd.f32 %v2880_v30, %v2810_v46  ;;  %v2958_v46 = vadd.f32 %v2894_v1, %v2824_v47  ;;  %v1491_v47 = vsel %vm1427_vm10, 1.0, %v7849_v53  ;;  %vm2671_vm10 = vcmask 1041409  }
 0x58e   : > { %vm1413_vm0 = vcmp.lt.f32.partialorder %v7936_v20, %v6574_v59  ;;  %v7943_v20 = vld [vmem:[#allocation113_spill] sm:$0xff]  ;;  %v1946_v1 = vsel %vm1882_vm15, 1.0, %v7849_v53  ;;  %v2014_v27 = vmul.f32 %v5058_v26, %v1491_v47  ;;  %vm2673_vm15 = vcmask 1042434  }
 0x58f   : > { %v1477_v34 = vsel %vm1413_vm0, 1.0, %v7849_v53  ;;  %vm1875_vm5 = vcmp.lt.f32.partialorder %v7943_v20, %v6521_v57  ;;  %v2091_v20 = vmul.f32 %v5062_v37, %v1946_v1 }
 0x590   : > { %v6906_v5 = vpop.permute.xlu1 %2239  ;;  %v6908_v25 = vpop.permute.xlu0 %2263  ;;  %v2000_v23 = vmul.f32 %v5058_v26, %v1477_v34  ;;  %v2811_v63 = vmul.f32 %v5064_v38, %v1477_v34 }
 0x591   : > { %2401 = vperm.xlu1 %4495, %v2154_v35   ;;  %3128 = vperm.xlu0 %4494, %v2937_v40   ;;  %v7939_v40 = vld [vmem:[#allocation110_spill] sm:$0xff]  ;;  %v2965_v35 = vadd.f32 %v2901_v15, %v2831_v61  ;;  %v2070_v15 = vmul.f32 %v5062_v37, %v1925_v13  ;;  %v1498_v61 = vsel %vm1434_vm13, 1.0, %v7849_v53  ;;  %vm2677_vm13 = vcmask 1044484  }
 0x592   : > { %vm1868_vm7 = vcmp.lt.f32.partialorder %v7939_v40, %v6425_v55  ;;  %v1939_v40 = vsel %vm1875_vm5, 1.0, %v7849_v53  ;;  %vm2675_vm5 = vcmask 1043459  }
 0x593   : > { %v1932_v30 = vsel %vm1868_vm7, 1.0, %v7849_v53  ;;  %v2134_v48 = vadd.f32 %v2070_v15, %v2000_v23  ;;  %v2818_v23 = vmul.f32 %v5064_v38, %v1484_v43  ;;  %v2895_v43 = vmul.f32 %v5066_v39, %v1939_v40 }
 0x594   : > { %v6923_v51 = vpop.permute.xlu1 %2284  ;;  %v6925_v4 = vpop.permute.xlu0 %2305  ;;  %v2077_v58 = vmul.f32 %v5062_v37, %v1932_v30 }
 0x595   : > { %7940 = vst [vmem:[#allocation40_spill] sm:$0xff] %v6925_v4  ;;  %3149 = vperm.xlu1 %4495, %v2944_v9   ;;  %3170 = vperm.xlu0 %4494, %v2951_v56  }
 0x596   : > { %v2141_v41 = vadd.f32 %v2077_v58, %v2007_v2  ;;  %v2881_v58 = vmul.f32 %v5066_v39, %v1925_v13  ;;  %v2832_v13 = vmul.f32 %v5064_v38, %v1498_v61 }
 0x598   : > { %v6942_v9 = vpop.permute.xlu1 %2326  ;;  %v6944_v56 = vpop.permute.xlu0 %2344  ;;  %v2945_v34 = vadd.f32 %v2881_v58, %v2811_v63 }
 0x599   : > { %7945 = vst [vmem:[#allocation45_spill] sm:$0xff] %v6942_v9  ;;  %7946 = vst [vmem:[#allocation46_spill] sm:$0xff] %v6944_v56  ;;  %3191 = vperm.xlu1 %4495, %v2958_v46   ;;  %3212 = vperm.xlu0 %4494, %v2965_v35   ;;  %v2084_v46 = vmul.f32 %v5062_v37, %v1939_v40  ;;  %v2021_v35 = vmul.f32 %v5058_v26, %v1498_v61  ;;  %v7954_v40 = vld [vmem:[#allocation117_spill] sm:$0xff] }
 0x59a   : > { %vm1435_vm8 = vcmp.lt.f32.partialorder %v7954_v40, %v6400_v19 }
 0x59b   : > { %v2148_v49 = vadd.f32 %v2084_v46, %v2014_v27  ;;  %v2155_v9 = vadd.f32 %v2091_v20, %v2021_v35  ;;  %v2825_v27 = vmul.f32 %v5064_v38, %v1491_v47  ;;  %v2902_v20 = vmul.f32 %v5066_v39, %v1946_v1  ;;  %v7955_v1 = vld [vmem:[#allocation118_spill] sm:$0xff] }
 0x59c   : > { %v6954_v21 = vpop.permute.xlu1 %2347  ;;  %v6956_v56 = vpop.permute.xlu0 %3050  ;;  %vm1883_vm9 = vcmp.lt.f32.partialorder %v7955_v1, %v6640_v31 }
 0x59d   : > { %7947 = vst [vmem:[#allocation51_spill] sm:$0xff] %v6954_v21  ;;  %2341 = vperm.xlu1 %4495, %v2134_v48   ;;  %2362 = vperm.xlu0 %4494, %v2141_v41   ;;  %v2888_v48 = vmul.f32 %v5066_v39, %v1932_v30  ;;  %v7948_v41 = vld [vmem:[#allocation115_spill] sm:$0xff]  ;;  %v7949_v21 = vld [vmem:[#allocation114_spill] sm:$0xff]  ;;  %v2966_v61 = vadd.f32 %v2902_v20, %v2832_v13 }
 0x59e   : > { %vm1421_vm6 = vcmp.lt.f32.partialorder %v7948_v41, %v6574_v59  ;;  %vm1428_vm1 = vcmp.lt.f32.partialorder %v7949_v21, %v6478_v17  ;;  %v7951_v30 = vld [vmem:[#allocation119_spill] sm:$0xff]  ;;  %v1499_v41 = vsel %vm1435_vm8, 1.0, %v7849_v53 }
 0x59f   : > { %v2952_v46 = vadd.f32 %v2888_v48, %v2818_v23  ;;  %vm1876_vm4 = vcmp.lt.f32.partialorder %v7951_v30, %v6521_v57  ;;  %v1485_v63 = vsel %vm1421_vm6, 1.0, %v7849_v53  ;;  %v1492_v47 = vsel %vm1428_vm1, 1.0, %v7849_v53 }
 0x5a0   : > { %v6962_v2 = vpop.permute.xlu1 %3074  ;;  %v6964_v15 = vpop.permute.xlu0 %3095  ;;  %v1940_v23 = vsel %vm1876_vm4, 1.0, %v7849_v53  ;;  %v2008_v58 = vmul.f32 %v5058_v26, %v1485_v63  ;;  %v2015_v48 = vmul.f32 %v5058_v26, %v1492_v47  ;;  %v2819_v40 = vmul.f32 %v5064_v38, %v1485_v63 }
 0x5a1   : > { %2383 = vperm.xlu1 %4495, %v2148_v49   ;;  %2404 = vperm.xlu0 %4494, %v2155_v9   ;;  %v7950_v49 = vld [vmem:[#allocation116_spill] sm:$0xff]  ;;  %vm2679_vm6 = vcmask 1045509   ;;  %vm2681_vm1 = vcmask 1046534   ;;  %vm7965_vm4 = vcmask 64512  }
 0x5a2   : > { %vm1869_vm3 = vcmp.lt.f32.partialorder %v7950_v49, %v6425_v55  ;;  %v2959_v55 = vadd.f32 %v2895_v43, %v2825_v27  ;;  %v1947_v49 = vsel %vm1883_vm9, 1.0, %v7849_v53  ;;  %v2085_v27 = vmul.f32 %v5062_v37, %v1940_v23  ;;  %vm7966_vm8 = vmmov %vm7965_vm4 }
 0x5a3   : > { %v1933_v21 = vsel %vm1869_vm3, 1.0, %v7849_v53  ;;  %v2022_v43 = vmul.f32 %v5058_v26, %v1499_v41  ;;  %v2092_v20 = vmul.f32 %v5062_v37, %v1947_v49  ;;  %vm2683_vm3 = vcmask 1047559   ;;  %vm7967_vm9 = vmmov %vm7965_vm4 }
 0x5a4   : > { %v6980_v9 = vpop.permute.xlu1 %3116  ;;  %v6982_v35 = vpop.permute.xlu0 %3137  ;;  %v2149_v13 = vadd.f32 %v2085_v27, %v2015_v48  ;;  %v2833_v48 = vmul.f32 %v5064_v38, %v1499_v41  ;;  %v7958_v27 = vld [vmem:[#allocation123_spill] sm:$0xff] }
 0x5a5   : > { %7952 = vst [vmem:[#allocation52_spill] sm:$0xff] %v6980_v9  ;;  %7953 = vst [vmem:[#allocation53_spill] sm:$0xff] %v6982_v35  ;;  %3152 = vperm.xlu1 %4495, %v2945_v34   ;;  %3173 = vperm.xlu0 %4494, %v2952_v46   ;;  %v2078_v34 = vmul.f32 %v5062_v37, %v1933_v21  ;;  %v7957_v9 = vld [vmem:[#allocation120_spill] sm:$0xff]  ;;  %v2156_v4 = vadd.f32 %v2092_v20, %v2022_v43 }
 0x5a6   : > { %vm1436_vm2 = vcmp.lt.f32.partialorder %v7957_v9, %v6478_v17  ;;  %vm1877_vm0 = vcmp.lt.f32.partialorder %v7958_v27, %v6521_v57 }
 0x5a7   : > { %v2142_v46 = vadd.f32 %v2078_v34, %v2008_v58  ;;  %v2826_v58 = vmul.f32 %v5064_v38, %v1492_v47  ;;  %v2903_v34 = vmul.f32 %v5066_v39, %v1947_v49  ;;  %v1500_v9 = vsel %vm1436_vm2, 1.0, %v7849_v53  ;;  %vm7969_vm2 = vmmov %vm7965_vm4 }
 0x5a8   : > { %v6996_v19 = vpop.permute.xlu1 %3155  ;;  %v6998_v30 = vpop.permute.xlu0 %3158  ;;  %v2896_v47 = vmul.f32 %v5066_v39, %v1940_v23  ;;  %v1941_v41 = vsel %vm1877_vm0, 1.0, %v7849_v53  ;;  %v2834_v27 = vmul.f32 %v5064_v38, %v1500_v9  ;;  %vm7972_vm0 = vmmov %vm7969_vm2 }
 0x5a9   : > { %3194 = vperm.xlu1 %4495, %v2959_v55   ;;  %3215 = vperm.xlu0 %4494, %v2966_v61   ;;  %v2889_v55 = vmul.f32 %v5066_v39, %v1933_v21  ;;  %v7956_v61 = vld [vmem:[#allocation121_spill] sm:$0xff]  ;;  %v2967_v43 = vadd.f32 %v2903_v34, %v2833_v48 }
 0x5aa   : > { %vm1429_vm12 = vcmp.lt.f32.partialorder %v7956_v61, %v6574_v59  ;;  %v2960_v57 = vadd.f32 %v2896_v47, %v2826_v58 }
 0x5ab   : > { %v2953_v63 = vadd.f32 %v2889_v55, %v2819_v40  ;;  %v1493_v17 = vsel %vm1429_vm12, 1.0, %v7849_v53  ;;  %v2023_v40 = vmul.f32 %v5058_v26, %v1500_v9  ;;  %vm7968_vm12 = vmmov %vm7965_vm4 }
 0x5ac   : > { %v7005_v1 = vpop.permute.xlu1 %2242  ;;  %v7007_v35 = vpop.permute.xlu0 %2266  ;;  %v2016_v20 = vmul.f32 %v5058_v26, %v1493_v17  ;;  %v2827_v58 = vmul.f32 %v5064_v38, %v1493_v17 }
 0x5ad   : > { %2365 = vperm.xlu1 %4495, %v2142_v46   ;;  %2386 = vperm.xlu0 %4494, %v2149_v13   ;;  %v7959_v46 = vld [vmem:[#allocation122_spill] sm:$0xff] }
 0x5ae   : > { %vm1884_vm14 = vcmp.lt.f32.partialorder %v7959_v46, %v6640_v31  ;;  %v7962_v46 = vld [vmem:[#allocation124_spill] sm:$0xff] }
 0x5af   : > { %v1948_v49 = vsel %vm1884_vm14, 1.0, %v7849_v53  ;;  %vm1885_vm7 = vcmp.lt.f32.partialorder %v7962_v46, %v6640_v31  ;;  %v7963_v46 = vld [vmem:[#allocation23_spill] sm:$0xff]  ;;  %vm7981_vm14 = vmmov %vm7972_vm0 }
 0x5b0   : > { %v7021_v21 = vpop.permute.xlu1 %2287  ;;  %v7023_v13 = vpop.permute.xlu0 %2308  ;;  %v2093_v23 = vmul.f32 %v5062_v37, %v1948_v49  ;;  %v1949_v17 = vsel %vm1885_vm7, 1.0, %v7849_v53  ;;  %vm7989_vm7 = vmmov %vm7972_vm0 }
 0x5b1   : > { %2407 = vperm.xlu1 %4495, %v2156_v4   ;;  %3176 = vperm.xlu0 %4494, %v2953_v63   ;;  %v2086_v4 = vmul.f32 %v5062_v37, %v1941_v41  ;;  %v7961_v63 = vld [vmem:[#allocation125_spill] sm:$0xff] }
 0x5b2   : > { %vm1437_vm11 = vcmp.lt.f32.partialorder %v7961_v63, %v6574_v59  ;;  %v2157_v34 = vadd.f32 %v2093_v23, %v2023_v40  ;;  %v2904_v59 = vmul.f32 %v5066_v39, %v1948_v49  ;;  %v2094_v63 = vmul.f32 %v5062_v37, %v1949_v17  ;;  %v7964_v37 = vld [vmem:[#allocation22_spill] sm:$0xff] }
 0x5b3   : > { %v2150_v48 = vadd.f32 %v2086_v4, %v2016_v20 }
 0x5b4   : > { %v7032_v55 = vpop.permute.xlu1 %2329  ;;  %v7034_v61 = vpop.permute.xlu0 %2350  ;;  %v2968_v40 = vadd.f32 %v2904_v59, %v2834_v27 }
 0x5b5   : > { %7960 = vst [vmem:[#allocation48_spill] sm:$0xff] %v7034_v61  ;;  %3197 = vperm.xlu1 %4495, %v2960_v57   ;;  %3218 = vperm.xlu0 %4494, %v2967_v43   ;;  %v1501_v43 = vsel %vm1437_vm11, 1.0, %v7849_v53  ;;  %v2897_v61 = vmul.f32 %v5066_v39, %v1941_v41  ;;  %v2905_v41 = vmul.f32 %v5066_v39, %v1949_v17  ;;  %vm7982_vm11 = vmmov %vm7972_vm0 }
 0x5b6   : > { %v2024_v9 = vmul.f32 %v5058_v26, %v1501_v43  ;;  %v2835_v31 = vmul.f32 %v5064_v38, %v1501_v43  ;;  %v7074_v43 = vsub.s32 %v7964_v37, %v7963_v46 }
 0x5b7   : > { %v2961_v20 = vadd.f32 %v2897_v61, %v2827_v58 }
 0x5b8   : > { %v7044_v47 = vpop.permute.xlu1 %2368  ;;  %v7046_v57 = vpop.permute.xlu0 %2371  ;;  %v2969_v49 = vadd.f32 %v2905_v41, %v2835_v31  ;;  %v2422_v17 = vrot.slane %v6598_v14, %v7074_v43  ;;  %v3229_v31 = vrot.slane %v6662_v42, %v7074_v43  ;;  %v3261_v41 = vrot.slane %v6685_v0, %v7074_v43 }
 0x5b9   : > { %2389 = vperm.xlu1 %4495, %v2150_v48   ;;  %2410 = vperm.xlu0 %4494, %v2157_v34   ;;  %v2158_v48 = vadd.f32 %v2094_v63, %v2024_v9  ;;  %v2454_v9 = vrot.slane %v6629_v45, %v7074_v43  ;;  %v3233_v63 = vrot.slane %v6664_v3, %v7074_v43 }
 0x5ba   : > { %v3265_v14 = vrot.slane %v6687_v24, %v7074_v43  ;;  %v2458_v45 = vrot.slane %v6707_v60, %v7074_v43  ;;  %v3237_v42 = vrot.slane %v6728_v10, %v7074_v43  ;;  %v2430_v46 = vrot.slane %v6751_v16, %v7074_v43 }
 0x5bb   : > { %v3482_v24 = vsel %vm2671_vm10, %v3233_v63, %v3229_v31  ;;  %v2462_v60 = vrot.slane %v6753_v32, %v7074_v43  ;;  %v2470_v32 = vrot.slane %v6908_v25, %v7074_v43  ;;  %v2610_v31 = vrot.slane %v7044_v47, %v7074_v43 }
 0x5bc   : > { %v7054_v4 = vpop.permute.xlu1 %3053  ;;  %v7056_v23 = vpop.permute.xlu0 %3077  ;;  %v3483_v16 = vsel %vm2673_vm15, %v3237_v42, %v3482_v24  ;;  %v2614_v63 = vrot.slane %v7046_v57, %v7074_v43  ;;  %v3245_v25 = vrot.slane %v6873_v33, %v7074_v43  ;;  %v2438_v42 = vrot.slane %v6906_v5, %v7074_v43 }
 0x5bd   : > { %3200 = vperm.xlu1 %4495, %v2961_v20   ;;  %3221 = vperm.xlu0 %4494, %v2968_v40   ;;  %v2418_v20 = vrot.slane %v6600_v6, %v7074_v43  ;;  %v2450_v40 = vrot.slane %v6627_v8, %v7074_v43  ;;  %v2426_v6 = vrot.slane %v6705_v28, %v7074_v43 }
 0x5be   : > { %v3489_v28 = vsel %vm2671_vm10, %v3265_v14, %v3261_v41  ;;  %v3249_v33 = vrot.slane %v6956_v56, %v7074_v43  ;;  %v3253_v24 = vrot.slane %v7054_v4, %v7074_v43  ;;  %v3277_v5 = vrot.slane %v6875_v54, %v7074_v43 }
 0x5bf   : > { %v2672_v3 = vsel %vm2671_vm10, %v2422_v17, %v2418_v20  ;;  %v2685_v0 = vsel %vm2671_vm10, %v2454_v9, %v2450_v40  ;;  %v3269_v20 = vrot.slane %v6730_v11, %v7074_v43  ;;  %v3241_v40 = vrot.slane %v6791_v18, %v7074_v43 }
 0x5c0   : > { %v7060_v34 = vpop.permute.xlu1 %3098  ;;  %v7062_v61 = vpop.permute.xlu0 %3119  ;;  %v2686_v17 = vsel %vm2673_vm15, %v2458_v45, %v2685_v0  ;;  %v2466_v9 = vrot.slane %v6830_v62, %v7074_v43  ;;  %v2434_v11 = vrot.slane %v6828_v52, %v7074_v43  ;;  %v2474_v18 = vrot.slane %v7007_v35, %v7074_v43 }
 0x5c1   : > { %2413 = vperm.xlu1 %4495, %v2158_v48   ;;  %3224 = vperm.xlu0 %4494, %v2969_v49   ;;  %v2674_v49 = vsel %vm2673_vm15, %v2426_v6, %v2672_v3  ;;  %v2687_v41 = vsel %vm2675_vm5, %v2462_v60, %v2686_v17  ;;  %v3484_v6 = vsel %vm2675_vm5, %v3241_v40, %v3483_v16 }
 0x5c2   : > { %v2676_v62 = vsel %vm2675_vm5, %v2430_v46, %v2674_v49  ;;  %v3273_v52 = vrot.slane %v6808_v29, %v7074_v43  ;;  %v2688_v35 = vsel %vm2677_vm13, %v2466_v9, %v2687_v41  ;;  %v3485_v46 = vsel %vm2677_vm13, %v3245_v25, %v3484_v6 }
 0x5c3   : > { %v2689_v3 = vsel %vm2679_vm6, %v2470_v32, %v2688_v35  ;;  %v2678_v0 = vsel %vm2677_vm13, %v2434_v11, %v2676_v62  ;;  %v2442_v56 = vrot.slane %v7005_v1, %v7074_v43  ;;  %v3281_v1 = vrot.slane %v6962_v2, %v7074_v43 }
 0x5c4   : > { %v7064_v26 = vpop.permute.xlu1 %3140  ;;  %v7066_v38 = vpop.permute.xlu0 %3161  ;;  %v2690_v49 = vsel %vm2681_vm1, %v2474_v18, %v2689_v3  ;;  %v2680_v54 = vsel %vm2679_vm6, %v2438_v42, %v2678_v0  ;;  %v3285_v11 = vrot.slane %v7056_v23, %v7074_v43 }
 0x5c5   : > { %v2682_v2 = vsel %vm2681_vm1, %v2442_v56, %v2680_v54  ;;  %v3397_v0 = vrot.slane %v7066_v38, %v7074_v43 }
 0x5c8   : > { %v7068_v58 = vpop.permute.xlu1 %3179  ;;  %v7070_v27 = vpop.permute.xlu0 %3182 }
 0x5cc   : > { %v7076_v39 = vpop.permute.xlu1 %2245  ;;  %v7078_v59 = vpop.permute.xlu0 %2269 }
 0x5cd   : > { %v2478_v47 = vrot.slane %v7078_v59, %v7074_v43  ;;  %v2720_v59 = vsel %vm2671_vm10, %v2614_v63, %v2610_v31  ;;  %v2446_v4 = vrot.slane %v7076_v39, %v7074_v43  ;;  %v3490_v31 = vsel %vm2673_vm15, %v3269_v20, %v3489_v28 }
 0x5ce   : > { %v3486_v63 = vsel %vm2679_vm6, %v3249_v33, %v3485_v46  ;;  %v3491_v41 = vsel %vm2675_vm5, %v3273_v52, %v3490_v31  ;;  %v3389_v33 = vrot.slane %v6996_v19, %v7074_v43  ;;  %v2502_v31 = vrot.slane %v7021_v21, %v7074_v43 }
 0x5cf   : > { %v2691_v40 = vsel %vm2683_vm3, %v2478_v47, %v2690_v49  ;;  %v3487_v62 = vsel %vm2681_vm1, %v3253_v24, %v3486_v63  ;;  %v3492_v47 = vsel %vm2677_vm13, %v3277_v5, %v3491_v41  ;;  %v3421_v24 = vrot.slane %v7068_v58, %v7074_v43 }
 0x5d0   : > { %v7098_v8 = vpop.permute.xlu1 %2290  ;;  %v7100_v48 = vpop.permute.xlu0 %2311  ;;  %v2745_v18 = vsel %vm7965_vm4, %v2691_v40, 0.0  ;;  %v3425_v49 = vrot.slane %v7070_v27, %v7074_v43  ;;  %v2482_v5 = vrot.slane %v6717_v22, %v7074_v43  ;;  %v2490_v27 = vrot.slane %v6768_v36, %v7074_v43  ;;  %vm7993_vm4 = vmmov %vm7972_vm0 }
 0x5d1   : > { %v2494_v22 = vrot.slane %v6836_v7, %v7074_v43 }
 0x5d2   : > { %v3524_v40 = vsel %vm2671_vm10, %v3425_v49, %v3421_v24 }
 0x5d4   : > { %v7115_v10 = vpop.permute.xlu1 %2332  ;;  %v7117_v37 = vpop.permute.xlu0 %2353 }
 0x5d8   : > { %v2375_v14 = vpop.permute.xlu1 %2374  ;;  %v2393_v57 = vpop.permute.xlu0 %2392 }
 0x5d9   : > { %v2618_v45 = vrot.slane %v2375_v14, %v7074_v43  ;;  %v2642_v9 = vrot.slane %v2393_v57, %v7074_v43  ;;  %v2684_v14 = vsel %vm2683_vm3, %v2446_v4, %v2682_v2  ;;  %v3493_v57 = vsel %vm2679_vm6, %v3281_v1, %v3492_v47 }
 0x5da   : > { %v3494_v52 = vsel %vm2681_vm1, %v3285_v11, %v3493_v57  ;;  %v2742_v42 = vsel %vm7967_vm9, %v2684_v14, 0.0  ;;  %v2506_v1 = vrot.slane %v7098_v8, %v7074_v43  ;;  %v3293_v14 = vrot.slane %v6739_v12, %v7074_v43  ;;  %vm7995_vm9 = vmmov %vm7972_vm0 }
 0x5db   : > { %v7158_v29 = vsel %vm2673_vm15, %v2618_v45, %v2720_v59  ;;  %v3393_v59 = vrot.slane %v6998_v30, %v7074_v43  ;;  %v2486_v30 = vrot.slane %v6719_v50, %v7074_v43  ;;  %v3297_v57 = vrot.slane %v6741_v44, %v7074_v43 }
 0x5dc   : > { %v2396_v60 = vpop.permute.xlu1 %2395  ;;  %v3057_v17 = vpop.permute.xlu0 %3056  ;;  %v3313_v12 = vrot.slane %v7060_v34, %v7074_v43 }
 0x5dd   : > { %v2646_v16 = vrot.slane %v2396_v60, %v7074_v43  ;;  %v3257_v32 = vrot.slane %v3057_v17, %v7074_v43  ;;  %v3517_v60 = vsel %vm2671_vm10, %v3393_v59, %v3389_v33  ;;  %v2692_v36 = vsel %vm2671_vm10, %v2486_v30, %v2482_v5 }
 0x5de   : > { %v3518_v17 = vsel %vm2673_vm15, %v3397_v0, %v3517_v60  ;;  %v2693_v63 = vsel %vm2673_vm15, %v2490_v27, %v2692_v36  ;;  %v3309_v33 = vrot.slane %v6964_v15, %v7074_v43  ;;  %v3496_v24 = vsel %vm2671_vm10, %v3297_v57, %v3293_v14  ;;  %v7976_v36 = vld [vmem:[#allocation40_spill] sm:$0xff] }
 0x5df   : > { %v7180_v39 = vsel %vm2671_vm10, %v2646_v16, %v2642_v9  ;;  %v3488_v25 = vsel %vm2683_vm3, %v3257_v32, %v3487_v62  ;;  %v2498_v9 = vrot.slane %v6923_v51, %v7074_v43  ;;  %v2694_v11 = vsel %vm2675_vm5, %v2494_v22, %v2693_v63  ;;  %v7974_v22 = vld [vmem:[#allocation42_spill] sm:$0xff]  ;;  %v7978_v14 = vld [vmem:[#allocation36_spill] sm:$0xff] }
 0x5e0   : > { %v3081_v28 = vpop.permute.xlu1 %3080  ;;  %2746 = vadd.xlane.f32.xlu0 %v2745_v18  ;;  %v7185_v20 = vpop.permute.xlu0 %3101  ;;  %v3546_v6 = vsel %vm7966_vm8, %v3488_v25, 0.0  ;;  %v3329_v57 = vrot.slane %v7978_v14, %v7074_v43  ;;  %vm7994_vm8 = vmmov %vm7972_vm0 }
 0x5e1   : > { %v3289_v23 = vrot.slane %v3081_v28, %v7074_v43  ;;  %v2695_v18 = vsel %vm2677_vm13, %v2498_v9, %v2694_v11  ;;  %v2522_v9 = vrot.slane %v7974_v22, %v7074_v43  ;;  %v2534_v11 = vrot.slane %v7100_v48, %v7074_v43 }
 0x5e2   : > { %v2696_v21 = vsel %vm2679_vm6, %v2502_v31, %v2695_v18  ;;  %v2526_v31 = vrot.slane %v7976_v36, %v7074_v43 }
 0x5e3   : > { %v3495_v3 = vsel %vm2683_vm3, %v3289_v23, %v3494_v52  ;;  %v2697_v25 = vsel %vm2681_vm1, %v2506_v1, %v2696_v21 }
 0x5e4   : > { %v7195_v35 = vpop.permute.xlu1 %3122  ;;  %3547 = vadd.xlane.f32.xlu0 %v3546_v6  ;;  %v7197_v45 = vpop.permute.xlu0 %3143  ;;  %v3549_v46 = vsel %vm7968_vm12, %v3495_v3, 0.0  ;;  %v7970_v6 = vld [vmem:[#allocation33_spill] sm:$0xff]  ;;  %vm7996_vm12 = vmmov %vm7972_vm0 }
 0x5e5   : > { %2743 = vadd.xlane.f32.xlu1 %v2742_v42  ;;  %v3301_v52 = vrot.slane %v7970_v6, %v7074_v43  ;;  %v7971_v42 = vld [vmem:[#allocation38_spill] sm:$0xff] }
 0x5e6   : > { %v3305_v3 = vrot.slane %v7971_v42, %v7074_v43 }
 0x5e7   : > { %v3497_v49 = vsel %vm2673_vm15, %v3301_v52, %v3496_v24  ;;  %v7979_v52 = vld [vmem:[#allocation41_spill] sm:$0xff]  ;;  %v3341_v24 = vrot.slane %v7062_v61, %v7074_v43 }
 0x5e8   : > { %v3165_v56 = vpop.permute.xlu1 %3164  ;;  %3550 = vadd.xlane.f32.xlu0 %v3549_v46  ;;  %v3186_v19 = vpop.permute.xlu0 %3185  ;;  %v3317_v46 = vrot.slane %v7185_v20, %v7074_v43  ;;  %v3498_v5 = vsel %vm2675_vm5, %v3305_v3, %v3497_v49  ;;  %v3333_v42 = vrot.slane %v7979_v52, %v7074_v43  ;;  %v7980_v3 = vld [vmem:[#allocation52_spill] sm:$0xff] }
 0x5e9   : > { %v3401_v38 = vrot.slane %v3165_v56, %v7074_v43  ;;  %v3429_v58 = vrot.slane %v3186_v19, %v7074_v43  ;;  %v3499_v56 = vsel %vm2677_vm13, %v3309_v33, %v3498_v5  ;;  %v3337_v33 = vrot.slane %v7980_v3, %v7074_v43 }
 0x5ea   : > { %v3500_v60 = vsel %vm2679_vm6, %v3313_v12, %v3499_v56  ;;  %v3345_v5 = vrot.slane %v7195_v35, %v7074_v43 }
 0x5eb   : > { %v7226_v4 = vsel %vm2675_vm5, %v3401_v38, %v3518_v17  ;;  %v7229_v50 = vsel %vm2673_vm15, %v3429_v58, %v3524_v40  ;;  %v3501_v38 = vsel %vm2681_vm1, %v3317_v46, %v3500_v60 }
 0x5ec   : > { %v3204_v16 = vpop.permute.xlu1 %3203  ;;  %v3207_v32 = vpop.permute.xlu0 %3206 }
 0x5ed   : > { %v3453_v54 = vrot.slane %v3204_v16, %v7074_v43  ;;  %v3457_v7 = vrot.slane %v3207_v32, %v7074_v43  ;;  %v7975_v16 = vld [vmem:[#allocation34_spill] sm:$0xff] }
 0x5ee   : > { %v2514_v32 = vrot.slane %v7975_v16, %v7074_v43 }
 0x5ef   : > { %v7243_v51 = vsel %vm2671_vm10, %v3457_v7, %v3453_v54  ;;  %v2530_v54 = vrot.slane %v7023_v13, %v7074_v43  ;;  %v7977_v13 = vld [vmem:[#allocation35_spill] sm:$0xff] }
 0x5f0   : > { %v2294_v62 = vpop.permute.xlu1 %2293  ;;  %v2315_v41 = vpop.permute.xlu0 %2314 }
 0x5f1   : > { %v2510_v28 = vrot.slane %v2294_v62, %v7074_v43  ;;  %v2538_v62 = vrot.slane %v2315_v41, %v7074_v43 }
 0x5f3   : > { %v2698_v2 = vsel %vm2683_vm3, %v2510_v28, %v2697_v25 }
 0x5f4   : > { %v7250_v47 = vpop.permute.xlu1 %2335  ;;  %v7252_v8 = vpop.permute.xlu0 %2356  ;;  %v2748_v23 = vsel %vm7969_vm2, %v2698_v2, 0.0  ;;  %vm7997_vm2 = vmmov %vm7972_vm0 }
 0x5f5   : > { %2749 = vadd.xlane.f32.xlu1 %v2748_v23  ;;  %v3325_v23 = vrot.slane %v7977_v13, %v7074_v43 }
 0x5f7   : > { %v3503_v46 = vsel %vm2671_vm10, %v3329_v57, %v3325_v23 }
 0x5f8   : > { %v7265_v59 = vpop.permute.xlu1 %2377  ;;  %v2399_v0 = vpop.permute.xlu0 %2398  ;;  %v3504_v56 = vsel %vm2673_vm15, %v3333_v42, %v3503_v46 }
 0x5f9   : > { %v2650_v44 = vrot.slane %v2399_v0, %v7074_v43  ;;  %v3505_v60 = vsel %vm2675_vm5, %v3337_v33, %v3504_v56  ;;  %v3369_v33 = vrot.slane %v7064_v26, %v7074_v43 }
 0x5fa   : > { %v3506_v61 = vsel %vm2677_vm13, %v3341_v24, %v3505_v60  ;;  %v3373_v24 = vrot.slane %v7197_v45, %v7074_v43 }
 0x5fb   : > { %v7277_v15 = vsel %vm2673_vm15, %v2650_v44, %v7180_v39  ;;  %v7973_v39 = vld [vmem:[#allocation32_spill] sm:$0xff] }
 0x5fc   : > { %v3105_v19 = vpop.permute.xlu1 %3104  ;;  %v3126_v30 = vpop.permute.xlu0 %3125  ;;  %v2518_v40 = vrot.slane %v7973_v39, %v7074_v43 }
 0x5fd   : > { %v3321_v34 = vrot.slane %v3105_v19, %v7074_v43  ;;  %v3349_v19 = vrot.slane %v3126_v30, %v7074_v43 }
 0x5fe   : > { %v2699_v1 = vsel %vm2671_vm10, %v2518_v40, %v2514_v32  ;;  %v7984_v32 = vld [vmem:[#allocation44_spill] sm:$0xff] }
 0x5ff   : > { %v3502_v58 = vsel %vm2683_vm3, %v3321_v34, %v3501_v38  ;;  %v2700_v18 = vsel %vm2673_vm15, %v2522_v9, %v2699_v1  ;;  %v7983_v9 = vld [vmem:[#allocation39_spill] sm:$0xff]  ;;  %v2550_v36 = vrot.slane %v7984_v32, %v7074_v43  ;;  %v2558_v1 = vrot.slane %v7032_v55, %v7074_v43 }
 0x600   : > { %v7284_v27 = vpop.permute.xlu1 %3146  ;;  %v7286_v20 = vpop.permute.xlu0 %3167  ;;  %v3552_v17 = vsel %vm7972_vm0, %v3502_v58, 0.0  ;;  %v2701_v21 = vsel %vm2675_vm5, %v2526_v31, %v2700_v18  ;;  %v3507_v58 = vsel %vm2679_vm6, %v3345_v5, %v3506_v61  ;;  %v2546_v16 = vrot.slane %v7983_v9, %v7074_v43  ;;  %v7985_v31 = vld [vmem:[#allocation45_spill] sm:$0xff] }
 0x601   : > { %3553 = vadd.xlane.f32.xlu0 %v3552_v17  ;;  %v2702_v28 = vsel %vm2677_vm13, %v2530_v54, %v2701_v21  ;;  %v3508_v39 = vsel %vm2681_vm1, %v3349_v19, %v3507_v58  ;;  %v2554_v54 = vrot.slane %v7985_v31, %v7074_v43  ;;  %v3377_v19 = vrot.slane %v7284_v27, %v7074_v43  ;;  %v7991_v27 = vld [vmem:[#allocation48_spill] sm:$0xff] }
 0x602   : > { %v2703_v6 = vsel %vm2679_vm6, %v2534_v11, %v2702_v28  ;;  %v2562_v11 = vrot.slane %v7115_v10, %v7074_v43  ;;  %v2706_v21 = vsel %vm2671_vm10, %v2550_v36, %v2546_v16  ;;  %v2566_v28 = vrot.slane %v7250_v47, %v7074_v43  ;;  %v7986_v10 = vld [vmem:[#allocation37_spill] sm:$0xff] }
 0x603   : > { %v2704_v41 = vsel %vm2681_vm1, %v2538_v62, %v2703_v6  ;;  %v3357_v6 = vrot.slane %v7986_v10, %v7074_v43  ;;  %v2586_v9 = vrot.slane %v7991_v27, %v7074_v43  ;;  %v2590_v36 = vrot.slane %v7117_v37, %v7074_v43 }
 0x604   : > { %v7299_v7 = vpop.permute.xlu1 %3188  ;;  %v7301_v63 = vpop.permute.xlu0 %3209 }
 0x608   : > { %v2318_v25 = vpop.permute.xlu1 %2317  ;;  %v2339_v2 = vpop.permute.xlu0 %2338 }
 0x609   : > { %v2542_v48 = vrot.slane %v2318_v25, %v7074_v43  ;;  %v2707_v25 = vsel %vm2673_vm15, %v2554_v54, %v2706_v21  ;;  %v2570_v13 = vrot.slane %v2339_v2, %v7074_v43  ;;  %v2594_v54 = vrot.slane %v7252_v8, %v7074_v43 }
 0x60a   : > { %v2708_v23 = vsel %vm2675_vm5, %v2558_v1, %v2707_v25  ;;  %v3405_v8 = vrot.slane %v7286_v20, %v7074_v43 }
 0x60b   : > { %v2705_v0 = vsel %vm2683_vm3, %v2542_v48, %v2704_v41  ;;  %v2709_v55 = vsel %vm2677_vm13, %v2562_v11, %v2708_v23  ;;  %v7987_v48 = vld [vmem:[#allocation43_spill] sm:$0xff]  ;;  %v7988_v41 = vld [vmem:[#allocation53_spill] sm:$0xff] }
 0x60c   : > { %v7324_v12 = vpop.permute.xlu1 %2359  ;;  %v7326_v44 = vpop.permute.xlu0 %2380  ;;  %v2751_v49 = vsel %vm7981_vm14, %v2705_v0, 0.0  ;;  %v3361_v52 = vrot.slane %v7987_v48, %v7074_v43  ;;  %v2710_v42 = vsel %vm2679_vm6, %v2566_v28, %v2709_v55  ;;  %v3365_v3 = vrot.slane %v7988_v41, %v7074_v43  ;;  %vm7998_vm14 = vmmov %vm7972_vm0 }
 0x60d   : > { %2752 = vadd.xlane.f32.xlu1 %v2751_v49  ;;  %v2711_v2 = vsel %vm2681_vm1, %v2570_v13, %v2710_v42  ;;  %v2598_v25 = vrot.slane %v7324_v12, %v7074_v43 }
 0x60e   : > { %v3510_v56 = vsel %vm2671_vm10, %v3361_v52, %v3357_v6 }
 0x60f   : > { %v3511_v60 = vsel %vm2673_vm15, %v3365_v3, %v3510_v56 }
 0x610   : > { %v7336_v34 = vpop.permute.xlu1 %2401  ;;  %v3129_v38 = vpop.permute.xlu0 %3128  ;;  %v3512_v61 = vsel %vm2675_vm5, %v3369_v33, %v3511_v60 }
 0x611   : > { %v3353_v17 = vrot.slane %v3129_v38, %v7074_v43  ;;  %v3513_v45 = vsel %vm2677_vm13, %v3373_v24, %v3512_v61 }
 0x613   : > { %v3509_v35 = vsel %vm2683_vm3, %v3353_v17, %v3508_v39  ;;  %v7990_v17 = vld [vmem:[#allocation51_spill] sm:$0xff] }
 0x614   : > { %v3150_v40 = vpop.permute.xlu1 %3149  ;;  %v7342_v22 = vpop.permute.xlu0 %3170  ;;  %v3555_v30 = vsel %vm7982_vm11, %v3509_v35, 0.0  ;;  %v2582_v39 = vrot.slane %v7990_v17, %v7074_v43  ;;  %v3514_v35 = vsel %vm2679_vm6, %v3377_v19, %v3513_v45  ;;  %vm7999_vm11 = vmmov %vm7972_vm0 }
 0x615   : > { %3556 = vadd.xlane.f32.xlu0 %v3555_v30  ;;  %v3381_v26 = vrot.slane %v3150_v40, %v7074_v43  ;;  %v7992_v40 = vld [vmem:[#allocation46_spill] sm:$0xff]  ;;  %v3409_v48 = vrot.slane %v7342_v22, %v7074_v43 }
 0x616   : > { %v2578_v32 = vrot.slane %v7992_v40, %v7074_v43 }
 0x617   : > { %v3515_v16 = vsel %vm2681_vm1, %v3381_v26, %v3514_v35  ;;  %v3461_v35 = vrot.slane %v7301_v63, %v7074_v43 }
 0x618   : > { %v7355_v18 = vpop.permute.xlu1 %3191  ;;  %v7357_v62 = vpop.permute.xlu0 %3212  ;;  %v2713_v28 = vsel %vm2671_vm10, %v2582_v39, %v2578_v32 }
 0x619   : > { %v2714_v13 = vsel %vm2673_vm15, %v2586_v9, %v2713_v28  ;;  %v3465_v27 = vrot.slane %v7357_v62, %v7074_v43 }
 0x61a   : > { %v2715_v23 = vsel %vm2675_vm5, %v2590_v36, %v2714_v13 }
 0x61b   : > { %v2716_v55 = vsel %vm2677_vm13, %v2594_v54, %v2715_v23 }
 0x61c   : > { %v2342_v14 = vpop.permute.xlu1 %2341  ;;  %v2363_v57 = vpop.permute.xlu0 %2362  ;;  %v2717_v6 = vsel %vm2679_vm6, %v2598_v25, %v2716_v55 }
 0x61d   : > { %v2574_v47 = vrot.slane %v2342_v14, %v7074_v43  ;;  %v2602_v37 = vrot.slane %v2363_v57, %v7074_v43 }
 0x61f   : > { %v2712_v0 = vsel %vm2683_vm3, %v2574_v47, %v2711_v2  ;;  %v2718_v57 = vsel %vm2681_vm1, %v2602_v37, %v2717_v6  ;;  %v3520_v47 = vsel %vm2677_vm13, %v3405_v8, %v7226_v4 }
 0x620   : > { %v7380_v49 = vpop.permute.xlu1 %2383  ;;  %v7382_v46 = vpop.permute.xlu0 %2404  ;;  %v2754_v5 = vsel %vm7989_vm7, %v2712_v0, 0.0  ;;  %v3521_v2 = vsel %vm2679_vm6, %v3409_v48, %v3520_v47  ;;  %v2622_v0 = vrot.slane %v7265_v59, %v7074_v43  ;;  %v3433_v59 = vrot.slane %v7299_v7, %v7074_v43  ;;  %vm8008_vm7 = vmmov %vm7972_vm0 }
 0x621   : > { %2755 = vadd.xlane.f32.xlu1 %v2754_v5  ;;  %v2626_v5 = vrot.slane %v7326_v44, %v7074_v43  ;;  %v2630_v60 = vrot.slane %v7380_v49, %v7074_v43  ;;  %v3437_v44 = vrot.slane %v7355_v18, %v7074_v43  ;;  %v2654_v18 = vrot.slane %v7336_v34, %v7074_v43 }
 0x622   : > { %v2722_v61 = vsel %vm2675_vm5, %v2622_v0, %v7158_v29  ;;  %v2658_v63 = vrot.slane %v7382_v46, %v7074_v43 }
 0x623   : > { %v2723_v45 = vsel %vm2677_vm13, %v2626_v5, %v2722_v61  ;;  %v2729_v28 = vsel %vm2675_vm5, %v2654_v18, %v7277_v15 }
 0x624   : > { %v3153_v38 = vpop.permute.xlu1 %3152  ;;  %v3174_v58 = vpop.permute.xlu0 %3173  ;;  %v2724_v17 = vsel %vm2679_vm6, %v2630_v60, %v2723_v45  ;;  %v2730_v37 = vsel %vm2677_vm13, %v2658_v63, %v2729_v28 }
 0x625   : > { %v3385_v30 = vrot.slane %v3153_v38, %v7074_v43  ;;  %v3413_v52 = vrot.slane %v3174_v58, %v7074_v43 }
 0x627   : > { %v3516_v31 = vsel %vm2683_vm3, %v3385_v30, %v3515_v16  ;;  %v3522_v22 = vsel %vm2681_vm1, %v3413_v52, %v3521_v2  ;;  %v3526_v30 = vsel %vm2675_vm5, %v3433_v59, %v7229_v50 }
 0x628   : > { %v3195_v1 = vpop.permute.xlu1 %3194  ;;  %v7406_v11 = vpop.permute.xlu0 %3215  ;;  %v3558_v21 = vsel %vm7993_vm4, %v3516_v31, 0.0  ;;  %v3527_v16 = vsel %vm2677_vm13, %v3437_v44, %v3526_v30  ;;  %vm8009_vm4 = vmmov 0  }
 0x629   : > { %3559 = vadd.xlane.f32.xlu0 %v3558_v21  ;;  %v3441_v49 = vrot.slane %v3195_v1, %v7074_v43  ;;  %v3469_v40 = vrot.slane %v7406_v11, %v7074_v43  ;;  %v3532_v1 = vsel %vm2673_vm15, %v3461_v35, %v7243_v51 }
 0x62a   : > { %v3533_v25 = vsel %vm2675_vm5, %v3465_v27, %v3532_v1 }
 0x62b   : > { %v3528_v31 = vsel %vm2679_vm6, %v3441_v49, %v3527_v16  ;;  %v3534_v23 = vsel %vm2677_vm13, %v3469_v40, %v3533_v25 }
 0x62c   : > { %v2366_v14 = vpop.permute.xlu1 %2365  ;;  %v2387_v10 = vpop.permute.xlu0 %2386 }
 0x62d   : > { %v2606_v12 = vrot.slane %v2366_v14, %v7074_v43  ;;  %v2634_v26 = vrot.slane %v2387_v10, %v7074_v43 }
 0x62f   : > { %v2719_v42 = vsel %vm2683_vm3, %v2606_v12, %v2718_v57  ;;  %v2725_v7 = vsel %vm2681_vm1, %v2634_v26, %v2724_v17 }
 0x630   : > { %v2408_v41 = vpop.permute.xlu1 %2407  ;;  %v3177_v20 = vpop.permute.xlu0 %3176  ;;  %v2757_v3 = vsel %vm7994_vm8, %v2719_v42, 0.0  ;;  %vm8010_vm8 = vmmov %vm7972_vm0 }
 0x631   : > { %v3417_v33 = vrot.slane %v3177_v20, %v7074_v43  ;;  %2758 = vadd.xlane.f32.xlu1 %v2757_v3  ;;  %v2662_v34 = vrot.slane %v2408_v41, %v7074_v43 }
 0x633   : > { %v3523_v24 = vsel %vm2683_vm3, %v3417_v33, %v3522_v22  ;;  %v2731_v14 = vsel %vm2679_vm6, %v2662_v34, %v2730_v37 }
 0x634   : > { %v3198_v4 = vpop.permute.xlu1 %3197  ;;  %v3219_v56 = vpop.permute.xlu0 %3218  ;;  %v3561_v19 = vsel %vm7995_vm9, %v3523_v24, 0.0 }
 0x635   : > { %3562 = vadd.xlane.f32.xlu0 %v3561_v19  ;;  %v3445_v29 = vrot.slane %v3198_v4, %v7074_v43  ;;  %v3473_v62 = vrot.slane %v3219_v56, %v7074_v43 }
 0x637   : > { %v3529_v21 = vsel %vm2681_vm1, %v3445_v29, %v3528_v31  ;;  %v3535_v10 = vsel %vm2679_vm6, %v3473_v62, %v3534_v23 }
 0x638   : > { %v2390_v38 = vpop.permute.xlu1 %2389  ;;  %v2411_v58 = vpop.permute.xlu0 %2410 }
 0x639   : > { %v2638_v39 = vrot.slane %v2390_v38, %v7074_v43  ;;  %v2666_v46 = vrot.slane %v2411_v58, %v7074_v43 }
 0x63b   : > { %v2726_v9 = vsel %vm2683_vm3, %v2638_v39, %v2725_v7  ;;  %v2732_v48 = vsel %vm2681_vm1, %v2666_v46, %v2731_v14 }
 0x63c   : > { %v3201_v32 = vpop.permute.xlu1 %3200  ;;  %v3222_v36 = vpop.permute.xlu0 %3221  ;;  %v2760_v50 = vsel %vm7996_vm12, %v2726_v9, 0.0 }
 0x63d   : > { %v3449_v54 = vrot.slane %v3201_v32, %v7074_v43  ;;  %2761 = vadd.xlane.f32.xlu1 %v2760_v50  ;;  %v3477_v11 = vrot.slane %v3222_v36, %v7074_v43 }
 0x63f   : > { %v3530_v13 = vsel %vm2683_vm3, %v3449_v54, %v3529_v21  ;;  %v3536_v12 = vsel %vm2681_vm1, %v3477_v11, %v3535_v10 }
 0x640   : > { %v2414_v55 = vpop.permute.xlu1 %2413  ;;  %v3225_v8 = vpop.permute.xlu0 %3224  ;;  %v3564_v51 = vsel %vm7997_vm2, %v3530_v13, 0.0 }
 0x641   : > { %v2670_v6 = vrot.slane %v2414_v55, %v7074_v43  ;;  %v3481_v15 = vrot.slane %v3225_v8, %v7074_v43  ;;  %3565 = vadd.xlane.f32.xlu0 %v3564_v51 }
 0x643   : > { %v2733_v52 = vsel %vm2683_vm3, %v2670_v6, %v2732_v48  ;;  %v3537_v57 = vsel %vm2683_vm3, %v3481_v15, %v3536_v12 }
 0x644   : > { %v2763_v42 = vsel %vm7972_vm0, %v2733_v52, 0.0  ;;  %v3567_v47 = vsel %vm7998_vm14, %v3537_v57, 0.0 }
 0x645   : > { %2764 = vadd.xlane.f32.xlu1 %v2763_v42  ;;  %3568 = vadd.xlane.f32.xlu0 %v3567_v47 }
 0x66d   : > { %v2747_v41 = vpop.xlane.xlu0 %2746 }
 0x66e   : > { %v3571_v60 = vmul.f32 6.0, %v2747_v41 }
 0x670   : > { %v4348_v35 = vadd.f32 -4488.0, %v3571_v60 }
 0x671   : > { %v3548_v20 = vpop.xlane.xlu0 %3547 }
 0x672   : > { %v2744_v3 = vpop.xlane.xlu1 %2743  ;;  %v3594_v0 = vmul.f32 6.0, %v3548_v20  ;;  %v3587_v32 = vmul.f32 0.0010009357, %v4348_v35 }
 0x673   : > { %v3570_v24 = vmul.f32 6.0, %v2744_v3 }
 0x674   : > { %v4355_v26 = vadd.f32 -4488.0, %v3594_v0  ;;  %v3619_v23 = vmul.f32 %v3587_v32, %v3587_v32 }
 0x675   : > { %v3551_v2 = vpop.xlane.xlu0 %3550  ;;  %v4347_v61 = vadd.f32 -4488.0, %v3570_v24 }
 0x676   : > { %v3595_v56 = vmul.f32 6.0, %v3551_v2  ;;  %v3610_v29 = vmul.f32 0.0010009357, %v4355_v26 }
 0x677   : > { %v3586_v7 = vmul.f32 0.0010009357, %v4347_v61 }
 0x678   : > { %v4356_v58 = vadd.f32 -4488.0, %v3595_v56  ;;  %v3626_v36 = vmul.f32 %v3610_v29, %v3610_v29 }
 0x679   : > { %v3618_v50 = vmul.f32 %v3586_v7, %v3586_v7  ;;  %v3642_v34 = vmul.f32 %v3610_v29, %v3586_v7 }
 0x67a   : > { %v3611_v9 = vmul.f32 0.0010009357, %v4356_v58 }
 0x67b   : > { %v3634_v55 = vadd.f32 %v3626_v36, %v3618_v50  ;;  %v3650_v14 = vmul.f32 -1.7802485, %v3642_v34 }
 0x67c   : > { %v3627_v46 = vmul.f32 %v3611_v9, %v3611_v9  ;;  %v3643_v28 = vmul.f32 %v3611_v9, %v3587_v32 }
 0x67d   : > { %v3658_v0 = vsub.f32 %v3634_v55, %v3650_v14 }
 0x67e   : > { %v3635_v12 = vadd.f32 %v3627_v46, %v3619_v23  ;;  %v3651_v47 = vmul.f32 -1.7802485, %v3643_v28 }
 0x680   : > { %v3659_v60 = vsub.f32 %v3635_v12, %v3651_v47 }
 0x682   : > { %v2750_v33 = vpop.xlane.xlu1 %2749  ;;  %v3667_v29 = vmul.f32 2.4075642, %v3659_v60 }
 0x683   : > { %v3572_v59 = vmul.f32 6.0, %v2750_v33 }
 0x684   : > { %v3675_v32 = vmin.f32 %v3667_v29, 3.1698787 }
 0x685   : > { %v4349_v18 = vadd.f32 -4488.0, %v3572_v59 }
 0x687   : > { %v3588_v62 = vmul.f32 0.0010009357, %v4349_v18 }
 0x689   : > { %v3620_v10 = vmul.f32 %v3588_v62, %v3588_v62 }
 0x68e   : > { %v3554_v22 = vpop.xlane.xlu0 %3553 }
 0x68f   : > { %v3596_v19 = vmul.f32 6.0, %v3554_v22 }
 0x691   : > { %v4357_v49 = vadd.f32 -4488.0, %v3596_v19 }
 0x693   : > { %v3612_v63 = vmul.f32 0.0010009357, %v4357_v49 }
 0x695   : > { %v3628_v25 = vmul.f32 %v3612_v63, %v3612_v63  ;;  %v3644_v13 = vmul.f32 %v3612_v63, %v3588_v62 }
 0x697   : > { %v3636_v41 = vadd.f32 %v3628_v25, %v3620_v10  ;;  %v3652_v20 = vmul.f32 -1.7802485, %v3644_v13  ;;  %v3683_v13 = vadd.f32 1e-06, %v3675_v32 }
 0x699   : > { %v3660_v26 = vsub.f32 %v3636_v41, %v3652_v20 }
 0x69a   : > { %v2753_v5 = vpop.xlane.xlu1 %2752 }
 0x69b   : > { %v3573_v39 = vmul.f32 6.0, %v2753_v5  ;;  %v3668_v7 = vmul.f32 2.4075642, %v3660_v26 }
 0x69d   : > { %v4350_v40 = vadd.f32 -4488.0, %v3573_v39  ;;  %v3676_v36 = vmin.f32 %v3668_v7, 3.1698787 }
 0x69f   : > { %v3589_v37 = vmul.f32 0.0010009357, %v4350_v40 }
 0x6a1   : > { %v3621_v3 = vmul.f32 %v3589_v37, %v3589_v37 }
 0x6a2   : > { %v3557_v4 = vpop.xlane.xlu0 %3556 }
 0x6a3   : > { %v3597_v45 = vmul.f32 6.0, %v3557_v4 }
 0x6a5   : > { %v4358_v27 = vadd.f32 -4488.0, %v3597_v45 }
 0x6a7   : > { %v3613_v54 = vmul.f32 0.0010009357, %v4358_v27 }
 0x6a9   : > { %v3629_v6 = vmul.f32 %v3613_v54, %v3613_v54  ;;  %v3645_v15 = vmul.f32 %v3613_v54, %v3589_v37  ;;  %v3684_v37 = vadd.f32 1e-06, %v3676_v36 }
 0x6ab   : > { %v3637_v24 = vadd.f32 %v3629_v6, %v3621_v3  ;;  %v3653_v5 = vmul.f32 -1.7802485, %v3645_v15 }
 0x6ae   : > { %v2756_v44 = vpop.xlane.xlu1 %2755 }
 0x6af   : > { %v3574_v30 = vmul.f32 6.0, %v2756_v44  ;;  %v3666_v44 = vmul.f32 2.4075642, %v3658_v0 }
 0x6b1   : > { %v4351_v31 = vadd.f32 -4488.0, %v3574_v30  ;;  %v3674_v27 = vmin.f32 %v3666_v44, 3.1698787 }
 0x6b3   : > { %v3590_v8 = vmul.f32 0.0010009357, %v4351_v31  ;;  %v3682_v62 = vadd.f32 1e-06, %v3674_v27 }
 0x6b5   : > { %v3622_v2 = vmul.f32 %v3590_v8, %v3590_v8  ;;  %4504 = vlog2.f32 %v3682_v62 }
 0x6b6   : > { %v3560_v38 = vpop.xlane.xlu0 %3559  ;;  %4506 = vlog2.f32 %v3683_v13 }
 0x6b7   : > { %v3598_v17 = vmul.f32 6.0, %v3560_v38  ;;  %v3661_v38 = vsub.f32 %v3637_v24, %v3653_v5  ;;  %4508 = vlog2.f32 %v3684_v37 }
 0x6b9   : > { %v4359_v16 = vadd.f32 -4488.0, %v3598_v17  ;;  %v3669_v9 = vmul.f32 2.4075642, %v3661_v38 }
 0x6bb   : > { %v3614_v11 = vmul.f32 0.0010009357, %v4359_v16  ;;  %v3677_v54 = vmin.f32 %v3669_v9, 3.1698787 }
 0x6bd   : > { %v3630_v52 = vmul.f32 %v3614_v11, %v3614_v11  ;;  %v3646_v57 = vmul.f32 %v3614_v11, %v3590_v8  ;;  %v3685_v10 = vadd.f32 1e-06, %v3677_v54 }
 0x6be   : > { %v2759_v1 = vpop.xlane.xlu1 %2758 }
 0x6bf   : > { %v3575_v21 = vmul.f32 6.0, %v2759_v1  ;;  %v3638_v4 = vadd.f32 %v3630_v52, %v3622_v2  ;;  %v3654_v56 = vmul.f32 -1.7802485, %v3646_v57  ;;  %4510 = vlog2.f32 %v3685_v10  ;;  %v8000_v10 = vld [vmem:[#allocation24_spill] sm:$0xff] }
 0x6c1   : > { %v4352_v51 = vadd.f32 -4488.0, %v3575_v21  ;;  %v3662_v17 = vsub.f32 %v3638_v4, %v3654_v56  ;;  %v4505_v4 = vpop.eup %4504 }
 0x6c2   : > { %v3563_v48 = vpop.xlane.xlu0 %3562 }
 0x6c3   : > { %v3599_v42 = vmul.f32 6.0, %v3563_v48  ;;  %v3591_v33 = vmul.f32 0.0010009357, %v4352_v51  ;;  %v3670_v63 = vmul.f32 2.4075642, %v3662_v17 }
 0x6c4   : > { %v3691_v17 = vmul.f32 0.6931472, %v4505_v4 }
 0x6c5   : > { %v4360_v22 = vadd.f32 -4488.0, %v3599_v42  ;;  %v3623_v61 = vmul.f32 %v3591_v33, %v3591_v33  ;;  %v3678_v11 = vmin.f32 %v3670_v63, 3.1698787 }
 0x6c7   : > { %v3615_v19 = vmul.f32 0.0010009357, %v4360_v22  ;;  %v3686_v15 = vadd.f32 1e-06, %v3678_v11 }
 0x6c9   : > { %v3631_v59 = vmul.f32 %v3615_v19, %v3615_v19  ;;  %v3647_v45 = vmul.f32 %v3615_v19, %v3591_v33  ;;  %4512 = vlog2.f32 %v3686_v15  ;;  %v4507_v19 = vpop.eup %4506  ;;  %v8001_v15 = vld [vmem:[#allocation25_spill] sm:$0xff] }
 0x6ca   : > { %v2762_v58 = vpop.xlane.xlu1 %2761  ;;  %v4509_v26 = vpop.eup %4508  ;;  %v3693_v44 = vmul.f32 0.6931472, %v4507_v19  ;;  %v8006_v19 = vld [vmem:[#allocation29_spill] sm:$0xff] }
 0x6cb   : > { %v3639_v49 = vadd.f32 %v3631_v59, %v3623_v61  ;;  %v3655_v39 = vmul.f32 -1.7802485, %v3647_v45  ;;  %v3576_v35 = vmul.f32 6.0, %v2762_v58  ;;  %v4511_v61 = vpop.eup %4510  ;;  %v3695_v58 = vmul.f32 0.6931472, %v4509_v26 }
 0x6cd   : > { %v3663_v30 = vsub.f32 %v3639_v49, %v3655_v39  ;;  %v4353_v18 = vadd.f32 -4488.0, %v3576_v35  ;;  %v3697_v49 = vmul.f32 0.6931472, %v4511_v61  ;;  %v3707_v35 = vsub.f32 0.0, %v3693_v44 }
 0x6ce   : > { %v3566_v16 = vpop.xlane.xlu0 %3565  ;;  %v3708_v7 = vsub.f32 0.0, %v3695_v58 }
 0x6cf   : > { %v3600_v40 = vmul.f32 6.0, %v3566_v16  ;;  %v3671_v50 = vmul.f32 2.4075642, %v3663_v30  ;;  %v3592_v31 = vmul.f32 0.0010009357, %v4353_v18  ;;  %v3706_v18 = vsub.f32 0.0, %v3691_v17 }
 0x6d0   : > { %v3709_v27 = vsub.f32 0.0, %v3697_v49  ;;  %v3729_v63 = vrot.slane %v3707_v35, %v7074_v43  ;;  %v3733_v32 = vrot.slane %v3708_v7, %v7074_v43 }
 0x6d1   : > { %v4361_v34 = vadd.f32 -4488.0, %v3600_v40  ;;  %v3679_v23 = vmin.f32 %v3671_v50, 3.1698787  ;;  %v3624_v55 = vmul.f32 %v3592_v31, %v3592_v31  ;;  %v3725_v50 = vrot.slane %v3706_v18, %v7074_v43 }
 0x6d2   : > { %v2765_v1 = vpop.xlane.xlu1 %2764  ;;  %v3569_v46 = vpop.xlane.xlu0 %3568 }
 0x6d3   : > { %v3616_v21 = vmul.f32 0.0010009357, %v4361_v34  ;;  %v3577_v28 = vmul.f32 6.0, %v2765_v1  ;;  %v3601_v25 = vmul.f32 6.0, %v3569_v46  ;;  %v3687_v57 = vadd.f32 1e-06, %v3679_v23  ;;  %v4513_v45 = vpop.eup %4512 }
 0x6d4   : > { %v3699_v39 = vmul.f32 0.6931472, %v4513_v45  ;;  %v3754_v46 = vsel %vm2671_vm10, %v3729_v63, %v3725_v50  ;;  %v8007_v45 = vld [vmem:[#allocation31_spill] sm:$0xff]  ;;  %v350_v63 = vld [vmem:[#allocation8 + $0x10] sm:$0xff] }
 0x6d5   : > { %v3632_v8 = vmul.f32 %v3616_v21, %v3616_v21  ;;  %v3648_v51 = vmul.f32 %v3616_v21, %v3592_v31  ;;  %v4354_v14 = vadd.f32 -4488.0, %v3577_v28  ;;  %v4362_v6 = vadd.f32 -4488.0, %v3601_v25  ;;  %4391 = vmatpush3.msra.mxu0 %v350_v63 }
 0x6d6   : > { %4514 = vlog2.f32 %v3687_v57  ;;  %v3710_v9 = vsub.f32 0.0, %v3699_v39  ;;  %v3737_v31 = vrot.slane %v3709_v27, %v7074_v43  ;;  %v3755_v21 = vsel %vm2673_vm15, %v3733_v32, %v3754_v46  ;;  %v8003_v57 = vld [vmem:[#allocation28_spill] sm:$0xff]  ;;  %4400 = vmatprep.subr.mxu0 %v7849_v53 }
 0x6d7   : > { %v3640_v48 = vadd.f32 %v3632_v8, %v3624_v55  ;;  %v3656_v12 = vmul.f32 -1.7802485, %v3648_v51  ;;  %v3593_v52 = vmul.f32 0.0010009357, %v4354_v14  ;;  %v3617_v42 = vmul.f32 0.0010009357, %v4362_v6 }
 0x6d8   : > { %v3741_v62 = vrot.slane %v3710_v9, %v7074_v43  ;;  %v3756_v25 = vsel %vm2675_vm5, %v3737_v31, %v3755_v21 }
 0x6d9   : > { %v3664_v47 = vsub.f32 %v3640_v48, %v3656_v12  ;;  %v3625_v41 = vmul.f32 %v3593_v52, %v3593_v52  ;;  %v3633_v20 = vmul.f32 %v3617_v42, %v3617_v42  ;;  %v3649_v3 = vmul.f32 %v3617_v42, %v3593_v52  ;;  %v8002_v12 = vld [vmem:[#allocation26_spill] sm:$0xff] }
 0x6da   : > { %v3757_v13 = vsel %vm2677_vm13, %v3741_v62, %v3756_v25 }
 0x6db   : > { %v3672_v2 = vmul.f32 2.4075642, %v3664_v47  ;;  %v3641_v33 = vadd.f32 %v3633_v20, %v3625_v41  ;;  %v3657_v22 = vmul.f32 -1.7802485, %v3649_v3  ;;  %v8004_v47 = vld [vmem:[#allocation30_spill] sm:$0xff] }
 0x6dd   : > { %v3680_v0 = vmin.f32 %v3672_v2, 3.1698787  ;;  %v3665_v24 = vsub.f32 %v3641_v33, %v3657_v22  ;;  %v8005_v2 = vld [vmem:[#allocation27_spill] sm:$0xff] }
 0x6df   : > { %v3688_v5 = vadd.f32 1e-06, %v3680_v0  ;;  %v3673_v56 = vmul.f32 2.4075642, %v3665_v24 }
 0x6e0   : > { %v4515_v38 = vpop.eup %4514 }
 0x6e1   : > { %4516 = vlog2.f32 %v3688_v5  ;;  %v3681_v60 = vmin.f32 %v3673_v56, 3.1698787  ;;  %v3701_v29 = vmul.f32 0.6931472, %v4515_v38 }
 0x6e3   : > { %v3689_v59 = vadd.f32 1e-06, %v3681_v60  ;;  %v3711_v40 = vsub.f32 0.0, %v3701_v29 }
 0x6e5   : > { %4518 = vlog2.f32 %v3689_v59  ;;  %v3745_v1 = vrot.slane %v3711_v40, %v7074_v43 }
 0x6e7   : > { %v3758_v23 = vsel %vm2679_vm6, %v3745_v1, %v3757_v13 }
 0x6eb   : > { %v4517_v30 = vpop.eup %4516 }
 0x6ec   : > { %v3703_v16 = vmul.f32 0.6931472, %v4517_v30 }
 0x6ee   : > { %v3712_v36 = vsub.f32 0.0, %v3703_v16 }
 0x6ef   : > { %v4519_v34 = vpop.eup %4518 }
 0x6f0   : > { %v3705_v54 = vmul.f32 0.6931472, %v4519_v34  ;;  %v3749_v11 = vrot.slane %v3712_v36, %v7074_v43 }
 0x6f2   : > { %v3713_v28 = vsub.f32 0.0, %v3705_v54  ;;  %v3759_v55 = vsel %vm2681_vm1, %v3749_v11, %v3758_v23 }
 0x6f4   : > { %v3753_v37 = vrot.slane %v3713_v28, %v7074_v43 }
 0x6f6   : > { %v3760_v8 = vsel %vm2683_vm3, %v3753_v37, %v3759_v55 }
 0x6f7   : > { %v3762_v51 = vsel %vm7999_vm11, %v3760_v8, -inf }
 0x6f8   : > { %3763 = vmax.xlane.f32.xlu1 %v3762_v51 }
 0x785   : > { %v3764_v14 = vpop.xlane.xlu1 %3763 }
 0x786   : > { %v3769_v6 = vrot.slane %v3764_v14, %v8000_v10  ;;  %v3773_v48 = vrot.slane %v3764_v14, %v8001_v15  ;;  %v3777_v52 = vrot.slane %v3764_v14, %v8002_v12  ;;  %v3785_v42 = vrot.slane %v3764_v14, %v8003_v57 }
 0x787   : > { %v3793_v41 = vrot.slane %v3764_v14, %v8004_v47  ;;  %v3781_v33 = vrot.slane %v3764_v14, %v8005_v2  ;;  %v3789_v60 = vrot.slane %v3764_v14, %v8006_v19  ;;  %v3797_v44 = vrot.slane %v3764_v14, %v8007_v45 }
 0x788   : > { %v3806_v20 = vsub.f32 %v3706_v18, %v3769_v6  ;;  %v3807_v3 = vsub.f32 %v3707_v35, %v3773_v48  ;;  %v3808_v22 = vsub.f32 %v3708_v7, %v3777_v52  ;;  %v3810_v0 = vsub.f32 %v3710_v9, %v3785_v42 }
 0x789   : > { %v3812_v4 = vsub.f32 %v3712_v36, %v3793_v41  ;;  %v3809_v26 = vsub.f32 %v3709_v27, %v3781_v33  ;;  %v3811_v38 = vsub.f32 %v3711_v40, %v3789_v60  ;;  %v3813_v17 = vsub.f32 %v3713_v28, %v3797_v44  ;;  %v345_v40 = vld [vmem:[%s302_s18] sm:$0xff] }
 0x78a   : > { %v3814_v24 = vmul.f32 1.442695, %v3806_v20  ;;  %v3816_v5 = vmul.f32 1.442695, %v3807_v3  ;;  %v3822_v56 = vmul.f32 1.442695, %v3810_v0  ;;  %4393 = vmatmul.mubr.msk.f32.vlgmr.msra.gmra.mrb[2].mxu0 %vm8008_vm7, %v345_v40 }
 0x78b   : > { %v3818_v61 = vmul.f32 1.442695, %v3808_v22  ;;  %v3826_v59 = vmul.f32 1.442695, %v3812_v4  ;;  %v3820_v58 = vmul.f32 1.442695, %v3809_v26  ;;  %4402 = vmatprep.mubr.msk.f32.mxu0 %vm8009_vm4, %v7849_v53 }
 0x78c   : > { %4520 = vpow2.f32 %v3814_v24  ;;  %v3824_v49 = vmul.f32 1.442695, %v3811_v38  ;;  %v3828_v29 = vmul.f32 1.442695, %v3813_v17 }
 0x78d   : > { %4522 = vpow2.f32 %v3816_v5 }
 0x78e   : > { %4524 = vpow2.f32 %v3822_v56 }
 0x78f   : > { %4526 = vpow2.f32 %v3818_v61 }
 0x790   : > { %4528 = vpow2.f32 %v3826_v59 }
 0x791   : > { %4530 = vpow2.f32 %v3820_v58 }
 0x792   : > { %4532 = vpow2.f32 %v3824_v49 }
 0x793   : > { %4534 = vpow2.f32 %v3828_v29 }
 0x796   : > { %v4521_v39 = vpop.eup %4520 }
 0x797   : > { %v4523_v35 = vpop.eup %4522  ;;  %3839 = vperm.xlu0 %4494, %v4521_v39  }
 0x798   : > { %3842 = vperm.xlu1 %4495, %v4523_v35   ;;  %v7517_v7 = vpop.eup %4524 }
 0x799   : > { %v4527_v30 = vpop.eup %4526 }
 0x79a   : > { %v7520_v18 = vpop.eup %4528 }
 0x79b   : > { %3851 = vperm.xlu0 %4494, %v7517_v7   ;;  %v4531_v27 = vpop.eup %4530 }
 0x79c   : > { %3845 = vperm.xlu1 %4495, %v4527_v30   ;;  %v4533_v9 = vpop.eup %4532 }
 0x79d   : > { %v4535_v16 = vpop.eup %4534 }
 0x79f   : > { %3857 = vperm.xlu0 %4494, %v7520_v18  }
 0x7a0   : > { %3848 = vperm.xlu1 %4495, %v4531_v27  }
 0x7a4   : > { %3854 = vperm.xlu1 %4495, %v4533_v9  }
 0x7a8   : > { %3860 = vperm.xlu1 %4495, %v4535_v16  }
 0x816   : > { %v3840_v36 = vpop.permute.xlu0 %3839 }
 0x817   : > { %v3843_v32 = vpop.permute.xlu1 %3842  ;;  %v3865_v34 = vrot.slane %v3840_v36, %v7074_v43 }
 0x818   : > { %v3869_v31 = vrot.slane %v3843_v32, %v7074_v43 }
 0x81a   : > { %v3852_v54 = vpop.permute.xlu0 %3851  ;;  %v3894_v46 = vsel %vm2671_vm10, %v3869_v31, %v3865_v34 }
 0x81b   : > { %v3846_v50 = vpop.permute.xlu1 %3845  ;;  %v3881_v53 = vrot.slane %v3852_v54, %v7074_v43 }
 0x81c   : > { %v3873_v62 = vrot.slane %v3846_v50, %v7074_v43 }
 0x81e   : > { %v3895_v21 = vsel %vm2673_vm15, %v3873_v62, %v3894_v46  ;;  %v3858_v13 = vpop.permute.xlu0 %3857 }
 0x81f   : > { %v3849_v1 = vpop.permute.xlu1 %3848  ;;  %v3889_v8 = vrot.slane %v3858_v13, %v7074_v43 }
 0x820   : > { %v3877_v11 = vrot.slane %v3849_v1, %v7074_v43 }
 0x822   : > { %v3896_v28 = vsel %vm2675_vm5, %v3877_v11, %v3895_v21  ;;  %v4364_v11 = vld [vmem:[%s7637_s4 + $0x3] ss:$0 sm:$0xff] }
 0x823   : > { %v3855_v25 = vpop.permute.xlu1 %3854  ;;  %v3897_v23 = vsel %vm2677_vm13, %v3881_v53, %v3896_v28 }
 0x824   : > { %v3885_v37 = vrot.slane %v3855_v25, %v7074_v43 }
 0x826   : > { %v3898_v55 = vsel %vm2679_vm6, %v3885_v37, %v3897_v23 }
 0x827   : > { %v3861_v51 = vpop.permute.xlu1 %3860  ;;  %v3899_v6 = vsel %vm2681_vm1, %v3889_v8, %v3898_v55 }
 0x828   : > { %v3893_v14 = vrot.slane %v3861_v51, %v7074_v43 }
 0x82a   : > { %v3900_v48 = vsel %vm2683_vm3, %v3893_v14, %v3899_v6 }
 0x82b   : > { %v3902_v52 = vsel %vm8010_vm8, %v3900_v48, 0.0 }
 0x82c   : > { %3903 = vadd.xlane.f32.xlu0 %v3902_v52 }
 0x8b9   : > { %v3904_v42 = vpop.xlane.xlu0 %3903 }
 0x8ba   : > { %4536 = vrcp.f32 %v3904_v42 }
 0x8c4   : > { %v4537_v41 = vpop.eup %4536 }
 0x8c5   : > { %v3938_v20 = vrot.slane %v4537_v41, %v8007_v45  ;;  %v3910_v3 = vrot.slane %v4537_v41, %v8000_v10  ;;  %v3914_v0 = vrot.slane %v4537_v41, %v8001_v15  ;;  %v3918_v5 = vrot.slane %v4537_v41, %v8002_v12  ;;  %v607_v45 = vpop.f32.mrb[2].mxu0 }
 0x8c6   : > { %v3922_v56 = vrot.slane %v4537_v41, %v8005_v2  ;;  %v3926_v26 = vrot.slane %v4537_v41, %v8003_v57  ;;  %v3930_v61 = vrot.slane %v4537_v41, %v8006_v19  ;;  %v3934_v59 = vrot.slane %v4537_v41, %v8004_v47  ;;  %v4345_v2 = vld [vmem:[%s7637_s4 + $0x2] ss:$0 sm:$0xff]  ;;  %v4394_v38 = vpop.f32.mrb[3].mxu0  ;;  %v352_v57 = vld [vmem:[#allocation8 + $0x18] sm:$0xff] }
 0x8c7   : > { %v3954_v33 = vmul.f32 %v4535_v16, %v3938_v20  ;;  %v3947_v22 = vmul.f32 %v4521_v39, %v3910_v3  ;;  %v3948_v24 = vmul.f32 %v4523_v35, %v3914_v0  ;;  %v3949_v4 = vmul.f32 %v4527_v30, %v3918_v5  ;;  %4401 = vmatpush3.msra.mxu0 %v352_v57 }
 0x8c8   : > { %v3950_v60 = vmul.f32 %v4531_v27, %v3922_v56  ;;  %v3951_v10 = vmul.f32 %v7517_v7, %v3926_v26  ;;  %v3952_v15 = vmul.f32 %v4533_v9, %v3930_v61  ;;  %v3953_v12 = vmul.f32 %v7520_v18, %v3934_v59 }
 0x8c9   : > { %3985 = vperm.xlu0 %4494, %v3954_v33   ;;  %3964 = vperm.xlu1 %4495, %v3947_v22   ;;  %v608_v44 = vadd.f32 %v4345_v2, %v607_v45 }
 0x8cb   : > { %4396 = vmatpush3.msra.mxu1 %v608_v44 }
 0x8cd   : > { %3967 = vperm.xlu1 %4495, %v3948_v24  }
 0x8d1   : > { %3970 = vperm.xlu1 %4495, %v3949_v4  }
 0x8d5   : > { %3973 = vperm.xlu1 %4495, %v3950_v60  }
 0x8d9   : > { %3976 = vperm.xlu1 %4495, %v3951_v10  }
 0x8dd   : > { %3979 = vperm.xlu1 %4495, %v3952_v15  }
 0x8e1   : > { %3982 = vperm.xlu1 %4495, %v3953_v12  }
 0x948   : > { %v3965_v58 = vpop.permute.xlu1 %3964  ;;  %v3986_v16 = vpop.permute.xlu0 %3985 }
 0x949   : > { %v3990_v29 = vrot.slane %v3965_v58, %v7074_v43  ;;  %v4018_v31 = vrot.slane %v3986_v16, %v7074_v43 }
 0x94c   : > { %v3968_v19 = vpop.permute.xlu1 %3967 }
 0x94d   : > { %v3994_v47 = vrot.slane %v3968_v19, %v7074_v43 }
 0x94f   : > { %v4019_v27 = vsel %vm2671_vm10, %v3994_v47, %v3990_v29  ;;  %vm8011_vm10 = vmmov %vm7972_vm0 }
 0x950   : > { %v3971_v17 = vpop.permute.xlu1 %3970 }
 0x951   : > { %v3998_v35 = vrot.slane %v3971_v17, %v7074_v43 }
 0x953   : > { %v4020_v63 = vsel %vm2673_vm15, %v3998_v35, %v4019_v27  ;;  %vm8013_vm15 = vmmov %vm7972_vm0 }
 0x954   : > { %v3974_v49 = vpop.permute.xlu1 %3973 }
 0x955   : > { %v4002_v7 = vrot.slane %v3974_v49, %v7074_v43 }
 0x957   : > { %v4021_v40 = vsel %vm2675_vm5, %v4002_v7, %v4020_v63  ;;  %vm8015_vm5 = vmmov %vm7972_vm0 }
 0x958   : > { %v3977_v39 = vpop.permute.xlu1 %3976 }
 0x959   : > { %v4006_v18 = vrot.slane %v3977_v39, %v7074_v43 }
 0x95b   : > { %v4022_v36 = vsel %vm2677_vm13, %v4006_v18, %v4021_v40 }
 0x95c   : > { %v3980_v30 = vpop.permute.xlu1 %3979 }
 0x95d   : > { %v4010_v9 = vrot.slane %v3980_v30, %v7074_v43 }
 0x95f   : > { %v4023_v34 = vsel %vm2679_vm6, %v4010_v9, %v4022_v36 }
 0x960   : > { %v3983_v32 = vpop.permute.xlu1 %3982 }
 0x961   : > { %v4014_v50 = vrot.slane %v3983_v32, %v7074_v43 }
 0x963   : > { %v4024_v62 = vsel %vm2681_vm1, %v4014_v50, %v4023_v34 }
 0x964   : > { %v4025_v54 = vsel %vm2683_vm3, %v4018_v31, %v4024_v62 }
 0x965   : > { %4398 = vmatmul.mubr.msk.f32.vlgmr.msra.gmra.mrb[2].mxu1 %vm8011_vm10, %v4025_v54 }
 0xa38   : > { %v4094_v1 = vpop.f32.mrb[2].mxu1 }
 0xa39   : > { %v4399_v46 = vpop.f32.mrb[3].mxu1  ;;  %4403 = vmatmul.mubr.msk.f32.vlgmr.msra.gmra.mrb[4].mxu0 %vm8013_vm15, %v4094_v1 }
 0xb0c   : > { %v4171_v43 = vpop.f32.mrb[4].mxu0 }
 0xb0d   : > { %v4172_v21 = vadd.f32 %v4364_v11, %v4171_v43  ;;  %v4404_v28 = vpop.f32.mrb[5].mxu0 }
 0xb0f   : > { %4175 = vst.msk [vmem:[%s342_s17] sm:$0xff] %vm8015_vm5, %v4172_v21 }
 0xb10   : > { %4669 = shalt.err (!%p4666_p12)
}
 0xb11   : > { %s4670_s15 = scalar_lea.hbm %s7583_s7, 128  ;;  %s4674_s18 = scalar_lea.hbm %s8014_s27, 256 }
 0xb12   : > { %p4671_p0 = scmp.ne.s32.totalorder %s7583_s7, %s4670_s15  ;;  %p4675_p9 = scmp.lt.u32.totalorder %s7583_s7, %s8014_s27 }
 0xb13   : > { %p4676_p4 = scmp.lt.u32.totalorder %s4674_s18, %s4670_s15  ;;  %p4678_p5 = scmp.lt.u32.totalorder %s4670_s15, %s7583_s7 }
 0xb14   : > { %p4672_p11 = pnand %p4671_p0, %p8016_p10 }
 0xb15   : > { %p4677_p2 = por %p4676_p4, %p4675_p9 }
 0xb16   : > { %p4673_p1 = pneg %p4672_p11 }
 0xb17   : > { %p4679_p13 = por %p4678_p5, %p4677_p2 }
 0xb19   : > { %p4680_p7 = pnand %p4679_p13, %p4673_p1 }
 0xb1b   : > { %4683 = shalt.err (!%p4680_p7)
}
 0xb1c   : > { %4415 = dma.vmem_to_hbm [thread:$0]  (%p8016_p10), %s7585_s11, 128, %s7583_s7, %s4177_s9  }
 0xb1d PF: > { %s8017_s10 = sld [smem:[#allocation15_spill]]  ;;  %s8018_s23 = sld [smem:[#allocation21_spill]] }
 0xb1e   : > { %s8019_s22 = sld [smem:[#allocation17_spill]] }
 0xb23   : > { %s4203_s24 = sand.u32 1, %s8017_s10   ;;  %p8020_p3 = scmp.ne.s32.totalorder %s8018_s23, 0 }
 0xb24   : > { %p8021_p6 = scmp.ge.s32.totalorder %s8019_s22, 2  ;;  %s4204_s8 = scalar_lea.sflag [#allocation4], %s4203_s24 }
 0xb26   : > { %p4432_p8 = pnand %p8021_p6, %p8020_p3 }
 0xb28   : > { %4721 = dma.done.wait (!%p4432_p8), %s4204_s8, 128  }
 0xb29   : > { %4723 = vsyncadd (!%p4432_p8), %s4204_s8, 4294967168  ;;  %s25_s23 = sadd.s32 1, %s8019_s22   ;;  %s8022_s6 = sld [smem:[#allocation19_spill]] }
 0xb2a   : > { %p22_p12 = scmp.ge.s32.totalorder %s25_s23, 4   ;;  %s8023_s21 = sld [smem:[#allocation16_spill]] }
 0xb2b   : > { %s8024_s22 = sld [smem:[#allocation18_spill]]  ;;  %s8025_s18 = smov %s4730_s19 }
 0xb2c   : > { %s8026_s19 = smov %s4734_s20  ;;  %24 = sbr.rel (!%p22_p12) target bundleno = 12 (0xc), region = 116 }
 0xb2f   : > { %s8027_s20 = smov %s8022_s6 }
 0xb33   :  { %4209 = vsyncpa [#allocation3], 1 }
 0xb34   :  { %4211 = vsyncpa [#allocation3 + $0x1], 1 }
 0xb35   :  { %4212 = vsyncpa [#allocation6], 1 }
 0xb36   :  { %4214 = vsyncpa [#allocation6 + $0x1], 1 }
 0xb37   :  { %4215 = vsyncpa [#allocation9], 1 }
 0xb38   :  { %4216 = vsyncpa [#allocation4], 1 }
 0xb39   :  { %4218 = vsyncpa [#allocation4 + $0x1], 1 }

</bundles_post_ra>
